<compile_context>
chip_gen: v6e
topology: v6e:2x2x1
jax: 0.10.0
libtpu: 0.0.40
codegen_flags: <defaults>
</compile_context>

<pallas_src>
import functools

import jax
import jax.numpy as jnp
from jax import lax
from jax.experimental import pallas as pl
from jax.experimental.pallas import tpu as pltpu

KSIZE = 7
PAD = (KSIZE - 1) // 2  # = 3
CG = 8                  # channels per sublane group


def _pick_rows_per_chunk(H, W):
    """Rows per chunk R: R | H and (R*W) % 128 == 0, targeting >=256 lanes."""
    valid = [r for r in range(1, H + 1) if H % r == 0 and (r * W) % 128 == 0]
    if not valid:
        return H                       # degenerate fallback: single chunk
    for r in valid:                    # ascending
        if r * W >= 256:
            return r
    return valid[-1]


def _spatial_gate_kernel(w_ref, b_ref, x_ref, o_ref, pm_ref, pa_ref, sflat_ref,
                         *, H, W, R, apply_in_input_dtype):
    # w_ref    : (98,) f32 SMEM   -- flattened conv weight [max ch | mean ch]
    # b_ref    : (1,)  f32 SMEM   -- conv bias
    # x_ref    : (1, C, H*W)      -- lane-dense input block (VMEM)
    # o_ref    : (1, C, H*W)      -- lane-dense output block (VMEM)
    # pm_ref   : (H+6, W+6) f32   -- zero-padded channel-max map (scratch)
    # pa_ref   : (H+6, W+6) f32   -- zero-padded channel-mean map (scratch)
    # sflat_ref: (1, R*W)   f32   -- per-chunk flattened sigmoid scale (scratch)
    C = x_ref.shape[1]
    CHUNK = R * W
    NJ = H // R                      # number of row chunks
    NCG = C // CG                    # full 8-channel sublane groups
    CREM = C - NCG * CG              # leftover channels
    Hp, Wp = H + 2 * PAD, W + 2 * PAD
    inv_c = jnp.float32(1.0 / C)

    def lane_slice(j):
        if NJ == 1:
            return slice(None)                           # single chunk: static
        return pl.ds(pl.multiple_of(j * CHUNK, 128), CHUNK)

    # ---- Phase 0: zero only the 3-wide pad border of the tiny maps ----------
    # (done every step, not only at program_id==0: scratch is per-core under
    #  megacore partitioning, so a program_id==0 guard would be unsafe)
    for ref in (pm_ref, pa_ref):
        ref[0:PAD, :] = jnp.zeros((PAD, Wp), jnp.float32)
        ref[PAD + H:, :] = jnp.zeros((PAD, Wp), jnp.float32)
        ref[:, 0:PAD] = jnp.zeros((Hp, PAD), jnp.float32)
        ref[:, PAD + W:] = jnp.zeros((Hp, PAD), jnp.float32)

    # ---- Phase 1: fused channel max + mean, chunked, 8-channel groups -------
    def reduce_chunk(j, carry):
        ls = lane_slice(j)
        m_part = None
        s_part = None
        if NCG > 0:
            def cg_body(g, mc_sc):
                mc, sc = mc_sc
                c0 = pl.multiple_of(g * CG, CG)
                rows = x_ref[0, pl.ds(c0, CG), ls].astype(jnp.float32)  # (8,CHUNK)
                return jnp.maximum(mc, rows), sc + rows
            macc, sacc = lax.fori_loop(
                0, NCG, cg_body,
                (jnp.full((CG, CHUNK), -jnp.inf, jnp.float32),
                 jnp.zeros((CG, CHUNK), jnp.float32)))
            m_part = jnp.max(macc, axis=0, keepdims=True)               # (1,CHUNK)
            s_part = jnp.sum(sacc, axis=0, keepdims=True)
        if CREM > 0:
            rows = x_ref[0, NCG * CG:C, ls].astype(jnp.float32)         # (CREM,CHUNK)
            mr = jnp.max(rows, axis=0, keepdims=True)
            sr = jnp.sum(rows, axis=0, keepdims=True)
            m_part = mr if m_part is None else jnp.maximum(m_part, mr)
            s_part = sr if s_part is None else s_part + sr
        a_part = s_part * inv_c                                         # mean

        # Scatter the R rows of this chunk into the padded 2-D maps (tiny data).
        for r in range(R):                                              # static
            hrow = j * R + r + PAD
            pm_ref[pl.ds(hrow, 1), PAD:PAD + W] = m_part[:, r * W:(r + 1) * W]
            pa_ref[pl.ds(hrow, 1), PAD:PAD + W] = a_part[:, r * W:(r + 1) * W]
        return carry

    if NJ == 1:
        reduce_chunk(0, 0)
    else:
        lax.fori_loop(0, NJ, reduce_chunk, 0)

    # ---- Phase 2: 7x7 VPU conv + sigmoid + gate apply, chunked --------------
    def conv_apply_chunk(j, carry):
        ls = lane_slice(j)
        h0 = j * R
        # Padded-map rows feeding output rows [h0, h0+R): rows [h0, h0+R+6).
        pm_rows = pm_ref[pl.ds(h0, R + 2 * PAD), :]                     # (R+6,Wp)
        pa_rows = pa_ref[pl.ds(h0, R + 2 * PAD), :]
        # Hoist the 7 kw lane shifts out of the 49-tap loop.
        sh_m = [pm_rows[:, kw:kw + W] for kw in range(KSIZE)]           # (R+6,W)
        sh_a = [pa_rows[:, kw:kw + W] for kw in range(KSIZE)]
        # 7 per-kh partial accumulators, tree-summed (no 98-add serial chain).
        parts = []
        for kh in range(KSIZE):
            acc = None
            for kw in range(KSIZE):
                wm = w_ref[kh * KSIZE + kw]                             # max tap
                wa = w_ref[KSIZE * KSIZE + kh * KSIZE + kw]             # mean tap
                t = wm * sh_m[kw][kh:kh + R, :] + wa * sh_a[kw][kh:kh + R, :]
                acc = t if acc is None else acc + t
            parts.append(acc)
        conv = (((parts[0] + parts[1]) + (parts[2] + parts[3]))
                + ((parts[4] + parts[5]) + parts[6])) + b_ref[0]
        scale2d = jax.nn.sigmoid(conv)                                  # (R,W) f32

        # Relayout the tiny (R, W) scale to a flat (1, R*W) lane vector.
        for r in range(R):                                              # static
            sflat_ref[:, r * W:(r + 1) * W] = scale2d[r:r + 1, :]
        scale_flat = sflat_ref[...]                                     # (1,CHUNK)

        if apply_in_input_dtype:
            scale_b = jnp.broadcast_to(scale_flat.astype(o_ref.dtype), (CG, CHUNK))
        else:
            scale_b = jnp.broadcast_to(scale_flat, (CG, CHUNK))

        def mul_body(g, c):
            c0 = pl.multiple_of(g * CG, CG)
            xs = x_ref[0, pl.ds(c0, CG), ls]                            # (8,CHUNK)
            if apply_in_input_dtype:
                o_ref[0, pl.ds(c0, CG), ls] = xs * scale_b
            else:
                o_ref[0, pl.ds(c0, CG), ls] = (
                    xs.astype(jnp.float32) * scale_b).astype(o_ref.dtype)
            return c
        if NCG > 0:
            lax.fori_loop(0, NCG, mul_body, 0)
        if CREM > 0:
            xs = x_ref[0, NCG * CG:C, ls]
            if apply_in_input_dtype:
                o_ref[0, NCG * CG:C, ls] = xs * scale_b[0:CREM, :]
            else:
                o_ref[0, NCG * CG:C, ls] = (
                    xs.astype(jnp.float32) * scale_b[0:CREM, :]).astype(o_ref.dtype)
        return carry

    if NJ == 1:
        conv_apply_chunk(0, 0)
    else:
        lax.fori_loop(0, NJ, conv_apply_chunk, 0)


def spatial_gate(x, weight, bias, *, apply_in_input_dtype=None):
    """x: (N, C, H, W); weight: (1, 2, 7, 7); bias: (1,)."""
    N, C, H, W = x.shape
    HW = H * W
    Hp, Wp = H + 2 * PAD, W + 2 * PAD
    R = _pick_rows_per_chunk(H, W)
    CHUNK = R * W

    try:
        kind = jax.devices()[0].device_kind.lower()
    except Exception:
        kind = ""
    if apply_in_input_dtype is None:
        # bf16 final multiply only where the VPU has bf16 ALUs (v6e/v7x, not v5e).
        apply_in_input_dtype = bool(x.dtype == jnp.bfloat16 and "v5" not in kind)

    # Free row-major collapse: lane-dense (last dim H*W) view, no HBM movement.
    xr = x.reshape(N, C, HW)
    w_flat = weight.reshape(-1).astype(jnp.float32)        # (98,) [max | mean]
    b = bias.reshape(1).astype(jnp.float32)

    kernel = functools.partial(
        _spatial_gate_kernel, H=H, W=W, R=R,
        apply_in_input_dtype=apply_in_input_dtype)

    # Size the VMEM budget from the actual footprint (double-buffered in+out
    # blocks + scratch), clamped per generation.
    block_bytes = C * HW * x.dtype.itemsize
    scratch_bytes = (2 * Hp * Wp + CHUNK) * 4
    cap = (56 if "v7" in kind else 110) * 1024 * 1024
    vmem_limit = int(min(cap, max(8 * 1024 * 1024,
                                  4 * block_bytes + scratch_bytes + (4 << 20))))

    out = pl.pallas_call(
        kernel,
        out_shape=jax.ShapeDtypeStruct((N, C, HW), x.dtype),
        grid=(N,),
        in_specs=[
            pl.BlockSpec(memory_space=pltpu.MemorySpace.SMEM),   # conv weights
            pl.BlockSpec(memory_space=pltpu.MemorySpace.SMEM),   # conv bias
            pl.BlockSpec((1, C, HW), lambda n: (n, 0, 0)),
        ],
        out_specs=pl.BlockSpec((1, C, HW), lambda n: (n, 0, 0)),
        scratch_shapes=[
            pltpu.VMEM((Hp, Wp), jnp.float32),    # padded channel-max map
            pltpu.VMEM((Hp, Wp), jnp.float32),    # padded channel-mean map
            pltpu.VMEM((1, CHUNK), jnp.float32),  # per-chunk flattened scale
        ],
        compiler_params=pltpu.CompilerParams(
            dimension_semantics=("parallel",),
            vmem_limit_bytes=vmem_limit),
    )(w_flat, b, xr)
    return out.reshape(N, C, H, W)


def spatial_gate_ref(x, weight, bias):
    """Pure-JAX reference mirroring the PyTorch module."""
    xmax = jnp.max(x, axis=1, keepdims=True)
    xmean = jnp.mean(x, axis=1, keepdims=True)
    xc = jnp.concatenate([xmax, xmean], axis=1)
    y = jax.lax.conv_general_dilated(
        xc, weight, window_strides=(1, 1),
        padding=((PAD, PAD), (PAD, PAD)),
        dimension_numbers=("NCHW", "OIHW", "NCHW"))
    y = y + bias.reshape(1, 1, 1, 1)
    return x * jax.nn.sigmoid(y)


if __name__ == "__main__":
    key = jax.random.PRNGKey(0)
    kx1, kx2, kx3, kw_, kb = jax.random.split(key, 5)

    # Deterministic synthetic parameters for Conv2d(2, 1, 7, padding=3).
    weight = 0.1 * jax.random.normal(kw_, (1, 2, KSIZE, KSIZE), dtype=jnp.float32)
    bias = 0.1 * jax.random.normal(kb, (1,), dtype=jnp.float32)

    # Case 1: C < 8 (remainder-only channel path), single lane chunk.
    x1 = jax.random.normal(kx1, (2, 4, 16, 16), dtype=jnp.float32)
    o1 = jax.block_until_ready(spatial_gate(x1, weight, bias))
    r1 = spatial_gate_ref(x1, weight, bias)
    assert jnp.allclose(o1, r1, atol=1e-5, rtol=1e-5), \
        f"case1 max_err={float(jnp.max(jnp.abs(o1 - r1)))}"

    # Case 2: multiple lane chunks + full 8-channel sublane groups.
    x2 = jax.random.normal(kx2, (1, 16, 16, 32), dtype=jnp.float32)
    o2 = jax.block_until_ready(spatial_gate(x2, weight, bias))
    r2 = spatial_gate_ref(x2, weight, bias)
    assert jnp.allclose(o2, r2, atol=1e-5, rtol=1e-5), \
        f"case2 max_err={float(jnp.max(jnp.abs(o2 - r2)))}"

    # Case 3: bf16 input, mixed full-group + remainder channels, bf16 apply.
    x3 = jax.random.normal(kx3, (1, 10, 16, 32), dtype=jnp.float32).astype(jnp.bfloat16)
    o3 = jax.block_until_ready(spatial_gate(x3, weight, bias))
    r3 = spatial_gate_ref(x3.astype(jnp.float32), weight, bias)
    assert jnp.allclose(o3.astype(jnp.float32), r3, atol=5e-2, rtol=5e-2), \
        f"case3 max_err={float(jnp.max(jnp.abs(o3.astype(jnp.float32) - r3)))}"

    print("KERNEL_OK")
</pallas_src>

<mosaic_0001>
module attributes {stable_mosaic.version = 11 : i64} {
  func.func @_spatial_gate_kernel(%arg0: i32, %arg1: memref<98xf32, #tpu.memory_space<smem>>, %arg2: memref<1xf32, #tpu.memory_space<smem>>, %arg3: memref<1x4x256xf32, #tpu.memory_space<vmem>>, %arg4: memref<1x4x256xf32, #tpu.memory_space<vmem>>, %arg5: memref<22x22xf32, #tpu.memory_space<vmem>>, %arg6: memref<22x22xf32, #tpu.memory_space<vmem>>, %arg7: memref<1x256xf32, #tpu.memory_space<vmem>>) attributes {dimension_semantics = [#tpu.dimension_semantics<parallel>], iteration_bounds = array<i64: 2>, scalar_prefetch = 0 : i64, scratch_operands = 3 : i64, tpu.core_type = #tpu.core_type<tc>, window_params = [{transform_indices = @transform_0, window_bounds = array<i64: 98>}, {transform_indices = @transform_1, window_bounds = array<i64: 1>}, {transform_indices = @transform_2, window_bounds = array<i64: 1, 4, 256>}, {transform_indices = @transform_3, window_bounds = array<i64: 1, 4, 256>}]} {
    %cst = arith.constant 0.000000e+00 : f32
    %0 = vector.broadcast %cst : f32 to vector<3x22xf32>
    %c0 = arith.constant 0 : index
    %c0_0 = arith.constant 0 : index
    %1 = vector.load %arg5[%c0, %c0_0] : memref<22x22xf32, #tpu.memory_space<vmem>>, vector<3x22xf32>
    tpu.vector_store %arg5[%c0, %c0_0], %0 {strides = array<i32>} : memref<22x22xf32, #tpu.memory_space<vmem>>, vector<3x22xf32>,
    %cst_1 = arith.constant 0.000000e+00 : f32
    %2 = vector.broadcast %cst_1 : f32 to vector<3x22xf32>
    %c19 = arith.constant 19 : index
    %c0_2 = arith.constant 0 : index
    %3 = vector.load %arg5[%c19, %c0_2] : memref<22x22xf32, #tpu.memory_space<vmem>>, vector<3x22xf32>
    tpu.vector_store %arg5[%c19, %c0_2], %2 {strides = array<i32>} : memref<22x22xf32, #tpu.memory_space<vmem>>, vector<3x22xf32>,
    %cst_3 = arith.constant 0.000000e+00 : f32
    %4 = vector.broadcast %cst_3 : f32 to vector<22x3xf32>
    %c0_4 = arith.constant 0 : index
    %c0_5 = arith.constant 0 : index
    %5 = vector.load %arg5[%c0_4, %c0_5] : memref<22x22xf32, #tpu.memory_space<vmem>>, vector<22x3xf32>
    tpu.vector_store %arg5[%c0_4, %c0_5], %4 {strides = array<i32>} : memref<22x22xf32, #tpu.memory_space<vmem>>, vector<22x3xf32>,
    %cst_6 = arith.constant 0.000000e+00 : f32
    %6 = vector.broadcast %cst_6 : f32 to vector<22x3xf32>
    %c0_7 = arith.constant 0 : index
    %c19_8 = arith.constant 19 : index
    %7 = vector.load %arg5[%c0_7, %c19_8] : memref<22x22xf32, #tpu.memory_space<vmem>>, vector<22x3xf32>
    tpu.vector_store %arg5[%c0_7, %c19_8], %6 {strides = array<i32>} : memref<22x22xf32, #tpu.memory_space<vmem>>, vector<22x3xf32>,
    %cst_9 = arith.constant 0.000000e+00 : f32
    %8 = vector.broadcast %cst_9 : f32 to vector<3x22xf32>
    %c0_10 = arith.constant 0 : index
    %c0_11 = arith.constant 0 : index
    %9 = vector.load %arg6[%c0_10, %c0_11] : memref<22x22xf32, #tpu.memory_space<vmem>>, vector<3x22xf32>
    tpu.vector_store %arg6[%c0_10, %c0_11], %8 {strides = array<i32>} : memref<22x22xf32, #tpu.memory_space<vmem>>, vector<3x22xf32>,
    %cst_12 = arith.constant 0.000000e+00 : f32
    %10 = vector.broadcast %cst_12 : f32 to vector<3x22xf32>
    %c19_13 = arith.constant 19 : index
    %c0_14 = arith.constant 0 : index
    %11 = vector.load %arg6[%c19_13, %c0_14] : memref<22x22xf32, #tpu.memory_space<vmem>>, vector<3x22xf32>
    tpu.vector_store %arg6[%c19_13, %c0_14], %10 {strides = array<i32>} : memref<22x22xf32, #tpu.memory_space<vmem>>, vector<3x22xf32>,
    %cst_15 = arith.constant 0.000000e+00 : f32
    %12 = vector.broadcast %cst_15 : f32 to vector<22x3xf32>
    %c0_16 = arith.constant 0 : index
    %c0_17 = arith.constant 0 : index
    %13 = vector.load %arg6[%c0_16, %c0_17] : memref<22x22xf32, #tpu.memory_space<vmem>>, vector<22x3xf32>
    tpu.vector_store %arg6[%c0_16, %c0_17], %12 {strides = array<i32>} : memref<22x22xf32, #tpu.memory_space<vmem>>, vector<22x3xf32>,
    %cst_18 = arith.constant 0.000000e+00 : f32
    %14 = vector.broadcast %cst_18 : f32 to vector<22x3xf32>
    %c0_19 = arith.constant 0 : index
    %c19_20 = arith.constant 19 : index
    %15 = vector.load %arg6[%c0_19, %c19_20] : memref<22x22xf32, #tpu.memory_space<vmem>>, vector<22x3xf32>
    tpu.vector_store %arg6[%c0_19, %c19_20], %14 {strides = array<i32>} : memref<22x22xf32, #tpu.memory_space<vmem>>, vector<22x3xf32>,
    %c0_21 = arith.constant 0 : index
    %c0_22 = arith.constant 0 : index
    %c0_23 = arith.constant 0 : index
    %16 = vector.load %arg3[%c0_21, %c0_22, %c0_23] : memref<1x4x256xf32, #tpu.memory_space<vmem>>, vector<1x4x256xf32>
    %17 = vector.shape_cast %16 : vector<1x4x256xf32> to vector<4x256xf32>
    %cst_24 = arith.constant dense<0xFF800000> : vector<256xf32>
    %18 = vector.multi_reduction <maximumf>, %17, %cst_24 [0] : vector<4x256xf32> to vector<256xf32>
    %19 = vector.shape_cast %18 : vector<256xf32> to vector<1x256xf32>
    %cst_25 = arith.constant dense<0.000000e+00> : vector<256xf32>
    %20 = vector.multi_reduction <add>, %17, %cst_25 [0] : vector<4x256xf32> to vector<256xf32>
    %21 = vector.shape_cast %20 : vector<256xf32> to vector<1x256xf32>
    %cst_26 = arith.constant 2.500000e-01 : f32
    %22 = vector.broadcast %cst_26 : f32 to vector<1x256xf32>
    %23 = arith.mulf %21, %22 : vector<1x256xf32>
    %24 = vector.extract_strided_slice %19 {offsets = [0, 0], sizes = [1, 16], strides = [1, 1]} : vector<1x256xf32> to vector<1x16xf32>
    %c3 = arith.constant 3 : index
    %c3_27 = arith.constant 3 : index
    %25 = vector.load %arg5[%c3, %c3_27] : memref<22x22xf32, #tpu.memory_space<vmem>>, vector<1x16xf32>
    tpu.vector_store %arg5[%c3, %c3_27], %24 {strides = array<i32>} : memref<22x22xf32, #tpu.memory_space<vmem>>, vector<1x16xf32>,
    %26 = vector.extract_strided_slice %23 {offsets = [0, 0], sizes = [1, 16], strides = [1, 1]} : vector<1x256xf32> to vector<1x16xf32>
    %c3_28 = arith.constant 3 : index
    %c3_29 = arith.constant 3 : index
    %27 = vector.load %arg6[%c3_28, %c3_29] : memref<22x22xf32, #tpu.memory_space<vmem>>, vector<1x16xf32>
    tpu.vector_store %arg6[%c3_28, %c3_29], %26 {strides = array<i32>} : memref<22x22xf32, #tpu.memory_space<vmem>>, vector<1x16xf32>,
    %28 = vector.extract_strided_slice %19 {offsets = [0, 16], sizes = [1, 16], strides = [1, 1]} : vector<1x256xf32> to vector<1x16xf32>
    %c4 = arith.constant 4 : index
    %c3_30 = arith.constant 3 : index
    %29 = vector.load %arg5[%c4, %c3_30] : memref<22x22xf32, #tpu.memory_space<vmem>>, vector<1x16xf32>
    tpu.vector_store %arg5[%c4, %c3_30], %28 {strides = array<i32>} : memref<22x22xf32, #tpu.memory_space<vmem>>, vector<1x16xf32>,
    %30 = vector.extract_strided_slice %23 {offsets = [0, 16], sizes = [1, 16], strides = [1, 1]} : vector<1x256xf32> to vector<1x16xf32>
    %c4_31 = arith.constant 4 : index
    %c3_32 = arith.constant 3 : index
    %31 = vector.load %arg6[%c4_31, %c3_32] : memref<22x22xf32, #tpu.memory_space<vmem>>, vector<1x16xf32>
    tpu.vector_store %arg6[%c4_31, %c3_32], %30 {strides = array<i32>} : memref<22x22xf32, #tpu.memory_space<vmem>>, vector<1x16xf32>,
    %32 = vector.extract_strided_slice %19 {offsets = [0, 32], sizes = [1, 16], strides = [1, 1]} : vector<1x256xf32> to vector<1x16xf32>
    %c5 = arith.constant 5 : index
    %c3_33 = arith.constant 3 : index
    %33 = vector.load %arg5[%c5, %c3_33] : memref<22x22xf32, #tpu.memory_space<vmem>>, vector<1x16xf32>
    tpu.vector_store %arg5[%c5, %c3_33], %32 {strides = array<i32>} : memref<22x22xf32, #tpu.memory_space<vmem>>, vector<1x16xf32>,
    %34 = vector.extract_strided_slice %23 {offsets = [0, 32], sizes = [1, 16], strides = [1, 1]} : vector<1x256xf32> to vector<1x16xf32>
    %c5_34 = arith.constant 5 : index
    %c3_35 = arith.constant 3 : index
    %35 = vector.load %arg6[%c5_34, %c3_35] : memref<22x22xf32, #tpu.memory_space<vmem>>, vector<1x16xf32>
    tpu.vector_store %arg6[%c5_34, %c3_35], %34 {strides = array<i32>} : memref<22x22xf32, #tpu.memory_space<vmem>>, vector<1x16xf32>,
    %36 = vector.extract_strided_slice %19 {offsets = [0, 48], sizes = [1, 16], strides = [1, 1]} : vector<1x256xf32> to vector<1x16xf32>
    %c6 = arith.constant 6 : index
    %c3_36 = arith.constant 3 : index
    %37 = vector.load %arg5[%c6, %c3_36] : memref<22x22xf32, #tpu.memory_space<vmem>>, vector<1x16xf32>
    tpu.vector_store %arg5[%c6, %c3_36], %36 {strides = array<i32>} : memref<22x22xf32, #tpu.memory_space<vmem>>, vector<1x16xf32>,
    %38 = vector.extract_strided_slice %23 {offsets = [0, 48], sizes = [1, 16], strides = [1, 1]} : vector<1x256xf32> to vector<1x16xf32>
    %c6_37 = arith.constant 6 : index
    %c3_38 = arith.constant 3 : index
    %39 = vector.load %arg6[%c6_37, %c3_38] : memref<22x22xf32, #tpu.memory_space<vmem>>, vector<1x16xf32>
    tpu.vector_store %arg6[%c6_37, %c3_38], %38 {strides = array<i32>} : memref<22x22xf32, #tpu.memory_space<vmem>>, vector<1x16xf32>,
    %40 = vector.extract_strided_slice %19 {offsets = [0, 64], sizes = [1, 16], strides = [1, 1]} : vector<1x256xf32> to vector<1x16xf32>
    %c7 = arith.constant 7 : index
    %c3_39 = arith.constant 3 : index
    %41 = vector.load %arg5[%c7, %c3_39] : memref<22x22xf32, #tpu.memory_space<vmem>>, vector<1x16xf32>
    tpu.vector_store %arg5[%c7, %c3_39], %40 {strides = array<i32>} : memref<22x22xf32, #tpu.memory_space<vmem>>, vector<1x16xf32>,
    %42 = vector.extract_strided_slice %23 {offsets = [0, 64], sizes = [1, 16], strides = [1, 1]} : vector<1x256xf32> to vector<1x16xf32>
    %c7_40 = arith.constant 7 : index
    %c3_41 = arith.constant 3 : index
    %43 = vector.load %arg6[%c7_40, %c3_41] : memref<22x22xf32, #tpu.memory_space<vmem>>, vector<1x16xf32>
    tpu.vector_store %arg6[%c7_40, %c3_41], %42 {strides = array<i32>} : memref<22x22xf32, #tpu.memory_space<vmem>>, vector<1x16xf32>,
    %44 = vector.extract_strided_slice %19 {offsets = [0, 80], sizes = [1, 16], strides = [1, 1]} : vector<1x256xf32> to vector<1x16xf32>
    %c8 = arith.constant 8 : index
    %c3_42 = arith.constant 3 : index
    %45 = vector.load %arg5[%c8, %c3_42] : memref<22x22xf32, #tpu.memory_space<vmem>>, vector<1x16xf32>
    tpu.vector_store %arg5[%c8, %c3_42], %44 {strides = array<i32>} : memref<22x22xf32, #tpu.memory_space<vmem>>, vector<1x16xf32>,
    %46 = vector.extract_strided_slice %23 {offsets = [0, 80], sizes = [1, 16], strides = [1, 1]} : vector<1x256xf32> to vector<1x16xf32>
    %c8_43 = arith.constant 8 : index
    %c3_44 = arith.constant 3 : index
    %47 = vector.load %arg6[%c8_43, %c3_44] : memref<22x22xf32, #tpu.memory_space<vmem>>, vector<1x16xf32>
    tpu.vector_store %arg6[%c8_43, %c3_44], %46 {strides = array<i32>} : memref<22x22xf32, #tpu.memory_space<vmem>>, vector<1x16xf32>,
    %48 = vector.extract_strided_slice %19 {offsets = [0, 96], sizes = [1, 16], strides = [1, 1]} : vector<1x256xf32> to vector<1x16xf32>
    %c9 = arith.constant 9 : index
    %c3_45 = arith.constant 3 : index
    %49 = vector.load %arg5[%c9, %c3_45] : memref<22x22xf32, #tpu.memory_space<vmem>>, vector<1x16xf32>
    tpu.vector_store %arg5[%c9, %c3_45], %48 {strides = array<i32>} : memref<22x22xf32, #tpu.memory_space<vmem>>, vector<1x16xf32>,
    %50 = vector.extract_strided_slice %23 {offsets = [0, 96], sizes = [1, 16], strides = [1, 1]} : vector<1x256xf32> to vector<1x16xf32>
    %c9_46 = arith.constant 9 : index
    %c3_47 = arith.constant 3 : index
    %51 = vector.load %arg6[%c9_46, %c3_47] : memref<22x22xf32, #tpu.memory_space<vmem>>, vector<1x16xf32>
    tpu.vector_store %arg6[%c9_46, %c3_47], %50 {strides = array<i32>} : memref<22x22xf32, #tpu.memory_space<vmem>>, vector<1x16xf32>,
    %52 = vector.extract_strided_slice %19 {offsets = [0, 112], sizes = [1, 16], strides = [1, 1]} : vector<1x256xf32> to vector<1x16xf32>
    %c10 = arith.constant 10 : index
    %c3_48 = arith.constant 3 : index
    %53 = vector.load %arg5[%c10, %c3_48] : memref<22x22xf32, #tpu.memory_space<vmem>>, vector<1x16xf32>
    tpu.vector_store %arg5[%c10, %c3_48], %52 {strides = array<i32>} : memref<22x22xf32, #tpu.memory_space<vmem>>, vector<1x16xf32>,
    %54 = vector.extract_strided_slice %23 {offsets = [0, 112], sizes = [1, 16], strides = [1, 1]} : vector<1x256xf32> to vector<1x16xf32>
    %c10_49 = arith.constant 10 : index
    %c3_50 = arith.constant 3 : index
    %55 = vector.load %arg6[%c10_49, %c3_50] : memref<22x22xf32, #tpu.memory_space<vmem>>, vector<1x16xf32>
    tpu.vector_store %arg6[%c10_49, %c3_50], %54 {strides = array<i32>} : memref<22x22xf32, #tpu.memory_space<vmem>>, vector<1x16xf32>,
    %56 = vector.extract_strided_slice %19 {offsets = [0, 128], sizes = [1, 16], strides = [1, 1]} : vector<1x256xf32> to vector<1x16xf32>
    %c11 = arith.constant 11 : index
    %c3_51 = arith.constant 3 : index
    %57 = vector.load %arg5[%c11, %c3_51] : memref<22x22xf32, #tpu.memory_space<vmem>>, vector<1x16xf32>
    tpu.vector_store %arg5[%c11, %c3_51], %56 {strides = array<i32>} : memref<22x22xf32, #tpu.memory_space<vmem>>, vector<1x16xf32>,
    %58 = vector.extract_strided_slice %23 {offsets = [0, 128], sizes = [1, 16], strides = [1, 1]} : vector<1x256xf32> to vector<1x16xf32>
    %c11_52 = arith.constant 11 : index
    %c3_53 = arith.constant 3 : index
    %59 = vector.load %arg6[%c11_52, %c3_53] : memref<22x22xf32, #tpu.memory_space<vmem>>, vector<1x16xf32>
    tpu.vector_store %arg6[%c11_52, %c3_53], %58 {strides = array<i32>} : memref<22x22xf32, #tpu.memory_space<vmem>>, vector<1x16xf32>,
    %60 = vector.extract_strided_slice %19 {offsets = [0, 144], sizes = [1, 16], strides = [1, 1]} : vector<1x256xf32> to vector<1x16xf32>
    %c12 = arith.constant 12 : index
    %c3_54 = arith.constant 3 : index
    %61 = vector.load %arg5[%c12, %c3_54] : memref<22x22xf32, #tpu.memory_space<vmem>>, vector<1x16xf32>
    tpu.vector_store %arg5[%c12, %c3_54], %60 {strides = array<i32>} : memref<22x22xf32, #tpu.memory_space<vmem>>, vector<1x16xf32>,
    %62 = vector.extract_strided_slice %23 {offsets = [0, 144], sizes = [1, 16], strides = [1, 1]} : vector<1x256xf32> to vector<1x16xf32>
    %c12_55 = arith.constant 12 : index
    %c3_56 = arith.constant 3 : index
    %63 = vector.load %arg6[%c12_55, %c3_56] : memref<22x22xf32, #tpu.memory_space<vmem>>, vector<1x16xf32>
    tpu.vector_store %arg6[%c12_55, %c3_56], %62 {strides = array<i32>} : memref<22x22xf32, #tpu.memory_space<vmem>>, vector<1x16xf32>,
    %64 = vector.extract_strided_slice %19 {offsets = [0, 160], sizes = [1, 16], strides = [1, 1]} : vector<1x256xf32> to vector<1x16xf32>
    %c13 = arith.constant 13 : index
    %c3_57 = arith.constant 3 : index
    %65 = vector.load %arg5[%c13, %c3_57] : memref<22x22xf32, #tpu.memory_space<vmem>>, vector<1x16xf32>
    tpu.vector_store %arg5[%c13, %c3_57], %64 {strides = array<i32>} : memref<22x22xf32, #tpu.memory_space<vmem>>, vector<1x16xf32>,
    %66 = vector.extract_strided_slice %23 {offsets = [0, 160], sizes = [1, 16], strides = [1, 1]} : vector<1x256xf32> to vector<1x16xf32>
    %c13_58 = arith.constant 13 : index
    %c3_59 = arith.constant 3 : index
    %67 = vector.load %arg6[%c13_58, %c3_59] : memref<22x22xf32, #tpu.memory_space<vmem>>, vector<1x16xf32>
    tpu.vector_store %arg6[%c13_58, %c3_59], %66 {strides = array<i32>} : memref<22x22xf32, #tpu.memory_space<vmem>>, vector<1x16xf32>,
    %68 = vector.extract_strided_slice %19 {offsets = [0, 176], sizes = [1, 16], strides = [1, 1]} : vector<1x256xf32> to vector<1x16xf32>
    %c14 = arith.constant 14 : index
    %c3_60 = arith.constant 3 : index
    %69 = vector.load %arg5[%c14, %c3_60] : memref<22x22xf32, #tpu.memory_space<vmem>>, vector<1x16xf32>
    tpu.vector_store %arg5[%c14, %c3_60], %68 {strides = array<i32>} : memref<22x22xf32, #tpu.memory_space<vmem>>, vector<1x16xf32>,
    %70 = vector.extract_strided_slice %23 {offsets = [0, 176], sizes = [1, 16], strides = [1, 1]} : vector<1x256xf32> to vector<1x16xf32>
    %c14_61 = arith.constant 14 : index
    %c3_62 = arith.constant 3 : index
    %71 = vector.load %arg6[%c14_61, %c3_62] : memref<22x22xf32, #tpu.memory_space<vmem>>, vector<1x16xf32>
    tpu.vector_store %arg6[%c14_61, %c3_62], %70 {strides = array<i32>} : memref<22x22xf32, #tpu.memory_space<vmem>>, vector<1x16xf32>,
    %72 = vector.extract_strided_slice %19 {offsets = [0, 192], sizes = [1, 16], strides = [1, 1]} : vector<1x256xf32> to vector<1x16xf32>
    %c15 = arith.constant 15 : index
    %c3_63 = arith.constant 3 : index
    %73 = vector.load %arg5[%c15, %c3_63] : memref<22x22xf32, #tpu.memory_space<vmem>>, vector<1x16xf32>
    tpu.vector_store %arg5[%c15, %c3_63], %72 {strides = array<i32>} : memref<22x22xf32, #tpu.memory_space<vmem>>, vector<1x16xf32>,
    %74 = vector.extract_strided_slice %23 {offsets = [0, 192], sizes = [1, 16], strides = [1, 1]} : vector<1x256xf32> to vector<1x16xf32>
    %c15_64 = arith.constant 15 : index
    %c3_65 = arith.constant 3 : index
    %75 = vector.load %arg6[%c15_64, %c3_65] : memref<22x22xf32, #tpu.memory_space<vmem>>, vector<1x16xf32>
    tpu.vector_store %arg6[%c15_64, %c3_65], %74 {strides = array<i32>} : memref<22x22xf32, #tpu.memory_space<vmem>>, vector<1x16xf32>,
    %76 = vector.extract_strided_slice %19 {offsets = [0, 208], sizes = [1, 16], strides = [1, 1]} : vector<1x256xf32> to vector<1x16xf32>
    %c16 = arith.constant 16 : index
    %c3_66 = arith.constant 3 : index
    %77 = vector.load %arg5[%c16, %c3_66] : memref<22x22xf32, #tpu.memory_space<vmem>>, vector<1x16xf32>
    tpu.vector_store %arg5[%c16, %c3_66], %76 {strides = array<i32>} : memref<22x22xf32, #tpu.memory_space<vmem>>, vector<1x16xf32>,
    %78 = vector.extract_strided_slice %23 {offsets = [0, 208], sizes = [1, 16], strides = [1, 1]} : vector<1x256xf32> to vector<1x16xf32>
    %c16_67 = arith.constant 16 : index
    %c3_68 = arith.constant 3 : index
    %79 = vector.load %arg6[%c16_67, %c3_68] : memref<22x22xf32, #tpu.memory_space<vmem>>, vector<1x16xf32>
    tpu.vector_store %arg6[%c16_67, %c3_68], %78 {strides = array<i32>} : memref<22x22xf32, #tpu.memory_space<vmem>>, vector<1x16xf32>,
    %80 = vector.extract_strided_slice %19 {offsets = [0, 224], sizes = [1, 16], strides = [1, 1]} : vector<1x256xf32> to vector<1x16xf32>
    %c17 = arith.constant 17 : index
    %c3_69 = arith.constant 3 : index
    %81 = vector.load %arg5[%c17, %c3_69] : memref<22x22xf32, #tpu.memory_space<vmem>>, vector<1x16xf32>
    tpu.vector_store %arg5[%c17, %c3_69], %80 {strides = array<i32>} : memref<22x22xf32, #tpu.memory_space<vmem>>, vector<1x16xf32>,
    %82 = vector.extract_strided_slice %23 {offsets = [0, 224], sizes = [1, 16], strides = [1, 1]} : vector<1x256xf32> to vector<1x16xf32>
    %c17_70 = arith.constant 17 : index
    %c3_71 = arith.constant 3 : index
    %83 = vector.load %arg6[%c17_70, %c3_71] : memref<22x22xf32, #tpu.memory_space<vmem>>, vector<1x16xf32>
    tpu.vector_store %arg6[%c17_70, %c3_71], %82 {strides = array<i32>} : memref<22x22xf32, #tpu.memory_space<vmem>>, vector<1x16xf32>,
    %84 = vector.extract_strided_slice %19 {offsets = [0, 240], sizes = [1, 16], strides = [1, 1]} : vector<1x256xf32> to vector<1x16xf32>
    %c18 = arith.constant 18 : index
    %c3_72 = arith.constant 3 : index
    %85 = vector.load %arg5[%c18, %c3_72] : memref<22x22xf32, #tpu.memory_space<vmem>>, vector<1x16xf32>
    tpu.vector_store %arg5[%c18, %c3_72], %84 {strides = array<i32>} : memref<22x22xf32, #tpu.memory_space<vmem>>, vector<1x16xf32>,
    %86 = vector.extract_strided_slice %23 {offsets = [0, 240], sizes = [1, 16], strides = [1, 1]} : vector<1x256xf32> to vector<1x16xf32>
    %c18_73 = arith.constant 18 : index
    %c3_74 = arith.constant 3 : index
    %87 = vector.load %arg6[%c18_73, %c3_74] : memref<22x22xf32, #tpu.memory_space<vmem>>, vector<1x16xf32>
    tpu.vector_store %arg6[%c18_73, %c3_74], %86 {strides = array<i32>} : memref<22x22xf32, #tpu.memory_space<vmem>>, vector<1x16xf32>,
    %c0_75 = arith.constant 0 : index
    %c0_76 = arith.constant 0 : index
    %88 = vector.load %arg5[%c0_75, %c0_76] : memref<22x22xf32, #tpu.memory_space<vmem>>, vector<22x22xf32>
    %c0_77 = arith.constant 0 : index
    %c0_78 = arith.constant 0 : index
    %89 = vector.load %arg6[%c0_77, %c0_78] : memref<22x22xf32, #tpu.memory_space<vmem>>, vector<22x22xf32>
    %90 = vector.extract_strided_slice %88 {offsets = [0, 0], sizes = [22, 16], strides = [1, 1]} : vector<22x22xf32> to vector<22x16xf32>
    %91 = vector.extract_strided_slice %88 {offsets = [0, 1], sizes = [22, 16], strides = [1, 1]} : vector<22x22xf32> to vector<22x16xf32>
    %92 = vector.extract_strided_slice %88 {offsets = [0, 2], sizes = [22, 16], strides = [1, 1]} : vector<22x22xf32> to vector<22x16xf32>
    %93 = vector.extract_strided_slice %88 {offsets = [0, 3], sizes = [22, 16], strides = [1, 1]} : vector<22x22xf32> to vector<22x16xf32>
    %94 = vector.extract_strided_slice %88 {offsets = [0, 4], sizes = [22, 16], strides = [1, 1]} : vector<22x22xf32> to vector<22x16xf32>
    %95 = vector.extract_strided_slice %88 {offsets = [0, 5], sizes = [22, 16], strides = [1, 1]} : vector<22x22xf32> to vector<22x16xf32>
    %96 = vector.extract_strided_slice %88 {offsets = [0, 6], sizes = [22, 16], strides = [1, 1]} : vector<22x22xf32> to vector<22x16xf32>
    %97 = vector.extract_strided_slice %89 {offsets = [0, 0], sizes = [22, 16], strides = [1, 1]} : vector<22x22xf32> to vector<22x16xf32>
    %98 = vector.extract_strided_slice %89 {offsets = [0, 1], sizes = [22, 16], strides = [1, 1]} : vector<22x22xf32> to vector<22x16xf32>
    %99 = vector.extract_strided_slice %89 {offsets = [0, 2], sizes = [22, 16], strides = [1, 1]} : vector<22x22xf32> to vector<22x16xf32>
    %100 = vector.extract_strided_slice %89 {offsets = [0, 3], sizes = [22, 16], strides = [1, 1]} : vector<22x22xf32> to vector<22x16xf32>
    %101 = vector.extract_strided_slice %89 {offsets = [0, 4], sizes = [22, 16], strides = [1, 1]} : vector<22x22xf32> to vector<22x16xf32>
    %102 = vector.extract_strided_slice %89 {offsets = [0, 5], sizes = [22, 16], strides = [1, 1]} : vector<22x22xf32> to vector<22x16xf32>
    %103 = vector.extract_strided_slice %89 {offsets = [0, 6], sizes = [22, 16], strides = [1, 1]} : vector<22x22xf32> to vector<22x16xf32>
    %c0_79 = arith.constant 0 : index
    %104 = memref.load %arg1[%c0_79] : memref<98xf32, #tpu.memory_space<smem>>
    %c49 = arith.constant 49 : index
    %105 = memref.load %arg1[%c49] : memref<98xf32, #tpu.memory_space<smem>>
    %106 = vector.extract_strided_slice %90 {offsets = [0, 0], sizes = [16, 16], strides = [1, 1]} : vector<22x16xf32> to vector<16x16xf32>
    %107 = vector.broadcast %104 : f32 to vector<16x16xf32>
    %108 = arith.mulf %107, %106 : vector<16x16xf32>
    %109 = vector.extract_strided_slice %97 {offsets = [0, 0], sizes = [16, 16], strides = [1, 1]} : vector<22x16xf32> to vector<16x16xf32>
    %110 = vector.broadcast %105 : f32 to vector<16x16xf32>
    %111 = arith.mulf %110, %109 : vector<16x16xf32>
    %112 = arith.addf %108, %111 : vector<16x16xf32>
    %c1 = arith.constant 1 : index
    %113 = memref.load %arg1[%c1] : memref<98xf32, #tpu.memory_space<smem>>
    %c50 = arith.constant 50 : index
    %114 = memref.load %arg1[%c50] : memref<98xf32, #tpu.memory_space<smem>>
    %115 = vector.extract_strided_slice %91 {offsets = [0, 0], sizes = [16, 16], strides = [1, 1]} : vector<22x16xf32> to vector<16x16xf32>
    %116 = vector.broadcast %113 : f32 to vector<16x16xf32>
    %117 = arith.mulf %116, %115 : vector<16x16xf32>
    %118 = vector.extract_strided_slice %98 {offsets = [0, 0], sizes = [16, 16], strides = [1, 1]} : vector<22x16xf32> to vector<16x16xf32>
    %119 = vector.broadcast %114 : f32 to vector<16x16xf32>
    %120 = arith.mulf %119, %118 : vector<16x16xf32>
    %121 = arith.addf %117, %120 : vector<16x16xf32>
    %122 = arith.addf %112, %121 : vector<16x16xf32>
    %c2 = arith.constant 2 : index
    %123 = memref.load %arg1[%c2] : memref<98xf32, #tpu.memory_space<smem>>
    %c51 = arith.constant 51 : index
    %124 = memref.load %arg1[%c51] : memref<98xf32, #tpu.memory_space<smem>>
    %125 = vector.extract_strided_slice %92 {offsets = [0, 0], sizes = [16, 16], strides = [1, 1]} : vector<22x16xf32> to vector<16x16xf32>
    %126 = vector.broadcast %123 : f32 to vector<16x16xf32>
    %127 = arith.mulf %126, %125 : vector<16x16xf32>
    %128 = vector.extract_strided_slice %99 {offsets = [0, 0], sizes = [16, 16], strides = [1, 1]} : vector<22x16xf32> to vector<16x16xf32>
    %129 = vector.broadcast %124 : f32 to vector<16x16xf32>
    %130 = arith.mulf %129, %128 : vector<16x16xf32>
    %131 = arith.addf %127, %130 : vector<16x16xf32>
    %132 = arith.addf %122, %131 : vector<16x16xf32>
    %c3_80 = arith.constant 3 : index
    %133 = memref.load %arg1[%c3_80] : memref<98xf32, #tpu.memory_space<smem>>
    %c52 = arith.constant 52 : index
    %134 = memref.load %arg1[%c52] : memref<98xf32, #tpu.memory_space<smem>>
    %135 = vector.extract_strided_slice %93 {offsets = [0, 0], sizes = [16, 16], strides = [1, 1]} : vector<22x16xf32> to vector<16x16xf32>
    %136 = vector.broadcast %133 : f32 to vector<16x16xf32>
    %137 = arith.mulf %136, %135 : vector<16x16xf32>
    %138 = vector.extract_strided_slice %100 {offsets = [0, 0], sizes = [16, 16], strides = [1, 1]} : vector<22x16xf32> to vector<16x16xf32>
    %139 = vector.broadcast %134 : f32 to vector<16x16xf32>
    %140 = arith.mulf %139, %138 : vector<16x16xf32>
    %141 = arith.addf %137, %140 : vector<16x16xf32>
    %142 = arith.addf %132, %141 : vector<16x16xf32>
    %c4_81 = arith.constant 4 : index
    %143 = memref.load %arg1[%c4_81] : memref<98xf32, #tpu.memory_space<smem>>
    %c53 = arith.constant 53 : index
    %144 = memref.load %arg1[%c53] : memref<98xf32, #tpu.memory_space<smem>>
    %145 = vector.extract_strided_slice %94 {offsets = [0, 0], sizes = [16, 16], strides = [1, 1]} : vector<22x16xf32> to vector<16x16xf32>
    %146 = vector.broadcast %143 : f32 to vector<16x16xf32>
    %147 = arith.mulf %146, %145 : vector<16x16xf32>
    %148 = vector.extract_strided_slice %101 {offsets = [0, 0], sizes = [16, 16], strides = [1, 1]} : vector<22x16xf32> to vector<16x16xf32>
    %149 = vector.broadcast %144 : f32 to vector<16x16xf32>
    %150 = arith.mulf %149, %148 : vector<16x16xf32>
    %151 = arith.addf %147, %150 : vector<16x16xf32>
    %152 = arith.addf %142, %151 : vector<16x16xf32>
    %c5_82 = arith.constant 5 : index
    %153 = memref.load %arg1[%c5_82] : memref<98xf32, #tpu.memory_space<smem>>
    %c54 = arith.constant 54 : index
    %154 = memref.load %arg1[%c54] : memref<98xf32, #tpu.memory_space<smem>>
    %155 = vector.extract_strided_slice %95 {offsets = [0, 0], sizes = [16, 16], strides = [1, 1]} : vector<22x16xf32> to vector<16x16xf32>
    %156 = vector.broadcast %153 : f32 to vector<16x16xf32>
    %157 = arith.mulf %156, %155 : vector<16x16xf32>
    %158 = vector.extract_strided_slice %102 {offsets = [0, 0], sizes = [16, 16], strides = [1, 1]} : vector<22x16xf32> to vector<16x16xf32>
    %159 = vector.broadcast %154 : f32 to vector<16x16xf32>
    %160 = arith.mulf %159, %158 : vector<16x16xf32>
    %161 = arith.addf %157, %160 : vector<16x16xf32>
    %162 = arith.addf %152, %161 : vector<16x16xf32>
    %c6_83 = arith.constant 6 : index
    %163 = memref.load %arg1[%c6_83] : memref<98xf32, #tpu.memory_space<smem>>
    %c55 = arith.constant 55 : index
    %164 = memref.load %arg1[%c55] : memref<98xf32, #tpu.memory_space<smem>>
    %165 = vector.extract_strided_slice %96 {offsets = [0, 0], sizes = [16, 16], strides = [1, 1]} : vector<22x16xf32> to vector<16x16xf32>
    %166 = vector.broadcast %163 : f32 to vector<16x16xf32>
    %167 = arith.mulf %166, %165 : vector<16x16xf32>
    %168 = vector.extract_strided_slice %103 {offsets = [0, 0], sizes = [16, 16], strides = [1, 1]} : vector<22x16xf32> to vector<16x16xf32>
    %169 = vector.broadcast %164 : f32 to vector<16x16xf32>
    %170 = arith.mulf %169, %168 : vector<16x16xf32>
    %171 = arith.addf %167, %170 : vector<16x16xf32>
    %172 = arith.addf %162, %171 : vector<16x16xf32>
    %c7_84 = arith.constant 7 : index
    %173 = memref.load %arg1[%c7_84] : memref<98xf32, #tpu.memory_space<smem>>
    %c56 = arith.constant 56 : index
    %174 = memref.load %arg1[%c56] : memref<98xf32, #tpu.memory_space<smem>>
    %175 = vector.extract_strided_slice %90 {offsets = [1, 0], sizes = [16, 16], strides = [1, 1]} : vector<22x16xf32> to vector<16x16xf32>
    %176 = vector.broadcast %173 : f32 to vector<16x16xf32>
    %177 = arith.mulf %176, %175 : vector<16x16xf32>
    %178 = vector.extract_strided_slice %97 {offsets = [1, 0], sizes = [16, 16], strides = [1, 1]} : vector<22x16xf32> to vector<16x16xf32>
    %179 = vector.broadcast %174 : f32 to vector<16x16xf32>
    %180 = arith.mulf %179, %178 : vector<16x16xf32>
    %181 = arith.addf %177, %180 : vector<16x16xf32>
    %c8_85 = arith.constant 8 : index
    %182 = memref.load %arg1[%c8_85] : memref<98xf32, #tpu.memory_space<smem>>
    %c57 = arith.constant 57 : index
    %183 = memref.load %arg1[%c57] : memref<98xf32, #tpu.memory_space<smem>>
    %184 = vector.extract_strided_slice %91 {offsets = [1, 0], sizes = [16, 16], strides = [1, 1]} : vector<22x16xf32> to vector<16x16xf32>
    %185 = vector.broadcast %182 : f32 to vector<16x16xf32>
    %186 = arith.mulf %185, %184 : vector<16x16xf32>
    %187 = vector.extract_strided_slice %98 {offsets = [1, 0], sizes = [16, 16], strides = [1, 1]} : vector<22x16xf32> to vector<16x16xf32>
    %188 = vector.broadcast %183 : f32 to vector<16x16xf32>
    %189 = arith.mulf %188, %187 : vector<16x16xf32>
    %190 = arith.addf %186, %189 : vector<16x16xf32>
    %191 = arith.addf %181, %190 : vector<16x16xf32>
    %c9_86 = arith.constant 9 : index
    %192 = memref.load %arg1[%c9_86] : memref<98xf32, #tpu.memory_space<smem>>
    %c58 = arith.constant 58 : index
    %193 = memref.load %arg1[%c58] : memref<98xf32, #tpu.memory_space<smem>>
    %194 = vector.extract_strided_slice %92 {offsets = [1, 0], sizes = [16, 16], strides = [1, 1]} : vector<22x16xf32> to vector<16x16xf32>
    %195 = vector.broadcast %192 : f32 to vector<16x16xf32>
    %196 = arith.mulf %195, %194 : vector<16x16xf32>
    %197 = vector.extract_strided_slice %99 {offsets = [1, 0], sizes = [16, 16], strides = [1, 1]} : vector<22x16xf32> to vector<16x16xf32>
    %198 = vector.broadcast %193 : f32 to vector<16x16xf32>
    %199 = arith.mulf %198, %197 : vector<16x16xf32>
    %200 = arith.addf %196, %199 : vector<16x16xf32>
    %201 = arith.addf %191, %200 : vector<16x16xf32>
    %c10_87 = arith.constant 10 : index
    %202 = memref.load %arg1[%c10_87] : memref<98xf32, #tpu.memory_space<smem>>
    %c59 = arith.constant 59 : index
    %203 = memref.load %arg1[%c59] : memref<98xf32, #tpu.memory_space<smem>>
    %204 = vector.extract_strided_slice %93 {offsets = [1, 0], sizes = [16, 16], strides = [1, 1]} : vector<22x16xf32> to vector<16x16xf32>
    %205 = vector.broadcast %202 : f32 to vector<16x16xf32>
    %206 = arith.mulf %205, %204 : vector<16x16xf32>
    %207 = vector.extract_strided_slice %100 {offsets = [1, 0], sizes = [16, 16], strides = [1, 1]} : vector<22x16xf32> to vector<16x16xf32>
    %208 = vector.broadcast %203 : f32 to vector<16x16xf32>
    %209 = arith.mulf %208, %207 : vector<16x16xf32>
    %210 = arith.addf %206, %209 : vector<16x16xf32>
    %211 = arith.addf %201, %210 : vector<16x16xf32>
    %c11_88 = arith.constant 11 : index
    %212 = memref.load %arg1[%c11_88] : memref<98xf32, #tpu.memory_space<smem>>
    %c60 = arith.constant 60 : index
    %213 = memref.load %arg1[%c60] : memref<98xf32, #tpu.memory_space<smem>>
    %214 = vector.extract_strided_slice %94 {offsets = [1, 0], sizes = [16, 16], strides = [1, 1]} : vector<22x16xf32> to vector<16x16xf32>
    %215 = vector.broadcast %212 : f32 to vector<16x16xf32>
    %216 = arith.mulf %215, %214 : vector<16x16xf32>
    %217 = vector.extract_strided_slice %101 {offsets = [1, 0], sizes = [16, 16], strides = [1, 1]} : vector<22x16xf32> to vector<16x16xf32>
    %218 = vector.broadcast %213 : f32 to vector<16x16xf32>
    %219 = arith.mulf %218, %217 : vector<16x16xf32>
    %220 = arith.addf %216, %219 : vector<16x16xf32>
    %221 = arith.addf %211, %220 : vector<16x16xf32>
    %c12_89 = arith.constant 12 : index
    %222 = memref.load %arg1[%c12_89] : memref<98xf32, #tpu.memory_space<smem>>
    %c61 = arith.constant 61 : index
    %223 = memref.load %arg1[%c61] : memref<98xf32, #tpu.memory_space<smem>>
    %224 = vector.extract_strided_slice %95 {offsets = [1, 0], sizes = [16, 16], strides = [1, 1]} : vector<22x16xf32> to vector<16x16xf32>
    %225 = vector.broadcast %222 : f32 to vector<16x16xf32>
    %226 = arith.mulf %225, %224 : vector<16x16xf32>
    %227 = vector.extract_strided_slice %102 {offsets = [1, 0], sizes = [16, 16], strides = [1, 1]} : vector<22x16xf32> to vector<16x16xf32>
    %228 = vector.broadcast %223 : f32 to vector<16x16xf32>
    %229 = arith.mulf %228, %227 : vector<16x16xf32>
    %230 = arith.addf %226, %229 : vector<16x16xf32>
    %231 = arith.addf %221, %230 : vector<16x16xf32>
    %c13_90 = arith.constant 13 : index
    %232 = memref.load %arg1[%c13_90] : memref<98xf32, #tpu.memory_space<smem>>
    %c62 = arith.constant 62 : index
    %233 = memref.load %arg1[%c62] : memref<98xf32, #tpu.memory_space<smem>>
    %234 = vector.extract_strided_slice %96 {offsets = [1, 0], sizes = [16, 16], strides = [1, 1]} : vector<22x16xf32> to vector<16x16xf32>
    %235 = vector.broadcast %232 : f32 to vector<16x16xf32>
    %236 = arith.mulf %235, %234 : vector<16x16xf32>
    %237 = vector.extract_strided_slice %103 {offsets = [1, 0], sizes = [16, 16], strides = [1, 1]} : vector<22x16xf32> to vector<16x16xf32>
    %238 = vector.broadcast %233 : f32 to vector<16x16xf32>
    %239 = arith.mulf %238, %237 : vector<16x16xf32>
    %240 = arith.addf %236, %239 : vector<16x16xf32>
    %241 = arith.addf %231, %240 : vector<16x16xf32>
    %c14_91 = arith.constant 14 : index
    %242 = memref.load %arg1[%c14_91] : memref<98xf32, #tpu.memory_space<smem>>
    %c63 = arith.constant 63 : index
    %243 = memref.load %arg1[%c63] : memref<98xf32, #tpu.memory_space<smem>>
    %244 = vector.extract_strided_slice %90 {offsets = [2, 0], sizes = [16, 16], strides = [1, 1]} : vector<22x16xf32> to vector<16x16xf32>
    %245 = vector.broadcast %242 : f32 to vector<16x16xf32>
    %246 = arith.mulf %245, %244 : vector<16x16xf32>
    %247 = vector.extract_strided_slice %97 {offsets = [2, 0], sizes = [16, 16], strides = [1, 1]} : vector<22x16xf32> to vector<16x16xf32>
    %248 = vector.broadcast %243 : f32 to vector<16x16xf32>
    %249 = arith.mulf %248, %247 : vector<16x16xf32>
    %250 = arith.addf %246, %249 : vector<16x16xf32>
    %c15_92 = arith.constant 15 : index
    %251 = memref.load %arg1[%c15_92] : memref<98xf32, #tpu.memory_space<smem>>
    %c64 = arith.constant 64 : index
    %252 = memref.load %arg1[%c64] : memref<98xf32, #tpu.memory_space<smem>>
    %253 = vector.extract_strided_slice %91 {offsets = [2, 0], sizes = [16, 16], strides = [1, 1]} : vector<22x16xf32> to vector<16x16xf32>
    %254 = vector.broadcast %251 : f32 to vector<16x16xf32>
    %255 = arith.mulf %254, %253 : vector<16x16xf32>
    %256 = vector.extract_strided_slice %98 {offsets = [2, 0], sizes = [16, 16], strides = [1, 1]} : vector<22x16xf32> to vector<16x16xf32>
    %257 = vector.broadcast %252 : f32 to vector<16x16xf32>
    %258 = arith.mulf %257, %256 : vector<16x16xf32>
    %259 = arith.addf %255, %258 : vector<16x16xf32>
    %260 = arith.addf %250, %259 : vector<16x16xf32>
    %c16_93 = arith.constant 16 : index
    %261 = memref.load %arg1[%c16_93] : memref<98xf32, #tpu.memory_space<smem>>
    %c65 = arith.constant 65 : index
    %262 = memref.load %arg1[%c65] : memref<98xf32, #tpu.memory_space<smem>>
    %263 = vector.extract_strided_slice %92 {offsets = [2, 0], sizes = [16, 16], strides = [1, 1]} : vector<22x16xf32> to vector<16x16xf32>
    %264 = vector.broadcast %261 : f32 to vector<16x16xf32>
    %265 = arith.mulf %264, %263 : vector<16x16xf32>
    %266 = vector.extract_strided_slice %99 {offsets = [2, 0], sizes = [16, 16], strides = [1, 1]} : vector<22x16xf32> to vector<16x16xf32>
    %267 = vector.broadcast %262 : f32 to vector<16x16xf32>
    %268 = arith.mulf %267, %266 : vector<16x16xf32>
    %269 = arith.addf %265, %268 : vector<16x16xf32>
    %270 = arith.addf %260, %269 : vector<16x16xf32>
    %c17_94 = arith.constant 17 : index
    %271 = memref.load %arg1[%c17_94] : memref<98xf32, #tpu.memory_space<smem>>
    %c66 = arith.constant 66 : index
    %272 = memref.load %arg1[%c66] : memref<98xf32, #tpu.memory_space<smem>>
    %273 = vector.extract_strided_slice %93 {offsets = [2, 0], sizes = [16, 16], strides = [1, 1]} : vector<22x16xf32> to vector<16x16xf32>
    %274 = vector.broadcast %271 : f32 to vector<16x16xf32>
    %275 = arith.mulf %274, %273 : vector<16x16xf32>
    %276 = vector.extract_strided_slice %100 {offsets = [2, 0], sizes = [16, 16], strides = [1, 1]} : vector<22x16xf32> to vector<16x16xf32>
    %277 = vector.broadcast %272 : f32 to vector<16x16xf32>
    %278 = arith.mulf %277, %276 : vector<16x16xf32>
    %279 = arith.addf %275, %278 : vector<16x16xf32>
    %280 = arith.addf %270, %279 : vector<16x16xf32>
    %c18_95 = arith.constant 18 : index
    %281 = memref.load %arg1[%c18_95] : memref<98xf32, #tpu.memory_space<smem>>
    %c67 = arith.constant 67 : index
    %282 = memref.load %arg1[%c67] : memref<98xf32, #tpu.memory_space<smem>>
    %283 = vector.extract_strided_slice %94 {offsets = [2, 0], sizes = [16, 16], strides = [1, 1]} : vector<22x16xf32> to vector<16x16xf32>
    %284 = vector.broadcast %281 : f32 to vector<16x16xf32>
    %285 = arith.mulf %284, %283 : vector<16x16xf32>
    %286 = vector.extract_strided_slice %101 {offsets = [2, 0], sizes = [16, 16], strides = [1, 1]} : vector<22x16xf32> to vector<16x16xf32>
    %287 = vector.broadcast %282 : f32 to vector<16x16xf32>
    %288 = arith.mulf %287, %286 : vector<16x16xf32>
    %289 = arith.addf %285, %288 : vector<16x16xf32>
    %290 = arith.addf %280, %289 : vector<16x16xf32>
    %c19_96 = arith.constant 19 : index
    %291 = memref.load %arg1[%c19_96] : memref<98xf32, #tpu.memory_space<smem>>
    %c68 = arith.constant 68 : index
    %292 = memref.load %arg1[%c68] : memref<98xf32, #tpu.memory_space<smem>>
    %293 = vector.extract_strided_slice %95 {offsets = [2, 0], sizes = [16, 16], strides = [1, 1]} : vector<22x16xf32> to vector<16x16xf32>
    %294 = vector.broadcast %291 : f32 to vector<16x16xf32>
    %295 = arith.mulf %294, %293 : vector<16x16xf32>
    %296 = vector.extract_strided_slice %102 {offsets = [2, 0], sizes = [16, 16], strides = [1, 1]} : vector<22x16xf32> to vector<16x16xf32>
    %297 = vector.broadcast %292 : f32 to vector<16x16xf32>
    %298 = arith.mulf %297, %296 : vector<16x16xf32>
    %299 = arith.addf %295, %298 : vector<16x16xf32>
    %300 = arith.addf %290, %299 : vector<16x16xf32>
    %c20 = arith.constant 20 : index
    %301 = memref.load %arg1[%c20] : memref<98xf32, #tpu.memory_space<smem>>
    %c69 = arith.constant 69 : index
    %302 = memref.load %arg1[%c69] : memref<98xf32, #tpu.memory_space<smem>>
    %303 = vector.extract_strided_slice %96 {offsets = [2, 0], sizes = [16, 16], strides = [1, 1]} : vector<22x16xf32> to vector<16x16xf32>
    %304 = vector.broadcast %301 : f32 to vector<16x16xf32>
    %305 = arith.mulf %304, %303 : vector<16x16xf32>
    %306 = vector.extract_strided_slice %103 {offsets = [2, 0], sizes = [16, 16], strides = [1, 1]} : vector<22x16xf32> to vector<16x16xf32>
    %307 = vector.broadcast %302 : f32 to vector<16x16xf32>
    %308 = arith.mulf %307, %306 : vector<16x16xf32>
    %309 = arith.addf %305, %308 : vector<16x16xf32>
    %310 = arith.addf %300, %309 : vector<16x16xf32>
    %c21 = arith.constant 21 : index
    %311 = memref.load %arg1[%c21] : memref<98xf32, #tpu.memory_space<smem>>
    %c70 = arith.constant 70 : index
    %312 = memref.load %arg1[%c70] : memref<98xf32, #tpu.memory_space<smem>>
    %313 = vector.extract_strided_slice %90 {offsets = [3, 0], sizes = [16, 16], strides = [1, 1]} : vector<22x16xf32> to vector<16x16xf32>
    %314 = vector.broadcast %311 : f32 to vector<16x16xf32>
    %315 = arith.mulf %314, %313 : vector<16x16xf32>
    %316 = vector.extract_strided_slice %97 {offsets = [3, 0], sizes = [16, 16], strides = [1, 1]} : vector<22x16xf32> to vector<16x16xf32>
    %317 = vector.broadcast %312 : f32 to vector<16x16xf32>
    %318 = arith.mulf %317, %316 : vector<16x16xf32>
    %319 = arith.addf %315, %318 : vector<16x16xf32>
    %c22 = arith.constant 22 : index
    %320 = memref.load %arg1[%c22] : memref<98xf32, #tpu.memory_space<smem>>
    %c71 = arith.constant 71 : index
    %321 = memref.load %arg1[%c71] : memref<98xf32, #tpu.memory_space<smem>>
    %322 = vector.extract_strided_slice %91 {offsets = [3, 0], sizes = [16, 16], strides = [1, 1]} : vector<22x16xf32> to vector<16x16xf32>
    %323 = vector.broadcast %320 : f32 to vector<16x16xf32>
    %324 = arith.mulf %323, %322 : vector<16x16xf32>
    %325 = vector.extract_strided_slice %98 {offsets = [3, 0], sizes = [16, 16], strides = [1, 1]} : vector<22x16xf32> to vector<16x16xf32>
    %326 = vector.broadcast %321 : f32 to vector<16x16xf32>
    %327 = arith.mulf %326, %325 : vector<16x16xf32>
    %328 = arith.addf %324, %327 : vector<16x16xf32>
    %329 = arith.addf %319, %328 : vector<16x16xf32>
    %c23 = arith.constant 23 : index
    %330 = memref.load %arg1[%c23] : memref<98xf32, #tpu.memory_space<smem>>
    %c72 = arith.constant 72 : index
    %331 = memref.load %arg1[%c72] : memref<98xf32, #tpu.memory_space<smem>>
    %332 = vector.extract_strided_slice %92 {offsets = [3, 0], sizes = [16, 16], strides = [1, 1]} : vector<22x16xf32> to vector<16x16xf32>
    %333 = vector.broadcast %330 : f32 to vector<16x16xf32>
    %334 = arith.mulf %333, %332 : vector<16x16xf32>
    %335 = vector.extract_strided_slice %99 {offsets = [3, 0], sizes = [16, 16], strides = [1, 1]} : vector<22x16xf32> to vector<16x16xf32>
    %336 = vector.broadcast %331 : f32 to vector<16x16xf32>
    %337 = arith.mulf %336, %335 : vector<16x16xf32>
    %338 = arith.addf %334, %337 : vector<16x16xf32>
    %339 = arith.addf %329, %338 : vector<16x16xf32>
    %c24 = arith.constant 24 : index
    %340 = memref.load %arg1[%c24] : memref<98xf32, #tpu.memory_space<smem>>
    %c73 = arith.constant 73 : index
    %341 = memref.load %arg1[%c73] : memref<98xf32, #tpu.memory_space<smem>>
    %342 = vector.extract_strided_slice %93 {offsets = [3, 0], sizes = [16, 16], strides = [1, 1]} : vector<22x16xf32> to vector<16x16xf32>
    %343 = vector.broadcast %340 : f32 to vector<16x16xf32>
    %344 = arith.mulf %343, %342 : vector<16x16xf32>
    %345 = vector.extract_strided_slice %100 {offsets = [3, 0], sizes = [16, 16], strides = [1, 1]} : vector<22x16xf32> to vector<16x16xf32>
    %346 = vector.broadcast %341 : f32 to vector<16x16xf32>
    %347 = arith.mulf %346, %345 : vector<16x16xf32>
    %348 = arith.addf %344, %347 : vector<16x16xf32>
    %349 = arith.addf %339, %348 : vector<16x16xf32>
    %c25 = arith.constant 25 : index
    %350 = memref.load %arg1[%c25] : memref<98xf32, #tpu.memory_space<smem>>
    %c74 = arith.constant 74 : index
    %351 = memref.load %arg1[%c74] : memref<98xf32, #tpu.memory_space<smem>>
    %352 = vector.extract_strided_slice %94 {offsets = [3, 0], sizes = [16, 16], strides = [1, 1]} : vector<22x16xf32> to vector<16x16xf32>
    %353 = vector.broadcast %350 : f32 to vector<16x16xf32>
    %354 = arith.mulf %353, %352 : vector<16x16xf32>
    %355 = vector.extract_strided_slice %101 {offsets = [3, 0], sizes = [16, 16], strides = [1, 1]} : vector<22x16xf32> to vector<16x16xf32>
    %356 = vector.broadcast %351 : f32 to vector<16x16xf32>
    %357 = arith.mulf %356, %355 : vector<16x16xf32>
    %358 = arith.addf %354, %357 : vector<16x16xf32>
    %359 = arith.addf %349, %358 : vector<16x16xf32>
    %c26 = arith.constant 26 : index
    %360 = memref.load %arg1[%c26] : memref<98xf32, #tpu.memory_space<smem>>
    %c75 = arith.constant 75 : index
    %361 = memref.load %arg1[%c75] : memref<98xf32, #tpu.memory_space<smem>>
    %362 = vector.extract_strided_slice %95 {offsets = [3, 0], sizes = [16, 16], strides = [1, 1]} : vector<22x16xf32> to vector<16x16xf32>
    %363 = vector.broadcast %360 : f32 to vector<16x16xf32>
    %364 = arith.mulf %363, %362 : vector<16x16xf32>
    %365 = vector.extract_strided_slice %102 {offsets = [3, 0], sizes = [16, 16], strides = [1, 1]} : vector<22x16xf32> to vector<16x16xf32>
    %366 = vector.broadcast %361 : f32 to vector<16x16xf32>
    %367 = arith.mulf %366, %365 : vector<16x16xf32>
    %368 = arith.addf %364, %367 : vector<16x16xf32>
    %369 = arith.addf %359, %368 : vector<16x16xf32>
    %c27 = arith.constant 27 : index
    %370 = memref.load %arg1[%c27] : memref<98xf32, #tpu.memory_space<smem>>
    %c76 = arith.constant 76 : index
    %371 = memref.load %arg1[%c76] : memref<98xf32, #tpu.memory_space<smem>>
    %372 = vector.extract_strided_slice %96 {offsets = [3, 0], sizes = [16, 16], strides = [1, 1]} : vector<22x16xf32> to vector<16x16xf32>
    %373 = vector.broadcast %370 : f32 to vector<16x16xf32>
    %374 = arith.mulf %373, %372 : vector<16x16xf32>
    %375 = vector.extract_strided_slice %103 {offsets = [3, 0], sizes = [16, 16], strides = [1, 1]} : vector<22x16xf32> to vector<16x16xf32>
    %376 = vector.broadcast %371 : f32 to vector<16x16xf32>
    %377 = arith.mulf %376, %375 : vector<16x16xf32>
    %378 = arith.addf %374, %377 : vector<16x16xf32>
    %379 = arith.addf %369, %378 : vector<16x16xf32>
    %c28 = arith.constant 28 : index
    %380 = memref.load %arg1[%c28] : memref<98xf32, #tpu.memory_space<smem>>
    %c77 = arith.constant 77 : index
    %381 = memref.load %arg1[%c77] : memref<98xf32, #tpu.memory_space<smem>>
    %382 = vector.extract_strided_slice %90 {offsets = [4, 0], sizes = [16, 16], strides = [1, 1]} : vector<22x16xf32> to vector<16x16xf32>
    %383 = vector.broadcast %380 : f32 to vector<16x16xf32>
    %384 = arith.mulf %383, %382 : vector<16x16xf32>
    %385 = vector.extract_strided_slice %97 {offsets = [4, 0], sizes = [16, 16], strides = [1, 1]} : vector<22x16xf32> to vector<16x16xf32>
    %386 = vector.broadcast %381 : f32 to vector<16x16xf32>
    %387 = arith.mulf %386, %385 : vector<16x16xf32>
    %388 = arith.addf %384, %387 : vector<16x16xf32>
    %c29 = arith.constant 29 : index
    %389 = memref.load %arg1[%c29] : memref<98xf32, #tpu.memory_space<smem>>
    %c78 = arith.constant 78 : index
    %390 = memref.load %arg1[%c78] : memref<98xf32, #tpu.memory_space<smem>>
    %391 = vector.extract_strided_slice %91 {offsets = [4, 0], sizes = [16, 16], strides = [1, 1]} : vector<22x16xf32> to vector<16x16xf32>
    %392 = vector.broadcast %389 : f32 to vector<16x16xf32>
    %393 = arith.mulf %392, %391 : vector<16x16xf32>
    %394 = vector.extract_strided_slice %98 {offsets = [4, 0], sizes = [16, 16], strides = [1, 1]} : vector<22x16xf32> to vector<16x16xf32>
    %395 = vector.broadcast %390 : f32 to vector<16x16xf32>
    %396 = arith.mulf %395, %394 : vector<16x16xf32>
    %397 = arith.addf %393, %396 : vector<16x16xf32>
    %398 = arith.addf %388, %397 : vector<16x16xf32>
    %c30 = arith.constant 30 : index
    %399 = memref.load %arg1[%c30] : memref<98xf32, #tpu.memory_space<smem>>
    %c79 = arith.constant 79 : index
    %400 = memref.load %arg1[%c79] : memref<98xf32, #tpu.memory_space<smem>>
    %401 = vector.extract_strided_slice %92 {offsets = [4, 0], sizes = [16, 16], strides = [1, 1]} : vector<22x16xf32> to vector<16x16xf32>
    %402 = vector.broadcast %399 : f32 to vector<16x16xf32>
    %403 = arith.mulf %402, %401 : vector<16x16xf32>
    %404 = vector.extract_strided_slice %99 {offsets = [4, 0], sizes = [16, 16], strides = [1, 1]} : vector<22x16xf32> to vector<16x16xf32>
    %405 = vector.broadcast %400 : f32 to vector<16x16xf32>
    %406 = arith.mulf %405, %404 : vector<16x16xf32>
    %407 = arith.addf %403, %406 : vector<16x16xf32>
    %408 = arith.addf %398, %407 : vector<16x16xf32>
    %c31 = arith.constant 31 : index
    %409 = memref.load %arg1[%c31] : memref<98xf32, #tpu.memory_space<smem>>
    %c80 = arith.constant 80 : index
    %410 = memref.load %arg1[%c80] : memref<98xf32, #tpu.memory_space<smem>>
    %411 = vector.extract_strided_slice %93 {offsets = [4, 0], sizes = [16, 16], strides = [1, 1]} : vector<22x16xf32> to vector<16x16xf32>
    %412 = vector.broadcast %409 : f32 to vector<16x16xf32>
    %413 = arith.mulf %412, %411 : vector<16x16xf32>
    %414 = vector.extract_strided_slice %100 {offsets = [4, 0], sizes = [16, 16], strides = [1, 1]} : vector<22x16xf32> to vector<16x16xf32>
    %415 = vector.broadcast %410 : f32 to vector<16x16xf32>
    %416 = arith.mulf %415, %414 : vector<16x16xf32>
    %417 = arith.addf %413, %416 : vector<16x16xf32>
    %418 = arith.addf %408, %417 : vector<16x16xf32>
    %c32 = arith.constant 32 : index
    %419 = memref.load %arg1[%c32] : memref<98xf32, #tpu.memory_space<smem>>
    %c81 = arith.constant 81 : index
    %420 = memref.load %arg1[%c81] : memref<98xf32, #tpu.memory_space<smem>>
    %421 = vector.extract_strided_slice %94 {offsets = [4, 0], sizes = [16, 16], strides = [1, 1]} : vector<22x16xf32> to vector<16x16xf32>
    %422 = vector.broadcast %419 : f32 to vector<16x16xf32>
    %423 = arith.mulf %422, %421 : vector<16x16xf32>
    %424 = vector.extract_strided_slice %101 {offsets = [4, 0], sizes = [16, 16], strides = [1, 1]} : vector<22x16xf32> to vector<16x16xf32>
    %425 = vector.broadcast %420 : f32 to vector<16x16xf32>
    %426 = arith.mulf %425, %424 : vector<16x16xf32>
    %427 = arith.addf %423, %426 : vector<16x16xf32>
    %428 = arith.addf %418, %427 : vector<16x16xf32>
    %c33 = arith.constant 33 : index
    %429 = memref.load %arg1[%c33] : memref<98xf32, #tpu.memory_space<smem>>
    %c82 = arith.constant 82 : index
    %430 = memref.load %arg1[%c82] : memref<98xf32, #tpu.memory_space<smem>>
    %431 = vector.extract_strided_slice %95 {offsets = [4, 0], sizes = [16, 16], strides = [1, 1]} : vector<22x16xf32> to vector<16x16xf32>
    %432 = vector.broadcast %429 : f32 to vector<16x16xf32>
    %433 = arith.mulf %432, %431 : vector<16x16xf32>
    %434 = vector.extract_strided_slice %102 {offsets = [4, 0], sizes = [16, 16], strides = [1, 1]} : vector<22x16xf32> to vector<16x16xf32>
    %435 = vector.broadcast %430 : f32 to vector<16x16xf32>
    %436 = arith.mulf %435, %434 : vector<16x16xf32>
    %437 = arith.addf %433, %436 : vector<16x16xf32>
    %438 = arith.addf %428, %437 : vector<16x16xf32>
    %c34 = arith.constant 34 : index
    %439 = memref.load %arg1[%c34] : memref<98xf32, #tpu.memory_space<smem>>
    %c83 = arith.constant 83 : index
    %440 = memref.load %arg1[%c83] : memref<98xf32, #tpu.memory_space<smem>>
    %441 = vector.extract_strided_slice %96 {offsets = [4, 0], sizes = [16, 16], strides = [1, 1]} : vector<22x16xf32> to vector<16x16xf32>
    %442 = vector.broadcast %439 : f32 to vector<16x16xf32>
    %443 = arith.mulf %442, %441 : vector<16x16xf32>
    %444 = vector.extract_strided_slice %103 {offsets = [4, 0], sizes = [16, 16], strides = [1, 1]} : vector<22x16xf32> to vector<16x16xf32>
    %445 = vector.broadcast %440 : f32 to vector<16x16xf32>
    %446 = arith.mulf %445, %444 : vector<16x16xf32>
    %447 = arith.addf %443, %446 : vector<16x16xf32>
    %448 = arith.addf %438, %447 : vector<16x16xf32>
    %c35 = arith.constant 35 : index
    %449 = memref.load %arg1[%c35] : memref<98xf32, #tpu.memory_space<smem>>
    %c84 = arith.constant 84 : index
    %450 = memref.load %arg1[%c84] : memref<98xf32, #tpu.memory_space<smem>>
    %451 = vector.extract_strided_slice %90 {offsets = [5, 0], sizes = [16, 16], strides = [1, 1]} : vector<22x16xf32> to vector<16x16xf32>
    %452 = vector.broadcast %449 : f32 to vector<16x16xf32>
    %453 = arith.mulf %452, %451 : vector<16x16xf32>
    %454 = vector.extract_strided_slice %97 {offsets = [5, 0], sizes = [16, 16], strides = [1, 1]} : vector<22x16xf32> to vector<16x16xf32>
    %455 = vector.broadcast %450 : f32 to vector<16x16xf32>
    %456 = arith.mulf %455, %454 : vector<16x16xf32>
    %457 = arith.addf %453, %456 : vector<16x16xf32>
    %c36 = arith.constant 36 : index
    %458 = memref.load %arg1[%c36] : memref<98xf32, #tpu.memory_space<smem>>
    %c85 = arith.constant 85 : index
    %459 = memref.load %arg1[%c85] : memref<98xf32, #tpu.memory_space<smem>>
    %460 = vector.extract_strided_slice %91 {offsets = [5, 0], sizes = [16, 16], strides = [1, 1]} : vector<22x16xf32> to vector<16x16xf32>
    %461 = vector.broadcast %458 : f32 to vector<16x16xf32>
    %462 = arith.mulf %461, %460 : vector<16x16xf32>
    %463 = vector.extract_strided_slice %98 {offsets = [5, 0], sizes = [16, 16], strides = [1, 1]} : vector<22x16xf32> to vector<16x16xf32>
    %464 = vector.broadcast %459 : f32 to vector<16x16xf32>
    %465 = arith.mulf %464, %463 : vector<16x16xf32>
    %466 = arith.addf %462, %465 : vector<16x16xf32>
    %467 = arith.addf %457, %466 : vector<16x16xf32>
    %c37 = arith.constant 37 : index
    %468 = memref.load %arg1[%c37] : memref<98xf32, #tpu.memory_space<smem>>
    %c86 = arith.constant 86 : index
    %469 = memref.load %arg1[%c86] : memref<98xf32, #tpu.memory_space<smem>>
    %470 = vector.extract_strided_slice %92 {offsets = [5, 0], sizes = [16, 16], strides = [1, 1]} : vector<22x16xf32> to vector<16x16xf32>
    %471 = vector.broadcast %468 : f32 to vector<16x16xf32>
    %472 = arith.mulf %471, %470 : vector<16x16xf32>
    %473 = vector.extract_strided_slice %99 {offsets = [5, 0], sizes = [16, 16], strides = [1, 1]} : vector<22x16xf32> to vector<16x16xf32>
    %474 = vector.broadcast %469 : f32 to vector<16x16xf32>
    %475 = arith.mulf %474, %473 : vector<16x16xf32>
    %476 = arith.addf %472, %475 : vector<16x16xf32>
    %477 = arith.addf %467, %476 : vector<16x16xf32>
    %c38 = arith.constant 38 : index
    %478 = memref.load %arg1[%c38] : memref<98xf32, #tpu.memory_space<smem>>
    %c87 = arith.constant 87 : index
    %479 = memref.load %arg1[%c87] : memref<98xf32, #tpu.memory_space<smem>>
    %480 = vector.extract_strided_slice %93 {offsets = [5, 0], sizes = [16, 16], strides = [1, 1]} : vector<22x16xf32> to vector<16x16xf32>
    %481 = vector.broadcast %478 : f32 to vector<16x16xf32>
    %482 = arith.mulf %481, %480 : vector<16x16xf32>
    %483 = vector.extract_strided_slice %100 {offsets = [5, 0], sizes = [16, 16], strides = [1, 1]} : vector<22x16xf32> to vector<16x16xf32>
    %484 = vector.broadcast %479 : f32 to vector<16x16xf32>
    %485 = arith.mulf %484, %483 : vector<16x16xf32>
    %486 = arith.addf %482, %485 : vector<16x16xf32>
    %487 = arith.addf %477, %486 : vector<16x16xf32>
    %c39 = arith.constant 39 : index
    %488 = memref.load %arg1[%c39] : memref<98xf32, #tpu.memory_space<smem>>
    %c88 = arith.constant 88 : index
    %489 = memref.load %arg1[%c88] : memref<98xf32, #tpu.memory_space<smem>>
    %490 = vector.extract_strided_slice %94 {offsets = [5, 0], sizes = [16, 16], strides = [1, 1]} : vector<22x16xf32> to vector<16x16xf32>
    %491 = vector.broadcast %488 : f32 to vector<16x16xf32>
    %492 = arith.mulf %491, %490 : vector<16x16xf32>
    %493 = vector.extract_strided_slice %101 {offsets = [5, 0], sizes = [16, 16], strides = [1, 1]} : vector<22x16xf32> to vector<16x16xf32>
    %494 = vector.broadcast %489 : f32 to vector<16x16xf32>
    %495 = arith.mulf %494, %493 : vector<16x16xf32>
    %496 = arith.addf %492, %495 : vector<16x16xf32>
    %497 = arith.addf %487, %496 : vector<16x16xf32>
    %c40 = arith.constant 40 : index
    %498 = memref.load %arg1[%c40] : memref<98xf32, #tpu.memory_space<smem>>
    %c89 = arith.constant 89 : index
    %499 = memref.load %arg1[%c89] : memref<98xf32, #tpu.memory_space<smem>>
    %500 = vector.extract_strided_slice %95 {offsets = [5, 0], sizes = [16, 16], strides = [1, 1]} : vector<22x16xf32> to vector<16x16xf32>
    %501 = vector.broadcast %498 : f32 to vector<16x16xf32>
    %502 = arith.mulf %501, %500 : vector<16x16xf32>
    %503 = vector.extract_strided_slice %102 {offsets = [5, 0], sizes = [16, 16], strides = [1, 1]} : vector<22x16xf32> to vector<16x16xf32>
    %504 = vector.broadcast %499 : f32 to vector<16x16xf32>
    %505 = arith.mulf %504, %503 : vector<16x16xf32>
    %506 = arith.addf %502, %505 : vector<16x16xf32>
    %507 = arith.addf %497, %506 : vector<16x16xf32>
    %c41 = arith.constant 41 : index
    %508 = memref.load %arg1[%c41] : memref<98xf32, #tpu.memory_space<smem>>
    %c90 = arith.constant 90 : index
    %509 = memref.load %arg1[%c90] : memref<98xf32, #tpu.memory_space<smem>>
    %510 = vector.extract_strided_slice %96 {offsets = [5, 0], sizes = [16, 16], strides = [1, 1]} : vector<22x16xf32> to vector<16x16xf32>
    %511 = vector.broadcast %508 : f32 to vector<16x16xf32>
    %512 = arith.mulf %511, %510 : vector<16x16xf32>
    %513 = vector.extract_strided_slice %103 {offsets = [5, 0], sizes = [16, 16], strides = [1, 1]} : vector<22x16xf32> to vector<16x16xf32>
    %514 = vector.broadcast %509 : f32 to vector<16x16xf32>
    %515 = arith.mulf %514, %513 : vector<16x16xf32>
    %516 = arith.addf %512, %515 : vector<16x16xf32>
    %517 = arith.addf %507, %516 : vector<16x16xf32>
    %c42 = arith.constant 42 : index
    %518 = memref.load %arg1[%c42] : memref<98xf32, #tpu.memory_space<smem>>
    %c91 = arith.constant 91 : index
    %519 = memref.load %arg1[%c91] : memref<98xf32, #tpu.memory_space<smem>>
    %520 = vector.extract_strided_slice %90 {offsets = [6, 0], sizes = [16, 16], strides = [1, 1]} : vector<22x16xf32> to vector<16x16xf32>
    %521 = vector.broadcast %518 : f32 to vector<16x16xf32>
    %522 = arith.mulf %521, %520 : vector<16x16xf32>
    %523 = vector.extract_strided_slice %97 {offsets = [6, 0], sizes = [16, 16], strides = [1, 1]} : vector<22x16xf32> to vector<16x16xf32>
    %524 = vector.broadcast %519 : f32 to vector<16x16xf32>
    %525 = arith.mulf %524, %523 : vector<16x16xf32>
    %526 = arith.addf %522, %525 : vector<16x16xf32>
    %c43 = arith.constant 43 : index
    %527 = memref.load %arg1[%c43] : memref<98xf32, #tpu.memory_space<smem>>
    %c92 = arith.constant 92 : index
    %528 = memref.load %arg1[%c92] : memref<98xf32, #tpu.memory_space<smem>>
    %529 = vector.extract_strided_slice %91 {offsets = [6, 0], sizes = [16, 16], strides = [1, 1]} : vector<22x16xf32> to vector<16x16xf32>
    %530 = vector.broadcast %527 : f32 to vector<16x16xf32>
    %531 = arith.mulf %530, %529 : vector<16x16xf32>
    %532 = vector.extract_strided_slice %98 {offsets = [6, 0], sizes = [16, 16], strides = [1, 1]} : vector<22x16xf32> to vector<16x16xf32>
    %533 = vector.broadcast %528 : f32 to vector<16x16xf32>
    %534 = arith.mulf %533, %532 : vector<16x16xf32>
    %535 = arith.addf %531, %534 : vector<16x16xf32>
    %536 = arith.addf %526, %535 : vector<16x16xf32>
    %c44 = arith.constant 44 : index
    %537 = memref.load %arg1[%c44] : memref<98xf32, #tpu.memory_space<smem>>
    %c93 = arith.constant 93 : index
    %538 = memref.load %arg1[%c93] : memref<98xf32, #tpu.memory_space<smem>>
    %539 = vector.extract_strided_slice %92 {offsets = [6, 0], sizes = [16, 16], strides = [1, 1]} : vector<22x16xf32> to vector<16x16xf32>
    %540 = vector.broadcast %537 : f32 to vector<16x16xf32>
    %541 = arith.mulf %540, %539 : vector<16x16xf32>
    %542 = vector.extract_strided_slice %99 {offsets = [6, 0], sizes = [16, 16], strides = [1, 1]} : vector<22x16xf32> to vector<16x16xf32>
    %543 = vector.broadcast %538 : f32 to vector<16x16xf32>
    %544 = arith.mulf %543, %542 : vector<16x16xf32>
    %545 = arith.addf %541, %544 : vector<16x16xf32>
    %546 = arith.addf %536, %545 : vector<16x16xf32>
    %c45 = arith.constant 45 : index
    %547 = memref.load %arg1[%c45] : memref<98xf32, #tpu.memory_space<smem>>
    %c94 = arith.constant 94 : index
    %548 = memref.load %arg1[%c94] : memref<98xf32, #tpu.memory_space<smem>>
    %549 = vector.extract_strided_slice %93 {offsets = [6, 0], sizes = [16, 16], strides = [1, 1]} : vector<22x16xf32> to vector<16x16xf32>
    %550 = vector.broadcast %547 : f32 to vector<16x16xf32>
    %551 = arith.mulf %550, %549 : vector<16x16xf32>
    %552 = vector.extract_strided_slice %100 {offsets = [6, 0], sizes = [16, 16], strides = [1, 1]} : vector<22x16xf32> to vector<16x16xf32>
    %553 = vector.broadcast %548 : f32 to vector<16x16xf32>
    %554 = arith.mulf %553, %552 : vector<16x16xf32>
    %555 = arith.addf %551, %554 : vector<16x16xf32>
    %556 = arith.addf %546, %555 : vector<16x16xf32>
    %c46 = arith.constant 46 : index
    %557 = memref.load %arg1[%c46] : memref<98xf32, #tpu.memory_space<smem>>
    %c95 = arith.constant 95 : index
    %558 = memref.load %arg1[%c95] : memref<98xf32, #tpu.memory_space<smem>>
    %559 = vector.extract_strided_slice %94 {offsets = [6, 0], sizes = [16, 16], strides = [1, 1]} : vector<22x16xf32> to vector<16x16xf32>
    %560 = vector.broadcast %557 : f32 to vector<16x16xf32>
    %561 = arith.mulf %560, %559 : vector<16x16xf32>
    %562 = vector.extract_strided_slice %101 {offsets = [6, 0], sizes = [16, 16], strides = [1, 1]} : vector<22x16xf32> to vector<16x16xf32>
    %563 = vector.broadcast %558 : f32 to vector<16x16xf32>
    %564 = arith.mulf %563, %562 : vector<16x16xf32>
    %565 = arith.addf %561, %564 : vector<16x16xf32>
    %566 = arith.addf %556, %565 : vector<16x16xf32>
    %c47 = arith.constant 47 : index
    %567 = memref.load %arg1[%c47] : memref<98xf32, #tpu.memory_space<smem>>
    %c96 = arith.constant 96 : index
    %568 = memref.load %arg1[%c96] : memref<98xf32, #tpu.memory_space<smem>>
    %569 = vector.extract_strided_slice %95 {offsets = [6, 0], sizes = [16, 16], strides = [1, 1]} : vector<22x16xf32> to vector<16x16xf32>
    %570 = vector.broadcast %567 : f32 to vector<16x16xf32>
    %571 = arith.mulf %570, %569 : vector<16x16xf32>
    %572 = vector.extract_strided_slice %102 {offsets = [6, 0], sizes = [16, 16], strides = [1, 1]} : vector<22x16xf32> to vector<16x16xf32>
    %573 = vector.broadcast %568 : f32 to vector<16x16xf32>
    %574 = arith.mulf %573, %572 : vector<16x16xf32>
    %575 = arith.addf %571, %574 : vector<16x16xf32>
    %576 = arith.addf %566, %575 : vector<16x16xf32>
    %c48 = arith.constant 48 : index
    %577 = memref.load %arg1[%c48] : memref<98xf32, #tpu.memory_space<smem>>
    %c97 = arith.constant 97 : index
    %578 = memref.load %arg1[%c97] : memref<98xf32, #tpu.memory_space<smem>>
    %579 = vector.extract_strided_slice %96 {offsets = [6, 0], sizes = [16, 16], strides = [1, 1]} : vector<22x16xf32> to vector<16x16xf32>
    %580 = vector.broadcast %577 : f32 to vector<16x16xf32>
    %581 = arith.mulf %580, %579 : vector<16x16xf32>
    %582 = vector.extract_strided_slice %103 {offsets = [6, 0], sizes = [16, 16], strides = [1, 1]} : vector<22x16xf32> to vector<16x16xf32>
    %583 = vector.broadcast %578 : f32 to vector<16x16xf32>
    %584 = arith.mulf %583, %582 : vector<16x16xf32>
    %585 = arith.addf %581, %584 : vector<16x16xf32>
    %586 = arith.addf %576, %585 : vector<16x16xf32>
    %587 = arith.addf %172, %241 : vector<16x16xf32>
    %588 = arith.addf %310, %379 : vector<16x16xf32>
    %589 = arith.addf %587, %588 : vector<16x16xf32>
    %590 = arith.addf %448, %517 : vector<16x16xf32>
    %591 = arith.addf %590, %586 : vector<16x16xf32>
    %592 = arith.addf %589, %591 : vector<16x16xf32>
    %c0_97 = arith.constant 0 : index
    %593 = memref.load %arg2[%c0_97] : memref<1xf32, #tpu.memory_space<smem>>
    %594 = vector.broadcast %593 : f32 to vector<16x16xf32>
    %595 = arith.addf %592, %594 : vector<16x16xf32>
    %596 = arith.negf %595 : vector<16x16xf32>
    %597 = math.exp %596 : vector<16x16xf32>
    %cst_98 = arith.constant 1.000000e+00 : f32
    %598 = vector.broadcast %cst_98 : f32 to vector<16x16xf32>
    %599 = arith.addf %598, %597 : vector<16x16xf32>
    %600 = arith.divf %598, %599 : vector<16x16xf32>
    %601 = vector.extract_strided_slice %600 {offsets = [0, 0], sizes = [1, 16], strides = [1, 1]} : vector<16x16xf32> to vector<1x16xf32>
    %c0_99 = arith.constant 0 : index
    %c0_100 = arith.constant 0 : index
    %602 = vector.load %arg7[%c0_99, %c0_100] : memref<1x256xf32, #tpu.memory_space<vmem>>, vector<1x16xf32>
    tpu.vector_store %arg7[%c0_99, %c0_100], %601 {strides = array<i32>} : memref<1x256xf32, #tpu.memory_space<vmem>>, vector<1x16xf32>,
    %603 = vector.extract_strided_slice %600 {offsets = [1, 0], sizes = [1, 16], strides = [1, 1]} : vector<16x16xf32> to vector<1x16xf32>
    %c0_101 = arith.constant 0 : index
    %c16_102 = arith.constant 16 : index
    %604 = vector.load %arg7[%c0_101, %c16_102] : memref<1x256xf32, #tpu.memory_space<vmem>>, vector<1x16xf32>
    tpu.vector_store %arg7[%c0_101, %c16_102], %603 {strides = array<i32>} : memref<1x256xf32, #tpu.memory_space<vmem>>, vector<1x16xf32>,
    %605 = vector.extract_strided_slice %600 {offsets = [2, 0], sizes = [1, 16], strides = [1, 1]} : vector<16x16xf32> to vector<1x16xf32>
    %c0_103 = arith.constant 0 : index
    %c32_104 = arith.constant 32 : index
    %606 = vector.load %arg7[%c0_103, %c32_104] : memref<1x256xf32, #tpu.memory_space<vmem>>, vector<1x16xf32>
    tpu.vector_store %arg7[%c0_103, %c32_104], %605 {strides = array<i32>} : memref<1x256xf32, #tpu.memory_space<vmem>>, vector<1x16xf32>,
    %607 = vector.extract_strided_slice %600 {offsets = [3, 0], sizes = [1, 16], strides = [1, 1]} : vector<16x16xf32> to vector<1x16xf32>
    %c0_105 = arith.constant 0 : index
    %c48_106 = arith.constant 48 : index
    %608 = vector.load %arg7[%c0_105, %c48_106] : memref<1x256xf32, #tpu.memory_space<vmem>>, vector<1x16xf32>
    tpu.vector_store %arg7[%c0_105, %c48_106], %607 {strides = array<i32>} : memref<1x256xf32, #tpu.memory_space<vmem>>, vector<1x16xf32>,
    %609 = vector.extract_strided_slice %600 {offsets = [4, 0], sizes = [1, 16], strides = [1, 1]} : vector<16x16xf32> to vector<1x16xf32>
    %c0_107 = arith.constant 0 : index
    %c64_108 = arith.constant 64 : index
    %610 = vector.load %arg7[%c0_107, %c64_108] : memref<1x256xf32, #tpu.memory_space<vmem>>, vector<1x16xf32>
    tpu.vector_store %arg7[%c0_107, %c64_108], %609 {strides = array<i32>} : memref<1x256xf32, #tpu.memory_space<vmem>>, vector<1x16xf32>,
    %611 = vector.extract_strided_slice %600 {offsets = [5, 0], sizes = [1, 16], strides = [1, 1]} : vector<16x16xf32> to vector<1x16xf32>
    %c0_109 = arith.constant 0 : index
    %c80_110 = arith.constant 80 : index
    %612 = vector.load %arg7[%c0_109, %c80_110] : memref<1x256xf32, #tpu.memory_space<vmem>>, vector<1x16xf32>
    tpu.vector_store %arg7[%c0_109, %c80_110], %611 {strides = array<i32>} : memref<1x256xf32, #tpu.memory_space<vmem>>, vector<1x16xf32>,
    %613 = vector.extract_strided_slice %600 {offsets = [6, 0], sizes = [1, 16], strides = [1, 1]} : vector<16x16xf32> to vector<1x16xf32>
    %c0_111 = arith.constant 0 : index
    %c96_112 = arith.constant 96 : index
    %614 = vector.load %arg7[%c0_111, %c96_112] : memref<1x256xf32, #tpu.memory_space<vmem>>, vector<1x16xf32>
    tpu.vector_store %arg7[%c0_111, %c96_112], %613 {strides = array<i32>} : memref<1x256xf32, #tpu.memory_space<vmem>>, vector<1x16xf32>,
    %615 = vector.extract_strided_slice %600 {offsets = [7, 0], sizes = [1, 16], strides = [1, 1]} : vector<16x16xf32> to vector<1x16xf32>
    %c0_113 = arith.constant 0 : index
    %c112 = arith.constant 112 : index
    %616 = vector.load %arg7[%c0_113, %c112] : memref<1x256xf32, #tpu.memory_space<vmem>>, vector<1x16xf32>
    tpu.vector_store %arg7[%c0_113, %c112], %615 {strides = array<i32>} : memref<1x256xf32, #tpu.memory_space<vmem>>, vector<1x16xf32>,
    %617 = vector.extract_strided_slice %600 {offsets = [8, 0], sizes = [1, 16], strides = [1, 1]} : vector<16x16xf32> to vector<1x16xf32>
    %c0_114 = arith.constant 0 : index
    %c128 = arith.constant 128 : index
    %618 = vector.load %arg7[%c0_114, %c128] : memref<1x256xf32, #tpu.memory_space<vmem>>, vector<1x16xf32>
    tpu.vector_store %arg7[%c0_114, %c128], %617 {strides = array<i32>} : memref<1x256xf32, #tpu.memory_space<vmem>>, vector<1x16xf32>,
    %619 = vector.extract_strided_slice %600 {offsets = [9, 0], sizes = [1, 16], strides = [1, 1]} : vector<16x16xf32> to vector<1x16xf32>
    %c0_115 = arith.constant 0 : index
    %c144 = arith.constant 144 : index
    %620 = vector.load %arg7[%c0_115, %c144] : memref<1x256xf32, #tpu.memory_space<vmem>>, vector<1x16xf32>
    tpu.vector_store %arg7[%c0_115, %c144], %619 {strides = array<i32>} : memref<1x256xf32, #tpu.memory_space<vmem>>, vector<1x16xf32>,
    %621 = vector.extract_strided_slice %600 {offsets = [10, 0], sizes = [1, 16], strides = [1, 1]} : vector<16x16xf32> to vector<1x16xf32>
    %c0_116 = arith.constant 0 : index
    %c160 = arith.constant 160 : index
    %622 = vector.load %arg7[%c0_116, %c160] : memref<1x256xf32, #tpu.memory_space<vmem>>, vector<1x16xf32>
    tpu.vector_store %arg7[%c0_116, %c160], %621 {strides = array<i32>} : memref<1x256xf32, #tpu.memory_space<vmem>>, vector<1x16xf32>,
    %623 = vector.extract_strided_slice %600 {offsets = [11, 0], sizes = [1, 16], strides = [1, 1]} : vector<16x16xf32> to vector<1x16xf32>
    %c0_117 = arith.constant 0 : index
    %c176 = arith.constant 176 : index
    %624 = vector.load %arg7[%c0_117, %c176] : memref<1x256xf32, #tpu.memory_space<vmem>>, vector<1x16xf32>
    tpu.vector_store %arg7[%c0_117, %c176], %623 {strides = array<i32>} : memref<1x256xf32, #tpu.memory_space<vmem>>, vector<1x16xf32>,
    %625 = vector.extract_strided_slice %600 {offsets = [12, 0], sizes = [1, 16], strides = [1, 1]} : vector<16x16xf32> to vector<1x16xf32>
    %c0_118 = arith.constant 0 : index
    %c192 = arith.constant 192 : index
    %626 = vector.load %arg7[%c0_118, %c192] : memref<1x256xf32, #tpu.memory_space<vmem>>, vector<1x16xf32>
    tpu.vector_store %arg7[%c0_118, %c192], %625 {strides = array<i32>} : memref<1x256xf32, #tpu.memory_space<vmem>>, vector<1x16xf32>,
    %627 = vector.extract_strided_slice %600 {offsets = [13, 0], sizes = [1, 16], strides = [1, 1]} : vector<16x16xf32> to vector<1x16xf32>
    %c0_119 = arith.constant 0 : index
    %c208 = arith.constant 208 : index
    %628 = vector.load %arg7[%c0_119, %c208] : memref<1x256xf32, #tpu.memory_space<vmem>>, vector<1x16xf32>
    tpu.vector_store %arg7[%c0_119, %c208], %627 {strides = array<i32>} : memref<1x256xf32, #tpu.memory_space<vmem>>, vector<1x16xf32>,
    %629 = vector.extract_strided_slice %600 {offsets = [14, 0], sizes = [1, 16], strides = [1, 1]} : vector<16x16xf32> to vector<1x16xf32>
    %c0_120 = arith.constant 0 : index
    %c224 = arith.constant 224 : index
    %630 = vector.load %arg7[%c0_120, %c224] : memref<1x256xf32, #tpu.memory_space<vmem>>, vector<1x16xf32>
    tpu.vector_store %arg7[%c0_120, %c224], %629 {strides = array<i32>} : memref<1x256xf32, #tpu.memory_space<vmem>>, vector<1x16xf32>,
    %631 = vector.extract_strided_slice %600 {offsets = [15, 0], sizes = [1, 16], strides = [1, 1]} : vector<16x16xf32> to vector<1x16xf32>
    %c0_121 = arith.constant 0 : index
    %c240 = arith.constant 240 : index
    %632 = vector.load %arg7[%c0_121, %c240] : memref<1x256xf32, #tpu.memory_space<vmem>>, vector<1x16xf32>
    tpu.vector_store %arg7[%c0_121, %c240], %631 {strides = array<i32>} : memref<1x256xf32, #tpu.memory_space<vmem>>, vector<1x16xf32>,
    %c0_122 = arith.constant 0 : index
    %c0_123 = arith.constant 0 : index
    %633 = vector.load %arg7[%c0_122, %c0_123] : memref<1x256xf32, #tpu.memory_space<vmem>>, vector<1x256xf32>
    %634 = vector.shape_cast %633 : vector<1x256xf32> to vector<1x256xf32>
    %635 = vector.broadcast %634 : vector<1x256xf32> to vector<8x256xf32>
    %c0_124 = arith.constant 0 : index
    %c0_125 = arith.constant 0 : index
    %c0_126 = arith.constant 0 : index
    %636 = vector.load %arg3[%c0_124, %c0_125, %c0_126] : memref<1x4x256xf32, #tpu.memory_space<vmem>>, vector<1x4x256xf32>
    %637 = vector.shape_cast %636 : vector<1x4x256xf32> to vector<4x256xf32>
    %638 = vector.extract_strided_slice %635 {offsets = [0, 0], sizes = [4, 256], strides = [1, 1]} : vector<8x256xf32> to vector<4x256xf32>
    %639 = arith.mulf %637, %638 : vector<4x256xf32>
    %c0_127 = arith.constant 0 : index
    %c0_128 = arith.constant 0 : index
    %c0_129 = arith.constant 0 : index
    %640 = vector.load %arg4[%c0_127, %c0_128, %c0_129] : memref<1x4x256xf32, #tpu.memory_space<vmem>>, vector<1x4x256xf32>
    %641 = vector.shape_cast %640 : vector<1x4x256xf32> to vector<4x256xf32>
    %642 = vector.shape_cast %639 : vector<4x256xf32> to vector<1x4x256xf32>
    tpu.vector_store %arg4[%c0_127, %c0_128, %c0_129], %642 {strides = array<i32>} : memref<1x4x256xf32, #tpu.memory_space<vmem>>, vector<1x4x256xf32>,
    return
  }
  func.func @transform_0(%arg0: i32) -> i32 {
    %c0_i32 = arith.constant 0 : i32
    %c0_i32_0 = arith.constant 0 : i32
    return %c0_i32 : i32
  }
  func.func @transform_1(%arg0: i32) -> i32 {
    %c0_i32 = arith.constant 0 : i32
    %c0_i32_0 = arith.constant 0 : i32
    return %c0_i32 : i32
  }
  func.func @transform_2(%arg0: i32) -> (i32, i32, i32) {
    %c0_i32 = arith.constant 0 : i32
    %c0_i32_0 = arith.constant 0 : i32
    %c0_i32_1 = arith.constant 0 : i32
    return %arg0, %c0_i32, %c0_i32_0 : i32, i32, i32
  }
  func.func @transform_3(%arg0: i32) -> (i32, i32, i32) {
    %c0_i32 = arith.constant 0 : i32
    %c0_i32_0 = arith.constant 0 : i32
    %c0_i32_1 = arith.constant 0 : i32
    return %arg0, %c0_i32, %c0_i32_0 : i32, i32, i32
  }
}

</mosaic_0001>

<bundles_post_ra>
// kernel: tpu_custom_call.1
= control target key start
LH: loop header
LB: loop body
LE: loop exit
PB: predicated region body
PF: predicated region fallthrough
CT: control target
= control target key end

     0   :  { %s4200_s0 = inlined_call_operand.vmem [shape: f32[98], index: 0, kind: input, shape index: {}]   ;;  %s4201_s1 = inlined_call_operand.<no memory space> [shape: f32[1], index: 1, kind: input, shape index: {}]   ;;  %s4202_s2 = inlined_call_operand.hbm [shape: f32[2,4,256], index: 2, kind: input, shape index: {}]   ;;  %s4203_s3 = inlined_call_operand.hbm [shape: f32[2,4,256], index: 3, kind: output, shape index: {}]  }
   0x1   :  { %4281 = sst [smem:[#allocation71_spill]] %s4200_s0 }
   0x2   :  { %4282 = sst [smem:[#allocation72_spill]] %s4202_s2 }
   0x3   :  { %4283 = sst [smem:[#allocation73_spill]] %s4203_s3 }
   0x4   :  { %8 = sst [smem:[#allocation5]] %s4201_s1 }
   0x5   :  { %9 = vsyncpa [#allocation9], 0 }
   0x6   :  { %10 = vsyncpa [#allocation7], 0 }
   0x7   :  { %12 = vsyncpa [#allocation7 + $0x1], 0 }
   0x8   :  { %13 = vsyncpa [#allocation8], 0 }
   0x9   :  { %15 = vsyncpa [#allocation8 + $0x1], 0  ;;  %s2376_s14 = smov 0   ;;  %s2378_s15 = smov 0  }
   0xa   :  { %s2380_s16 = smov 0   ;;  %s2382_s17 = smov 0  }
   0xb LB: > { %4284 = sst [smem:[#allocation15_spill]] %s2313_s14  ;;  %s2397_s1 = sadd.s32 4294967295, %s2325_s17   ;;  %s2325_s17 = sphi %s2382_s17, %s4466_s17   ;;  %s2321_s16 = sphi %s2380_s16, %s4469_s16   ;;  %s2317_s15 = sphi %s2378_s15, %s4468_s15   ;;  %s2313_s14 = sphi %s2376_s14, %s4467_s14  }
   0xc   : > { %4285 = sst [smem:[#allocation16_spill]] %s2317_s15  ;;  %s2004_s18 = sadd.s32 4294967294, %s2325_s17  }
   0xd   : > { %4286 = sst [smem:[#allocation17_spill]] %s2321_s16  ;;  %p83_p0 = scmp.ne.s32.totalorder %s2317_s15, %s2313_s14 }
   0xe   : > { %4287 = sst [smem:[#allocation18_spill]] %s2325_s17  ;;  %p4204_p1 = scmp.eq.s32.totalorder %s2397_s1, 0 }
   0xf   : > { %p113_p3 = scmp.eq.s32.totalorder %s2004_s18, 1  ;;  %p2005_p5 = scmp.ge.s32.totalorder %s2325_s17, 1 }
  0x10   : > { %p2406_p4 = por %p4204_p1, %p83_p0  ;;  %p120_p7 = scmp.lt.s32.totalorder %s2325_s17, 3 }
  0x11   : > { %p2411_p6 = por %p113_p3, %p83_p0  ;;  %s4291_s0 = sld [smem:[#allocation71_spill]] }
  0x12   : > { %s4288_s19 = scalar_select %p2406_p4, 1, 0 }
  0x13   : > { %s4289_s20 = scalar_select %p2411_p6, 1, 0 }
  0x14   : > { %p2419_p8 = pnand %p2005_p5, %p120_p7  ;;  %s2427_s25 = sadd.s32 1, %s2325_s17  }
  0x15   : > { %4290 = sst [smem:[#allocation19_spill]] %s4289_s20  ;;  %s67_s27 = ssub.s32 %s2325_s17, %s2427_s25 }
  0x16   : > { %s4292_s24 = scalar_select %p2419_p8, 1, 0 }
  0x17   : > { %s133_s23 = sshll.u32 %s4291_s0, 4  ;;  %p2129_p10 = pneg %p2419_p8  ;;  %s134_s23 = int_to_ptr.vmem [resolvable:$true] %s133_s23 }
  0x18   : > { %4293 = sst [smem:[#allocation20_spill]] %s2427_s25  ;;  %p2437_p12 = scmp.eq.s32.totalorder %s67_s27, 0 }
  0x19   : > { %p2431_p11 = pnand %p2129_p10, %p4204_p1  ;;  %s70_s29 = sadd.s32 1, %s2321_s16 }
  0x1a   : > { %p77_p13 = scmp.ne.s32.totalorder %s2321_s16, %s2317_s15  ;;  %s2214_s30 = scalar_lea.vmem %s134_s23, 16 }
  0x1b   : > { %p2215_p0 = scmp.ne.s32.totalorder %s134_s23, %s2214_s30  ;;  %p2216_p3 = pneg %p2431_p11 }
  0x1c   : > { %p2222_p9 = scmp.lt.s32.totalorder %s134_s23, %s134_s23  ;;  %p2223_p2 = scmp.lt.s32.totalorder %s2214_s30, %s2214_s30 }
  0x1d   : > { %p2217_p5 = pnand %p2216_p3, %p2215_p0 }
  0x1e   : > { %p2224_p10 = por %p2223_p2, %p2222_p9 }
  0x1f   : > { %p2218_p7 = pneg %p2217_p5 }
  0x21   : > { %p2225_p1 = pnand %p2224_p10, %p2218_p7 }
  0x23   : > { %2228 = shalt.err (!%p2225_p1)
}
  0x24   : > { %s2327_s4 = smov [#allocation6]   ;;  %p78_p2 = scmp.eq.s32.totalorder %s2325_s17, 0 }
  0x25   : > { %2132 = dma.vmem_to_smem (!%p2431_p11), %s134_s23, 16, %s2327_s4, [#allocation9]  }
  0x26   : > { %s2451_s5 = scalar_select %p2437_p12, %s2321_s16, %s70_s29  }
  0x27   : > { %p4297_p1 = scmp.eq.s32.totalorder %s2397_s1, 1  ;;  %p2142_p0 = scmp.lt.s32.totalorder %s2325_s17, 2 }
  0x28   : > { %4296 = sst [smem:[#allocation21_spill]] %s2451_s5  ;;  %s147_s7 = sand.u32 1, %s2321_s16  }
  0x29   : > { %p2459_p9 = por %p4297_p1, %p77_p13  ;;  %p79_p3 = por %p78_p2, %p77_p13 }
  0x2a   : > { %s2008_s8 = sshll.u32 %s147_s7, 3  ;;  %s2119_s9 = sshll.u32 %s2325_s17, 7 }
  0x2b   : > { %s4298_s6 = scalar_select %p2459_p9, 1, 0 }
  0x2c   : > { %s4300_s2 = sld [smem:[#allocation72_spill]]  ;;  %s151_s13 = scalar_lea.vmem [#allocation10], %s2008_s8 }
  0x2d   : > { %4299 = sst [smem:[#allocation22_spill]] %s4298_s6  ;;  %s159_s18 = sshll.u32 %s151_s13, 4  ;;  %s160_s18 = int_to_ptr.vmem [resolvable:$true] %s159_s18 }
  0x2e   : > { %p2474_p11 = pnand %p2142_p0, %p79_p3  ;;  %s148_s22 = scalar_lea.sflag [#allocation7], %s147_s7 }
  0x30   : > { %p2231_p13 = pneg %p2474_p11 }
  0x32   : > { %s2472_s12 = scalar_lea.hbm %s4300_s2, %s2119_s9  ;;  %s2234_s28 = scalar_lea.hbm %s4300_s2, 256 }
  0x33   : > { %s2229_s23 = scalar_lea.hbm %s2472_s12, 128  ;;  %p2235_p10 = scmp.lt.s32.totalorder %s2472_s12, %s4300_s2 }
  0x34   : > { %p2230_p12 = scmp.ne.s32.totalorder %s2472_s12, %s2229_s23  ;;  %p2236_p2 = scmp.lt.s32.totalorder %s2234_s28, %s2229_s23 }
  0x36   : > { %p2232_p5 = pnand %p2231_p13, %p2230_p12  ;;  %p2237_p1 = por %p2236_p2, %p2235_p10 }
  0x38   : > { %p2233_p7 = pneg %p2232_p5 }
  0x3a   : > { %p2238_p0 = pnand %p2237_p1, %p2233_p7 }
  0x3c   : > { %2241 = shalt.err (!%p2238_p0)
}
  0x3d   : > { %s2242_s4 = scalar_lea.vmem %s160_s18, 128  ;;  %s2328_s7 = smov [#allocation10]  }
  0x3e   : > { %p2243_p3 = scmp.ne.s32.totalorder %s160_s18, %s2242_s4  ;;  %s2247_s8 = sshll.u32 %s2328_s7, 4  ;;  %s2248_s8 = int_to_ptr.vmem [resolvable:$false] %s2247_s8 }
  0x3f   : > { %s2249_s9 = scalar_lea.vmem %s2248_s8, 256  ;;  %p2250_p12 = scmp.lt.s32.totalorder %s160_s18, %s2248_s8 }
  0x40   : > { %p2245_p6 = pnand %p2243_p3, %p2231_p13  ;;  %p2251_p5 = scmp.lt.s32.totalorder %s2249_s9, %s2242_s4 }
  0x42   : > { %p2246_p9 = pneg %p2245_p6  ;;  %p2252_p4 = por %p2251_p5, %p2250_p12 }
  0x44   : > { %p2253_p8 = pnand %p2252_p4, %p2246_p9 }
  0x46   : > { %2256 = shalt.err (!%p2253_p8)
}
  0x47   : > { %2136 = dma.hbm_to_vmem [thread:$0]  (!%p2474_p11), %s2472_s12, 128, %s160_s18, %s148_s22  }
  0x48   : > { %p4302_p7 = scmp.ne.s32.totalorder %s4292_s24, 0 }
  0x4a   : > { %168 = sbr.rel (%p4302_p7) target bundleno = 825 (0x339), region = 32 }
  0x4f   : > { %p4303_p10 = scmp.eq.s32.totalorder %s2397_s1, 0 }
  0x51   : > { %2300 = dma.done.wait (%p4303_p10), [#allocation9], 16   ;;  %p4304_p6 = pmov %p4303_p10 }
  0x52   : > { %s2499_s10 = sand.u32 1, %s2317_s15   ;;  %p4305_p4 = scmp.ne.s32.totalorder %s4288_s19, 0 }
  0x53   : > { %2302 = vsyncadd (%p4304_p6), [#allocation9], 4294967280  ;;  %s4208_s11 = sshll.u32 %s2499_s10, 3  ;;  %s175_s13 = scalar_lea.sflag [#allocation7], %s2499_s10 }
  0x54   : > { %s2505_s12 = scalar_lea.vmem [#allocation10], %s4208_s11 }
  0x55   : > { %2304 = dma.done.wait (%p4305_p4), %s175_s13, 128  }
  0x56   : > { %2306 = vsyncadd (%p4305_p4), %s175_s13, 4294967168 }
  0x57   : > { %183 = sfence }
  0x58   : > { %v223_v0 = vld [vmem:[%s2505_s12] sm:$0xff]  ;;  %vm227_vm0 = vcmask 1043456   ;;  %vm202_vm1 = vcmask 174080   ;;  %v2329_v5 = vmov 0.0   ;;  %vm205_vm2 = vcmask 23552   ;;  %s2330_s19 = smov 115  }
  0x59   : > { %v228_v1 = vsel %vm227_vm0, %v223_v0, -inf  ;;  %v242_v2 = vsel %vm227_vm0, %v223_v0, 0.0  ;;  %203 = vst.msk [vmem:[#allocation2] sm:$0x7] %vm202_vm1, %v2329_v5  ;;  %vm210_vm3 = vcmask 179352   ;;  %v225_v14 = vcombine.high %v223_v0, %v223_v0  ;;  %s2331_s24 = smov 3  }
  0x5a   : > { %v229_v3 = vrot.slane %v228_v1, 4  ;;  %v243_v4 = vrot.slane %v242_v2, 4  ;;  %204 = vst.msk [vmem:[#allocation2 + $0x13] sm:$0x7] %vm202_vm1, %v2329_v5  ;;  %215 = vst.msk [vmem:[#allocation3] sm:$0x7] %vm202_vm1, %v2329_v5 }
  0x5b   : > { %216 = vst.msk [vmem:[#allocation3 + $0x13] sm:$0x7] %vm202_vm1, %v2329_v5  ;;  %v249_v18 = vsel %vm227_vm0, %v225_v14, 0.0  ;;  %s2332_s18 = smov 99   ;;  %v235_v20 = vsel %vm227_vm0, %v225_v14, -inf  ;;  %s2333_s21 = smov 83  }
  0x5c   : > { %206 = vst.msk [vmem:[#allocation2] sm:$0xff] %vm205_vm2, %v2329_v5  ;;  %207 = vst.msk [vmem:[#allocation2 + $0x8] sm:$0xff] %vm205_vm2, %v2329_v5  ;;  %v230_v6 = vmax.f32 %v228_v1, %v229_v3  ;;  %v244_v7 = vadd.f32 %v243_v4, %v242_v2  ;;  %v250_v19 = vrot.slane %v249_v18, 4  ;;  %v236_v22 = vrot.slane %v235_v20, 4  ;;  %s2334_s22 = smov 67   ;;  %s2335_s23 = smov 51  }
  0x5d   : > { %218 = vst.msk [vmem:[#allocation3 + $0x8] sm:$0xff] %vm205_vm2, %v2329_v5  ;;  %217 = vst.msk [vmem:[#allocation3] sm:$0xff] %vm205_vm2, %v2329_v5  ;;  %s2336_s26 = smov 35   ;;  %s2337_s27 = smov 19   ;;  %vm208_vm4 = vcmask 21504   ;;  %vm213_vm5 = vcmask 177304  }
  0x5e   : > { %211 = vst.msk [vmem:[#allocation2] sm:$0xff] %vm210_vm3, %v2329_v5  ;;  %212 = vst.msk [vmem:[#allocation2 + $0x8] sm:$0xff] %vm210_vm3, %v2329_v5  ;;  %v231_v8 = vrot.slane %v230_v6, 2  ;;  %v245_v9 = vrot.slane %v244_v7, 2  ;;  %v251_v21 = vadd.f32 %v250_v19, %v249_v18  ;;  %v237_v24 = vmax.f32 %v235_v20, %v236_v22  ;;  %s2032_s28 = sld [smem:[#allocation6 + $0x9]]  ;;  %s4310_s5 = smov 127  }
  0x5f   : > { %221 = vst.msk [vmem:[#allocation3 + $0x8] sm:$0xff] %vm210_vm3, %v2329_v5  ;;  %220 = vst.msk [vmem:[#allocation3] sm:$0xff] %vm210_vm3, %v2329_v5  ;;  %vm262_vm6 = vcmask 147480   ;;  %s2562_s29 = sld [smem:[#allocation6 + $0x1]]  ;;  %s4223_s16 = smov 123   ;;  %vm1616_vm7 = vcmask 1046528  }
  0x60   : > { %v232_v10 = vmax.f32 %v230_v6, %v231_v8  ;;  %v246_v11 = vadd.f32 %v245_v9, %v244_v7  ;;  %v252_v23 = vrot.slane %v251_v21, 2  ;;  %v238_v26 = vrot.slane %v237_v24, 2  ;;  %219 = vst.msk [vmem:[#allocation3 + $0x10] sm:$0x3f] %vm208_vm4, %v2329_v5  ;;  %209 = vst.msk [vmem:[#allocation2 + $0x10] sm:$0x3f] %vm208_vm4, %v2329_v5 }
  0x61   : > { %222 = vst.msk [vmem:[#allocation3 + $0x10] sm:$0x3f] %vm213_vm5, %v2329_v5  ;;  %214 = vst.msk [vmem:[#allocation2 + $0x10] sm:$0x3f] %vm213_vm5, %v2329_v5  ;;  %s2033_s30 = sld [smem:[#allocation6 + $0x3a]]  ;;  %s4312_s3 = smov 125  }
  0x62   : > { %v233_v12 = vrot.slane %v232_v10, 1  ;;  %v247_v13 = vrot.slane %v246_v11, 1  ;;  %v253_v25 = vadd.f32 %v252_v23, %v251_v21  ;;  %v239_v28 = vmax.f32 %v237_v24, %v238_v26  ;;  %s2566_s4 = sld [smem:[#allocation6 + $0x32]] }
  0x63   : > { %s2037_s7 = sld [smem:[#allocation6 + $0x3c]]  ;;  %vm1643_vm8 = vcmask 1045504  }
  0x64   : > { %v234_v15 = vmax.f32 %v232_v10, %v233_v12  ;;  %v248_v16 = vadd.f32 %v247_v13, %v246_v11  ;;  %v254_v27 = vrot.slane %v253_v25, 1  ;;  %v240_v30 = vrot.slane %v239_v28, 1  ;;  %s2568_s8 = sld [smem:[#allocation6 + $0x33]] }
  0x65   : > { %s2036_s9 = sld [smem:[#allocation6 + $0xb]]  ;;  %v2584_v46 = vstv %s2032_s28  ;;  %v409_v48 = vstv %s2562_s29 }
  0x66   : > { %269 = vrot.lane.b32.xlu1 %v234_v15, %s2330_s19  ;;  %259 = vrot.lane.b32.xlu0 %v234_v15, %s2331_s24  ;;  %v256_v17 = vmul.f32 0.25, %v248_v16  ;;  %v255_v29 = vadd.f32 %v254_v27, %v253_v25  ;;  %v241_v32 = vmax.f32 %v239_v28, %v240_v30  ;;  %s2572_s13 = sld [smem:[#allocation6 + $0x2]] }
  0x67   : > { %v2586_v47 = vstv %s2033_s30  ;;  %s2625_s28 = sld [smem:[#allocation6 + $0x55]] }
  0x68   : > { %v257_v31 = vmul.f32 0.25, %v255_v29  ;;  %v412_v49 = vstv %s2566_s4  ;;  %s2631_s30 = sld [smem:[#allocation6 + $0x36]] }
  0x69   : > { %v2596_v53 = vstv %s2037_s7  ;;  %s4213_s7 = smov 126   ;;  %s2648_s11 = sld [smem:[#allocation6 + $0x5]] }
  0x6a   : > { %273 = vrot.lane.b32.xlu1 %v256_v17, %s2330_s19  ;;  %277 = vrot.lane.b32.xlu0 %v234_v15, %s2332_s18  ;;  %v432_v54 = vstv %s2568_s8  ;;  %s2034_s0 = sld [smem:[#allocation6 + $0xa]] }
  0x6b   : > { %v2615_v59 = vstv %s2036_s9  ;;  %s4209_s9 = smov 127   ;;  %s2039_s2 = sld [smem:[#allocation6 + $0x3d]] }
  0x6c   : > { %v429_v60 = vstv %s2572_s13  ;;  %s2038_s15 = sld [smem:[#allocation6 + $0xc]] }
  0x6d   : > { %v2682_v27 = vstv %s2625_s28  ;;  %s2030_s28 = sld [smem:[#allocation6 + $0x8]] }
  0x6e   : > { %281 = vrot.lane.b32.xlu1 %v256_v17, %s2332_s18  ;;  %285 = vrot.lane.b32.xlu0 %v234_v15, %s2333_s21  ;;  %v492_v28 = vstv %s2631_s30  ;;  %s2735_s25 = sld [smem:[#allocation6 + $0xf]] }
  0x6f   : > { %s2746_s17 = sld [smem:[#allocation6 + $0x47]] }
  0x70   : > { %s2754_s20 = sld [smem:[#allocation6 + $0x48]] }
  0x71   : > { %s2765_s14 = sld [smem:[#allocation6 + $0x56]] }
  0x72   : > { %289 = vrot.lane.b32.xlu1 %v256_v17, %s2333_s21  ;;  %293 = vrot.lane.b32.xlu0 %v234_v15, %s2334_s22  ;;  %s2800_s6 = sld [smem:[#allocation6 + $0x4e]] }
  0x73   : > { %s2808_s29 = sld [smem:[#allocation6 + $0x18]] }
  0x74   : > { %s2818_s4 = sld [smem:[#allocation6 + $0x26]] }
  0x75   : > { %s2828_s8 = sld [smem:[#allocation6 + $0x57]] }
  0x76   : > { %297 = vrot.lane.b32.xlu1 %v256_v17, %s2334_s22  ;;  %265 = vrot.lane.b32.xlu0 %v256_v17, %s2331_s24  ;;  %s2836_s13 = sld [smem:[#allocation6 + $0x2c]] }
  0x77   : > { %s2922_s30 = sld [smem:[#allocation6 + $0x38]] }
  0x7a   : > { %305 = vrot.lane.b32.xlu1 %v256_v17, %s2335_s23  ;;  %301 = vrot.lane.b32.xlu0 %v234_v15, %s2335_s23 }
  0x7e   : > { %313 = vrot.lane.b32.xlu1 %v256_v17, %s2336_s26  ;;  %309 = vrot.lane.b32.xlu0 %v234_v15, %s2336_s26 }
  0x82   : > { %321 = vrot.lane.b32.xlu1 %v256_v17, %s2337_s27  ;;  %317 = vrot.lane.b32.xlu0 %v234_v15, %s2337_s27 }
  0x86   : > { %331 = vrot.lane.b32.xlu1 %v257_v31, %s2331_s24  ;;  %326 = vrot.lane.b32.xlu0 %v241_v32, %s2331_s24  ;;  %s2576_s24 = sld [smem:[#allocation6 + $0x34]] }
  0x8a   : > { %339 = vrot.lane.b32.xlu1 %v257_v31, %s2330_s19  ;;  %335 = vrot.lane.b32.xlu0 %v241_v32, %s2330_s19  ;;  %s2574_s19 = sld [smem:[#allocation6 + $0x3e]] }
  0x8c   : > { %v452_v4 = vstv %s2576_s24  ;;  %s2857_s24 = sld [smem:[#allocation6 + $0x4f]] }
  0x8e   : > { %347 = vrot.lane.b32.xlu1 %v257_v31, %s2332_s18  ;;  %343 = vrot.lane.b32.xlu0 %v241_v32, %s2332_s18  ;;  %s2580_s18 = sld [smem:[#allocation6 + $0xd]] }
  0x90   : > { %v2628_v3 = vstv %s2574_s19  ;;  %s2642_s19 = sld [smem:[#allocation6 + $0x24]] }
  0x92   : > { %355 = vrot.lane.b32.xlu1 %v257_v31, %s2333_s21  ;;  %351 = vrot.lane.b32.xlu0 %v241_v32, %s2333_s21  ;;  %s2590_s21 = sld [smem:[#allocation6 + $0x3]] }
  0x94   : > { %v2645_v7 = vstv %s2580_s18  ;;  %s2659_s18 = sld [smem:[#allocation6 + $0x37]] }
  0x96   : > { %363 = vrot.lane.b32.xlu1 %v257_v31, %s2334_s22  ;;  %359 = vrot.lane.b32.xlu0 %v241_v32, %s2334_s22  ;;  %s2592_s22 = sld [smem:[#allocation6 + $0x41]] }
  0x98   : > { %v449_v8 = vstv %s2590_s21  ;;  %s2859_s21 = sld [smem:[#allocation6 + $0x23]] }
  0x9a   : > { %371 = vrot.lane.b32.xlu1 %v257_v31, %s2335_s23  ;;  %367 = vrot.lane.b32.xlu0 %v241_v32, %s2335_s23  ;;  %s2599_s23 = sld [smem:[#allocation6 + $0x35]] }
  0x9c   : > { %v2656_v15 = vstv %s2592_s22  ;;  %s2670_s22 = sld [smem:[#allocation6 + $0x6]] }
  0x9d   : > { %4306 = vst [vmem:[#allocation23_spill] sm:$0xff] %v2656_v15 }
  0x9e   : > { %379 = vrot.lane.b32.xlu1 %v257_v31, %s2336_s26  ;;  %375 = vrot.lane.b32.xlu0 %v241_v32, %s2336_s26  ;;  %s2613_s26 = sld [smem:[#allocation6 + $0x10]] }
  0xa0   : > { %v472_v16 = vstv %s2599_s23  ;;  %s2876_s23 = sld [smem:[#allocation6 + $0x54]] }
  0xa2   : > { %387 = vrot.lane.b32.xlu1 %v257_v31, %s2337_s27  ;;  %383 = vrot.lane.b32.xlu0 %v241_v32, %s2337_s27  ;;  %s2618_s27 = sld [smem:[#allocation6 + $0x4]]  ;;  %v2697_v31 = vstv %s2642_s19  ;;  %v489_v32 = vstv %s2648_s11  ;;  %s4308_s19 = smov 126  }
  0xa3   : > { %s2908_s11 = sld [smem:[#allocation6 + $0x7]] }
  0xa4   : > { %v2673_v19 = vstv %s2613_s26  ;;  %s2685_s26 = sld [smem:[#allocation6 + $0x39]] }
  0xa5   : > { %4307 = vst [vmem:[#allocation24_spill] sm:$0xff] %v2673_v19 }
  0xa8   : > { %v469_v20 = vstv %s2618_s27  ;;  %s2898_s27 = sld [smem:[#allocation6 + $0x4a]] }
  0xd8   : > { %v270_v33 = vpop.permute.xlu1 %269  ;;  %v260_v34 = vpop.permute.xlu0 %259 }
  0xd9   : > { %272 = vst.msk [vmem:[#allocation2 + $0x4] sm:$0x1] %vm262_vm6, %v270_v33  ;;  %263 = vst.msk [vmem:[#allocation2 + $0x3] sm:$0x1] %vm262_vm6, %v260_v34 }
  0xdc   : > { %v274_v35 = vpop.permute.xlu1 %273  ;;  %v278_v36 = vpop.permute.xlu0 %277 }
  0xdd   : > { %276 = vst.msk [vmem:[#allocation3 + $0x4] sm:$0x1] %vm262_vm6, %v274_v35  ;;  %280 = vst.msk [vmem:[#allocation2 + $0x5] sm:$0x1] %vm262_vm6, %v278_v36 }
  0xe0   : > { %v282_v37 = vpop.permute.xlu1 %281  ;;  %v286_v38 = vpop.permute.xlu0 %285 }
  0xe1   : > { %284 = vst.msk [vmem:[#allocation3 + $0x5] sm:$0x1] %vm262_vm6, %v282_v37  ;;  %288 = vst.msk [vmem:[#allocation2 + $0x6] sm:$0x1] %vm262_vm6, %v286_v38 }
  0xe4   : > { %v290_v39 = vpop.permute.xlu1 %289  ;;  %v294_v40 = vpop.permute.xlu0 %293 }
  0xe5   : > { %292 = vst.msk [vmem:[#allocation3 + $0x6] sm:$0x1] %vm262_vm6, %v290_v39  ;;  %296 = vst.msk [vmem:[#allocation2 + $0x7] sm:$0x1] %vm262_vm6, %v294_v40  ;;  %v512_v39 = vstv %s2659_s18  ;;  %s2961_s18 = sld [smem:[#allocation6 + $0x58]] }
  0xe8   : > { %v298_v41 = vpop.permute.xlu1 %297  ;;  %v266_v42 = vpop.permute.xlu0 %265 }
  0xe9   : > { %300 = vst.msk [vmem:[#allocation3 + $0x7] sm:$0x1] %vm262_vm6, %v298_v41  ;;  %268 = vst.msk [vmem:[#allocation3 + $0x3] sm:$0x1] %vm262_vm6, %v266_v42  ;;  %v509_v42 = vstv %s2670_s22  ;;  %s2971_s22 = sld [smem:[#allocation6 + $0x2d]] }
  0xec   : > { %v306_v43 = vpop.permute.xlu1 %305  ;;  %v302_v44 = vpop.permute.xlu0 %301  ;;  %v2582_v45 = vld [vmem:[#allocation2] sm:$0xff] }
  0xed   : > { %308 = vst.msk [vmem:[#allocation3 + $0x8] sm:$0x1] %vm262_vm6, %v306_v43  ;;  %304 = vst.msk [vmem:[#allocation2 + $0x8] sm:$0x1] %vm262_vm6, %v302_v44  ;;  %v571_v55 = vmul.f32 %v2584_v46, %v2582_v45  ;;  %v410_v57 = vmul.f32 %v409_v48, %v2582_v45  ;;  %v627_v5 = vmul.f32 %v2615_v59, %v2582_v45 }
  0xee   : > { %v430_v6 = vmul.f32 %v429_v60, %v2582_v45  ;;  %v683_v17 = vmul.f32 %v2645_v7, %v2582_v45  ;;  %v450_v18 = vmul.f32 %v449_v8, %v2582_v45  ;;  %v752_v29 = vmul.f32 %v2673_v19, %v2582_v45 }
  0xef   : > { %v470_v30 = vmul.f32 %v469_v20, %v2582_v45  ;;  %v1267_v40 = vmul.f32 %v2697_v31, %v2582_v45  ;;  %v490_v41 = vmul.f32 %v489_v32, %v2582_v45 }
  0xf0   : > { %v2594_v50 = vld [vmem:[#allocation3] sm:$0xff]  ;;  %v314_v51 = vpop.permute.xlu1 %313  ;;  %v310_v52 = vpop.permute.xlu0 %309 }
  0xf1   : > { %316 = vst.msk [vmem:[#allocation3 + $0x9] sm:$0x1] %vm262_vm6, %v314_v51  ;;  %312 = vst.msk [vmem:[#allocation2 + $0x9] sm:$0x1] %vm262_vm6, %v310_v52  ;;  %v575_v56 = vmul.f32 %v2586_v47, %v2594_v50  ;;  %v413_v58 = vmul.f32 %v412_v49, %v2594_v50  ;;  %v631_v63 = vmul.f32 %v2596_v53, %v2594_v50 }
  0xf2   : > { %v433_v0 = vmul.f32 %v432_v54, %v2594_v50  ;;  %v687_v11 = vmul.f32 %v2628_v3, %v2594_v50  ;;  %v453_v12 = vmul.f32 %v452_v4, %v2594_v50  ;;  %v756_v23 = vmul.f32 %v2656_v15, %v2594_v50 }
  0xf3   : > { %v578_v61 = vadd.f32 %v575_v56, %v571_v55  ;;  %v415_v62 = vadd.f32 %v413_v58, %v410_v57  ;;  %v634_v9 = vadd.f32 %v631_v63, %v627_v5  ;;  %v473_v24 = vmul.f32 %v472_v16, %v2594_v50 }
  0xf4   : > { %v322_v1 = vpop.permute.xlu1 %321  ;;  %v318_v2 = vpop.permute.xlu0 %317  ;;  %v435_v10 = vadd.f32 %v433_v0, %v430_v6  ;;  %v690_v21 = vadd.f32 %v687_v11, %v683_v17  ;;  %v455_v22 = vadd.f32 %v453_v12, %v450_v18  ;;  %v759_v33 = vadd.f32 %v756_v23, %v752_v29 }
  0xf5   : > { %324 = vst.msk [vmem:[#allocation3 + $0xa] sm:$0x1] %vm262_vm6, %v322_v1  ;;  %320 = vst.msk [vmem:[#allocation2 + $0xa] sm:$0x1] %vm262_vm6, %v318_v2  ;;  %584 = vrot.lane.b32.xlu1 %v578_v61, %s4213_s7  ;;  %419 = vrot.lane.b32.xlu0 %v415_v62, %s4209_s9  ;;  %s4211_s9 = smov 124   ;;  %v475_v34 = vadd.f32 %v473_v24, %v470_v30  ;;  %v1271_v35 = vmul.f32 %v2682_v27, %v2594_v50  ;;  %v2720_v56 = vstv %s2685_s26  ;;  %s2045_s26 = sld [smem:[#allocation6 + $0x40]] }
  0xf6   : > { %v493_v36 = vmul.f32 %v492_v28, %v2594_v50  ;;  %v513_v51 = vmul.f32 %v512_v39, %v2594_v50  ;;  %v510_v57 = vmul.f32 %v509_v42, %v2582_v45  ;;  %v2729_v58 = vstv %s2030_s28  ;;  %s2742_s28 = sld [smem:[#allocation6 + $0x16]] }
  0xf7   : > { %v1274_v43 = vadd.f32 %v1271_v35, %v1267_v40  ;;  %v547_v62 = vmul.f32 %v2720_v56, %v2594_v50  ;;  %v543_v2 = vmul.f32 %v2729_v58, %v2582_v45  ;;  %v2744_v5 = vstv %s2034_s0  ;;  %s2761_s0 = sld [smem:[#allocation6 + $0x25]] }
  0xf8   : > { %v332_v13 = vpop.permute.xlu1 %331  ;;  %v327_v14 = vpop.permute.xlu0 %326  ;;  %v495_v44 = vadd.f32 %v493_v36, %v490_v41  ;;  %v515_v61 = vadd.f32 %v513_v51, %v510_v57  ;;  %v2752_v12 = vstv %s2039_s2  ;;  %s2771_s2 = sld [smem:[#allocation6 + $0x2b]]  ;;  %v2798_v35 = vstv %s2746_s17 }
  0xf9   : > { %334 = vst.msk [vmem:[#allocation3 + $0xb] sm:$0x1] %vm262_vm6, %v332_v13  ;;  %329 = vst.msk [vmem:[#allocation2 + $0xb] sm:$0x1] %vm262_vm6, %v327_v14  ;;  %640 = vrot.lane.b32.xlu1 %v634_v9, %s4211_s9  ;;  %439 = vrot.lane.b32.xlu0 %v435_v10, %s4213_s7  ;;  %s4217_s9 = smov 122   ;;  %s4215_s7 = smov 125   ;;  %v550_v6 = vadd.f32 %v547_v62, %v543_v2  ;;  %v599_v13 = vmul.f32 %v2744_v5, %v2582_v45  ;;  %v2763_v14 = vstv %s2038_s15 }
  0xfa   : > { %v659_v18 = vmul.f32 %v2752_v12, %v2594_v50  ;;  %s2777_s15 = sld [smem:[#allocation6 + $0x5c]]  ;;  %v655_v30 = vmul.f32 %v2763_v14, %v2582_v45  ;;  %v909_v41 = vmul.f32 %v2798_v35, %v2594_v50 }
  0xfb   : > { %s2810_s17 = sld [smem:[#allocation6 + $0x49]] }
  0xfc   : > { %v340_v25 = vpop.permute.xlu1 %339  ;;  %v336_v26 = vpop.permute.xlu0 %335 }
  0xfd   : > { %342 = vst.msk [vmem:[#allocation3 + $0xc] sm:$0x1] %vm262_vm6, %v340_v25  ;;  %338 = vst.msk [vmem:[#allocation2 + $0xc] sm:$0x1] %vm262_vm6, %v336_v26  ;;  %696 = vrot.lane.b32.xlu1 %v690_v21, %s4217_s9  ;;  %459 = vrot.lane.b32.xlu0 %v455_v22, %s4215_s7  ;;  %s2035_s7 = sld [smem:[#allocation6 + $0x3b]]  ;;  %s4309_s9 = smov 124   ;;  %v2769_v21 = vstv %s2045_s26 }
  0xfe   : > { %s2790_s26 = sld [smem:[#allocation6 + $0x1d]] }
 0x100   : > { %v348_v37 = vpop.permute.xlu1 %347  ;;  %v344_v38 = vpop.permute.xlu0 %343 }
 0x101   : > { %350 = vst.msk [vmem:[#allocation3 + $0xd] sm:$0x1] %vm262_vm6, %v348_v37  ;;  %346 = vst.msk [vmem:[#allocation2 + $0xd] sm:$0x1] %vm262_vm6, %v344_v38  ;;  %765 = vrot.lane.b32.xlu1 %v759_v33, %s4308_s19  ;;  %479 = vrot.lane.b32.xlu0 %v475_v34, %s4309_s9  ;;  %v2793_v33 = vstv %s2735_s25  ;;  %v728_v34 = vmul.f32 %v2769_v21, %v2594_v50  ;;  %s4313_s25 = smov 123  }
 0x103   : > { %v2733_v1 = vstv %s2035_s7  ;;  %s2750_s7 = sld [smem:[#allocation6 + $0x17]] }
 0x104   : > { %v356_v52 = vpop.permute.xlu1 %355  ;;  %v352_v55 = vpop.permute.xlu0 %351  ;;  %v603_v9 = vmul.f32 %v2733_v1, %v2594_v50 }
 0x105   : > { %358 = vst.msk [vmem:[#allocation3 + $0xe] sm:$0x1] %vm262_vm6, %v356_v52  ;;  %354 = vst.msk [vmem:[#allocation2 + $0xe] sm:$0x1] %vm262_vm6, %v352_v55  ;;  %1280 = vrot.lane.b32.xlu1 %v1274_v43, %s4310_s5  ;;  %499 = vrot.lane.b32.xlu0 %v495_v44, %s4223_s16  ;;  %s4311_s16 = smov 122   ;;  %v2826_v43 = vstv %s2754_s20  ;;  %s2847_s20 = sld [smem:[#allocation6 + $0x1e]] }
 0x106   : > { %v606_v17 = vadd.f32 %v603_v9, %v599_v13  ;;  %v937_v62 = vmul.f32 %v2826_v43, %v2594_v50  ;;  %v2871_v9 = vstv %s2765_s14  ;;  %s2890_s14 = sld [smem:[#allocation6 + $0x19]] }
 0x108   : > { %v364_v63 = vpop.permute.xlu1 %363  ;;  %v360_v0 = vpop.permute.xlu0 %359 }
 0x109   : > { %366 = vst.msk [vmem:[#allocation3 + $0xf] sm:$0x1] %vm262_vm6, %v364_v63  ;;  %362 = vst.msk [vmem:[#allocation2 + $0xf] sm:$0x1] %vm262_vm6, %v360_v0  ;;  %519 = vrot.lane.b32.xlu0 %v515_v61, %s4311_s16  ;;  %v2845_v61 = vstv %s2750_s7  ;;  %s2980_s7 = sld [smem:[#allocation6 + $0x5e]] }
 0x10c   : > { %v372_v10 = vpop.permute.xlu1 %371  ;;  %v368_v11 = vpop.permute.xlu0 %367 }
 0x10d   : > { %556 = vrot.lane.b32.xlu0 %v550_v6, %s4310_s5  ;;  %374 = vst.msk [vmem:[#allocation3 + $0x10] sm:$0x1] %vm262_vm6, %v372_v10  ;;  %370 = vst.msk [vmem:[#allocation2 + $0x10] sm:$0x1] %vm262_vm6, %v368_v11  ;;  %v2874_v10 = vstv %s2771_s2  ;;  %s3002_s2 = sld [smem:[#allocation6 + $0x3f]] }
 0x110   : > { %v2773_v22 = vld [vmem:[#allocation3 + $0x8] sm:$0xff]  ;;  %v2775_v23 = vld [vmem:[#allocation2 + $0x8] sm:$0xff]  ;;  %v380_v24 = vpop.permute.xlu1 %379  ;;  %v376_v25 = vpop.permute.xlu0 %375 }
 0x111   : > { %612 = vrot.lane.b32.xlu0 %v606_v17, %s4312_s3  ;;  %382 = vst.msk [vmem:[#allocation3 + $0x11] sm:$0x1] %vm262_vm6, %v380_v24  ;;  %378 = vst.msk [vmem:[#allocation2 + $0x11] sm:$0x1] %vm262_vm6, %v376_v25  ;;  %v411_v26 = vmul.f32 %v409_v48, %v2775_v23  ;;  %v414_v29 = vmul.f32 %v412_v49, %v2773_v22  ;;  %v662_v48 = vadd.f32 %v659_v18, %v655_v30 }
 0x112   : > { %v431_v49 = vmul.f32 %v429_v60, %v2775_v23  ;;  %v434_v37 = vmul.f32 %v432_v54, %v2773_v22  ;;  %v724_v54 = vmul.f32 %v2793_v33, %v2582_v45  ;;  %v2821_v60 = vstv %s2742_s28  ;;  %s2838_s28 = sld [smem:[#allocation6 + $0x5d]] }
 0x113   : > { %v416_v36 = vadd.f32 %v414_v29, %v411_v26  ;;  %v451_v52 = vmul.f32 %v449_v8, %v2775_v23  ;;  %v454_v55 = vmul.f32 %v452_v4, %v2773_v22  ;;  %v905_v57 = vmul.f32 %v2821_v60, %v2582_v45 }
 0x114   : > { %v388_v38 = vpop.permute.xlu1 %387  ;;  %v384_v40 = vpop.permute.xlu0 %383  ;;  %v436_v44 = vadd.f32 %v434_v37, %v431_v49  ;;  %v731_v51 = vadd.f32 %v728_v34, %v724_v54  ;;  %v471_v4 = vmul.f32 %v469_v20, %v2775_v23  ;;  %v474_v8 = vmul.f32 %v472_v16, %v2773_v22 }
 0x115   : > { %421 = vrot.lane.b32.xlu1 %v416_v36, %s4310_s5  ;;  %668 = vrot.lane.b32.xlu0 %v662_v48, %s4313_s25  ;;  %390 = vst.msk [vmem:[#allocation3 + $0x12] sm:$0x1] %vm262_vm6, %v388_v38  ;;  %386 = vst.msk [vmem:[#allocation2 + $0x12] sm:$0x1] %vm262_vm6, %v384_v40  ;;  %v456_v63 = vadd.f32 %v454_v55, %v451_v52  ;;  %v912_v0 = vadd.f32 %v909_v41, %v905_v57  ;;  %v2868_v20 = vstv %s2761_s0  ;;  %s2988_s0 = sld [smem:[#allocation6 + $0xe]] }
 0x116   : > { %v933_v16 = vmul.f32 %v2845_v61, %v2582_v45  ;;  %v2885_v17 = vstv %s2777_s15  ;;  %v2888_v18 = vstv %s2790_s26  ;;  %v476_v24 = vadd.f32 %v474_v8, %v471_v4  ;;  %s3012_s15 = sld [smem:[#allocation6 + $0x11]] }
 0x117   : > { %v491_v26 = vmul.f32 %v489_v32, %v2775_v23  ;;  %v494_v29 = vmul.f32 %v492_v28, %v2773_v22  ;;  %v1268_v36 = vmul.f32 %v2697_v31, %v2775_v23  ;;  %v1272_v32 = vmul.f32 %v2682_v27, %v2773_v22  ;;  %s3022_s26 = sld [smem:[#allocation6 + $0x42]] }
 0x118   : > { %v940_v25 = vadd.f32 %v937_v62, %v933_v16  ;;  %v2911_v28 = vstv %s2800_s6  ;;  %v2914_v48 = vstv %s2808_s29  ;;  %v2917_v49 = vstv %s2810_s17  ;;  %s2933_s6 = sld [smem:[#allocation6 + $0x27]] }
 0x119   : > { %441 = vrot.lane.b32.xlu1 %v436_v44, %s4308_s19  ;;  %737 = vrot.lane.b32.xlu0 %v731_v51, %s4310_s5  ;;  %v2920_v37 = vstv %s2818_s4  ;;  %v2931_v41 = vstv %s2828_s8  ;;  %v511_v44 = vmul.f32 %v509_v42, %v2775_v23  ;;  %v514_v51 = vmul.f32 %v512_v39, %v2773_v22  ;;  %s3028_s29 = sld [smem:[#allocation6 + $0x15]] }
 0x11a   : > { %v2944_v55 = vstv %s2836_s13  ;;  %v496_v57 = vadd.f32 %v494_v29, %v491_v26  ;;  %v572_v4 = vmul.f32 %v2584_v46, %v2775_v23  ;;  %v576_v8 = vmul.f32 %v2586_v47, %v2773_v22  ;;  %s3038_s17 = sld [smem:[#allocation6 + $0x1f]] }
 0x11b   : > { %v2950_v62 = vadd.f32 %v1272_v32, %v1268_v36  ;;  %v2966_v16 = vstv %s2847_s20  ;;  %v548_v26 = vmul.f32 %v2720_v56, %v2773_v22  ;;  %v2997_v36 = vstv %s2898_s27  ;;  %s3051_s4 = sld [smem:[#allocation6 + $0x50]] }
 0x11c   : > { %v2861_v2 = vld [vmem:[#allocation3 + $0x10] sm:$0x3f]  ;;  %v2863_v6 = vld [vmem:[#allocation2 + $0x10] sm:$0x3f]  ;;  %4315 = vst [vmem:[#allocation26_spill] sm:$0xff] %v2997_v36  ;;  %v3000_v32 = vstv %s2908_s11  ;;  %s3065_s8 = sld [smem:[#allocation6 + $0x46]] }
 0x11d   : > { %461 = vrot.lane.b32.xlu1 %v456_v63, %s4312_s3  ;;  %918 = vrot.lane.b32.xlu0 %v912_v0, %s4310_s5  ;;  %v545_v11 = vmul.f32 %v2729_v58, %v2863_v6  ;;  %v549_v13 = vmul.f32 %v2720_v56, %v2861_v2  ;;  %v629_v30 = vmul.f32 %v2615_v59, %v2863_v6  ;;  %v2959_v0 = vstv %s2838_s28  ;;  %s3077_s13 = sld [smem:[#allocation6 + $0x1a]] }
 0x11e   : > { %v633_v34 = vmul.f32 %v2596_v53, %v2861_v2  ;;  %v685_v54 = vmul.f32 %v2645_v7, %v2863_v6  ;;  %v689_v52 = vmul.f32 %v2628_v3, %v2861_v2  ;;  %v1269_v39 = vmul.f32 %v2697_v31, %v2863_v6  ;;  %4316 = vst [vmem:[#allocation27_spill] sm:$0xff] %v3000_v32  ;;  %s3089_s28 = sld [smem:[#allocation6 + $0x28]] }
 0x11f   : > { %v552_v38 = vadd.f32 %v549_v13, %v545_v11  ;;  %v1273_v63 = vmul.f32 %v2682_v27, %v2861_v2  ;;  %v2969_v11 = vstv %s2857_s24  ;;  %v516_v31 = vadd.f32 %v514_v51, %v511_v44  ;;  %s3100_s20 = sld [smem:[#allocation6 + $0x4b]] }
 0x120   : > { %v2926_v40 = vadd.f32 %v633_v34, %v629_v30  ;;  %v2952_v42 = vadd.f32 %v689_v52, %v685_v54  ;;  %v544_v27 = vmul.f32 %v2729_v58, %v2775_v23  ;;  %v601_v29 = vmul.f32 %v2744_v5, %v2863_v6  ;;  %s3106_s24 = sld [smem:[#allocation6 + $0x59]] }
 0x121   : > { %481 = vrot.lane.b32.xlu1 %v476_v24, %s4309_s9  ;;  %946 = vrot.lane.b32.xlu0 %v940_v25, %s4308_s19  ;;  %v2975_v13 = vadd.f32 %v1273_v63, %v1269_v39  ;;  %v2978_v24 = vstv %s2859_s21  ;;  %v579_v25 = vadd.f32 %v576_v8, %v572_v4  ;;  %v605_v30 = vmul.f32 %v2733_v1, %v2861_v2  ;;  %s3118_s21 = sld [smem:[#allocation6 + $0x2e]] }
 0x122   : > { %v2991_v58 = vstv %s2876_s23  ;;  %v2994_v34 = vstv %s2890_s14  ;;  %v3007_v56 = vstv %s2922_s30  ;;  %v628_v54 = vmul.f32 %v2615_v59, %v2775_v23  ;;  %s3130_s23 = sld [smem:[#allocation6 + $0x5f]] }
 0x123   : > { %4314 = vst [vmem:[#allocation25_spill] sm:$0xff] %v2994_v34  ;;  %4317 = vst [vmem:[#allocation28_spill] sm:$0xff] %v3007_v56  ;;  %v632_v44 = vmul.f32 %v2596_v53, %v2773_v22  ;;  %v1088_v51 = vmul.f32 %v2888_v18, %v2863_v6  ;;  %v1092_v52 = vmul.f32 %v2911_v28, %v2861_v2  ;;  %s3140_s14 = sld [smem:[#allocation6 + $0x12]] }
 0x124   : > { %v608_v4 = vadd.f32 %v605_v30, %v601_v29  ;;  %v573_v8 = vmul.f32 %v2584_v46, %v2863_v6  ;;  %v577_v59 = vmul.f32 %v2586_v47, %v2861_v2  ;;  %v1478_v39 = vmul.f32 %v2944_v55, %v2863_v6  ;;  %s3148_s27 = sld [smem:[#allocation6 + $0x43]] }
 0x125   : > { %501 = vrot.lane.b32.xlu1 %v496_v57, %s4313_s25  ;;  %560 = vrot.lane.b32.xlu0 %v552_v38, %s4310_s5  ;;  %v3010_v38 = vstv %s2933_s6  ;;  %v551_v57 = vadd.f32 %v548_v26, %v544_v27  ;;  %v3030_v53 = vadd.f32 %v1092_v52, %v1088_v51  ;;  %v1482_v63 = vmul.f32 %v2959_v0, %v2861_v2  ;;  %s3158_s11 = sld [smem:[#allocation6 + $0x20]] }
 0x126   : > { %v600_v46 = vmul.f32 %v2744_v5, %v2775_v23  ;;  %v604_v47 = vmul.f32 %v2733_v1, %v2773_v22  ;;  %v1329_v27 = vmul.f32 %v2931_v41, %v2861_v2  ;;  %v635_v26 = vadd.f32 %v632_v44, %v628_v54  ;;  %s3171_s30 = sld [smem:[#allocation6 + $0x51]] }
 0x127   : > { %v3053_v29 = vadd.f32 %v1482_v63, %v1478_v39  ;;  %v754_v30 = vmul.f32 %v2673_v19, %v2863_v6  ;;  %v758_v5 = vmul.f32 %v2656_v15, %v2861_v2  ;;  %v580_v1 = vadd.f32 %v577_v59, %v573_v8  ;;  %s3179_s6 = sld [smem:[#allocation6 + $0x1b]] }
 0x128   : > { %v657_v51 = vmul.f32 %v2763_v14, %v2863_v6  ;;  %v661_v52 = vmul.f32 %v2752_v12, %v2861_v2  ;;  %v991_v44 = vmul.f32 %v2994_v34, %v2863_v6  ;;  %v3075_v39 = vstv %s2980_s7  ;;  %s3212_s7 = sld [smem:[#allocation6 + $0x5a]] }
 0x129   : > { %521 = vrot.lane.b32.xlu1 %v516_v31, %s4311_s16  ;;  %586 = vrot.lane.b32.xlu0 %v579_v25, %s4308_s19  ;;  %v1325_v31 = vmul.f32 %v2920_v37, %v2863_v6  ;;  %v3049_v25 = vstv %s2961_s18  ;;  %v3067_v54 = vadd.f32 %v758_v5, %v754_v30  ;;  %v995_v8 = vmul.f32 %v2997_v36, %v2861_v2  ;;  %s3187_s18 = sld [smem:[#allocation6 + $0x4c]] }
 0x12a   : > { %v3084_v59 = vstv %s2988_s0  ;;  %v3087_v63 = vstv %s3002_s2  ;;  %v3098_v30 = vstv %s3012_s15  ;;  %v607_v5 = vadd.f32 %v604_v47, %v600_v46  ;;  %s3224_s0 = sld [smem:[#allocation6 + $0x2f]] }
 0x12b   : > { %4318 = vst [vmem:[#allocation29_spill] sm:$0xff] %v3067_v54  ;;  %4320 = vst [vmem:[#allocation31_spill] sm:$0xff] %v3084_v59  ;;  %v688_v34 = vmul.f32 %v2628_v3, %v2773_v22  ;;  %v3104_v15 = vadd.f32 %v995_v8, %v991_v44  ;;  %v3113_v36 = vstv %s3022_s26  ;;  %v3116_v54 = vstv %s3028_s29  ;;  %s3233_s2 = sld [smem:[#allocation6 + $0x60]] }
 0x12c   : > { %4321 = vst [vmem:[#allocation32_spill] sm:$0xff] %v3087_v63  ;;  %4322 = vst [vmem:[#allocation33_spill] sm:$0xff] %v3116_v54  ;;  %v1510_v3 = vmul.f32 %v3075_v39, %v2861_v2  ;;  %v3125_v46 = vstv %s3038_s17  ;;  %v3128_v47 = vstv %s3051_s4  ;;  %v1353_v44 = vmul.f32 %v3010_v38, %v2863_v6  ;;  %s3243_s15 = sld [smem:[#allocation6 + $0x2a]] }
 0x12d   : > { %558 = vrot.lane.b32.xlu1 %v551_v57, %s4310_s5  ;;  %616 = vrot.lane.b32.xlu0 %v608_v4, %s4312_s3  ;;  %v3063_v57 = vadd.f32 %v1329_v27, %v1325_v31  ;;  %v3072_v4 = vstv %s2971_s22  ;;  %v684_v31 = vmul.f32 %v2645_v7, %v2775_v23  ;;  %v1116_v27 = vmul.f32 %v2966_v16, %v2863_v6  ;;  %s3199_s22 = sld [smem:[#allocation6 + $0x29]] }
 0x12e   : > { %4319 = vst [vmem:[#allocation30_spill] sm:$0xff] %v3072_v4  ;;  %v1506_v19 = vmul.f32 %v3072_v4, %v2863_v6  ;;  %4323 = vst [vmem:[#allocation34_spill] sm:$0xff] %v3125_v46  ;;  %v1357_v8 = vmul.f32 %v3049_v25, %v2861_v2  ;;  %v1148_v4 = vmul.f32 %v3128_v47, %v2861_v2  ;;  %s3255_s26 = sld [smem:[#allocation6 + $0x5b]] }
 0x12f   : > { %s3273_s29 = sld [smem:[#allocation6 + $0x13]] }
 0x130   : > { %s3286_s17 = sld [smem:[#allocation6 + $0x44]] }
 0x131   : > { %588 = vrot.lane.b32.xlu1 %v580_v1, %s4308_s19  ;;  %642 = vrot.lane.b32.xlu0 %v635_v26, %s4309_s9  ;;  %v1120_v26 = vmul.f32 %v2969_v11, %v2861_v2  ;;  %v664_v1 = vadd.f32 %v661_v52, %v657_v51  ;;  %v656_v51 = vmul.f32 %v2763_v14, %v2775_v23  ;;  %s3299_s4 = sld [smem:[#allocation6 + $0x1c]] }
 0x132   : > { %v660_v52 = vmul.f32 %v2752_v12, %v2773_v22  ;;  %v730_v14 = vmul.f32 %v2769_v21, %v2861_v2  ;;  %v3150_v12 = vadd.f32 %v1357_v8, %v1353_v44 }
 0x133   : > { %v3108_v7 = vadd.f32 %v1120_v26, %v1116_v27  ;;  %v691_v27 = vadd.f32 %v688_v34, %v684_v31  ;;  %v726_v26 = vmul.f32 %v2793_v33, %v2863_v6  ;;  %v532_v34 = vmul.f32 %v3000_v32, %v2863_v6 }
 0x134   : > { %4324 = vst [vmem:[#allocation35_spill] sm:$0xff] %v3150_v12  ;;  %v536_v31 = vmul.f32 %v3007_v56, %v2861_v2  ;;  %v663_v44 = vadd.f32 %v660_v52, %v656_v51  ;;  %v782_v32 = vmul.f32 %v3098_v30, %v2863_v6  ;;  %v907_v56 = vmul.f32 %v2821_v60, %v2863_v6 }
 0x135   : > { %614 = vrot.lane.b32.xlu1 %v607_v5, %s4312_s3  ;;  %672 = vrot.lane.b32.xlu0 %v664_v1, %s4313_s25  ;;  %v3146_v5 = vadd.f32 %v1510_v3, %v1506_v19  ;;  %v1144_v1 = vmul.f32 %v3125_v46, %v2863_v6  ;;  %v3164_v19 = vstv %s3065_s8  ;;  %v3169_v3 = vstv %s3089_s28  ;;  %s3311_s8 = sld [smem:[#allocation6 + $0x4d]] }
 0x136   : > { %4325 = vst [vmem:[#allocation36_spill] sm:$0xff] %v3164_v19  ;;  %4326 = vst [vmem:[#allocation37_spill] sm:$0xff] %v3169_v3  ;;  %v911_v46 = vmul.f32 %v2798_v35, %v2861_v2  ;;  %v3185_v12 = vadd.f32 %v536_v31, %v532_v34  ;;  %v3192_v51 = vstv %s3077_s13  ;;  %v3195_v52 = vstv %s3106_s24  ;;  %s3317_s13 = sld [smem:[#allocation6 + $0x21]] }
 0x137   : > { %v3173_v8 = vadd.f32 %v1148_v4, %v1144_v1  ;;  %4330 = vst [vmem:[#allocation41_spill] sm:$0xff] %v3195_v52  ;;  %v3208_v1 = vstv %s3100_s20  ;;  %v1385_v34 = vmul.f32 %v3195_v52, %v2861_v2  ;;  %v1019_v31 = vmul.f32 %v3192_v51, %v2863_v6  ;;  %s3329_s28 = sld [smem:[#allocation6 + $0x52]] }
 0x138   : > { %4328 = vst [vmem:[#allocation39_spill] sm:$0xff] %v3185_v12  ;;  %s3342_s20 = sld [smem:[#allocation6 + $0x30]] }
 0x139   : > { %644 = vrot.lane.b32.xlu1 %v2926_v40, %s4309_s9  ;;  %698 = vrot.lane.b32.xlu0 %v691_v27, %s4311_s16  ;;  %4327 = vst [vmem:[#allocation38_spill] sm:$0xff] %v3173_v8  ;;  %v786_v40 = vmul.f32 %v3113_v36, %v2861_v2  ;;  %v733_v27 = vadd.f32 %v730_v14, %v726_v26  ;;  %s3358_s24 = sld [smem:[#allocation6 + $0x14]] }
 0x13a   : > { %v1381_v26 = vmul.f32 %v3169_v3, %v2863_v6  ;;  %v725_v14 = vmul.f32 %v2793_v33, %v2775_v23  ;;  %v906_v33 = vmul.f32 %v2821_v60, %v2775_v23  ;;  %v3231_v3 = vstv %s3148_s27  ;;  %s3428_s27 = sld [smem:[#allocation6 + $0x53]] }
 0x13b   : > { %v3189_v4 = vadd.f32 %v786_v40, %v782_v32  ;;  %v729_v32 = vmul.f32 %v2769_v21, %v2773_v22  ;;  %v3219_v40 = vstv %s3118_s21  ;;  %v914_v21 = vadd.f32 %v911_v46, %v907_v56  ;;  %s3368_s21 = sld [smem:[#allocation6 + $0x61]] }
 0x13c   : > { %v3228_v12 = vadd.f32 %v1385_v34, %v1381_v26  ;;  %v814_v8 = vmul.f32 %v3231_v3, %v2861_v2  ;;  %v713_v56 = vmul.f32 %v3084_v59, %v2863_v6  ;;  %v910_v46 = vmul.f32 %v2798_v35, %v2773_v22 }
 0x13d   : > { %4329 = vst [vmem:[#allocation40_spill] sm:$0xff] %v3189_v4  ;;  %670 = vrot.lane.b32.xlu1 %v663_v44, %s4313_s25  ;;  %741 = vrot.lane.b32.xlu0 %v733_v27, %s4310_s5  ;;  %v1023_v44 = vmul.f32 %v3208_v1, %v2861_v2  ;;  %v3222_v27 = vstv %s3140_s14  ;;  %v732_v60 = vadd.f32 %v729_v32, %v725_v14  ;;  %v3251_v26 = vstv %s3130_s23  ;;  %s3382_s23 = sld [smem:[#allocation6 + $0x45]] }
 0x13e   : > { %4331 = vst [vmem:[#allocation42_spill] sm:$0xff] %v3222_v27  ;;  %v810_v52 = vmul.f32 %v3222_v27, %v2863_v6  ;;  %v717_v34 = vmul.f32 %v3087_v63, %v2861_v2  ;;  %v1534_v14 = vmul.f32 %v3219_v40, %v2863_v6  ;;  %v1538_v35 = vmul.f32 %v3251_v26, %v2861_v2  ;;  %s3418_s14 = sld [smem:[#allocation6 + $0x22]] }
 0x13f   : > { %v3235_v4 = vadd.f32 %v1023_v44, %v1019_v31  ;;  %v935_v31 = vmul.f32 %v2845_v61, %v2863_v6  ;;  %v939_v32 = vmul.f32 %v2826_v43, %v2861_v2  ;;  %v3278_v63 = vstv %s3158_s11  ;;  %s2348_s11 = smov 48  }
 0x140   : > { %v3267_v44 = vadd.f32 %v717_v34, %v713_v56  ;;  %4335 = vst [vmem:[#allocation46_spill] sm:$0xff] %v3278_v63  ;;  %v3281_v59 = vstv %s3171_s30  ;;  %v3294_v34 = vstv %s3187_s18  ;;  %v3327_v27 = vstv %s3243_s15  ;;  %s2349_s30 = smov 80   ;;  %s2351_s18 = smov 112  }
 0x141   : > { %700 = vrot.lane.b32.xlu1 %v2952_v42, %s4311_s16  ;;  %922 = vrot.lane.b32.xlu0 %v914_v21, %s4310_s5  ;;  %v3259_v42 = vadd.f32 %v814_v8, %v810_v52  ;;  %v894_v21 = vmul.f32 %v3116_v54, %v2863_v6  ;;  %v898_v8 = vmul.f32 %v3164_v19, %v2861_v2  ;;  %v3309_v54 = vstv %s3224_s0  ;;  %s4457_s0 = sshll.u32 %s2499_s10, 3 }
 0x142   : > { %4333 = vst [vmem:[#allocation44_spill] sm:$0xff] %v3267_v44  ;;  %v3275_v52 = vadd.f32 %v1538_v35, %v1534_v14  ;;  %4336 = vst [vmem:[#allocation47_spill] sm:$0xff] %v3281_v59  ;;  %v3297_v14 = vstv %s3199_s22  ;;  %v1296_v35 = vmul.f32 %v2868_v20, %v2775_v23  ;;  %v3324_v44 = vstv %s3233_s2  ;;  %s4456_s22 = sld [smem:[#allocation22_spill]]  ;;  %s201_s2 = scalar_lea.vmem [#allocation11], %s4457_s0 }
 0x143   : > { %4332 = vst [vmem:[#allocation43_spill] sm:$0xff] %v3259_v42  ;;  %v3284_v42 = vstv %s3179_s6  ;;  %v3291_v56 = vadd.f32 %v898_v8, %v894_v21  ;;  %4339 = vst [vmem:[#allocation50_spill] sm:$0xff] %v3294_v34  ;;  %v942_v21 = vadd.f32 %v939_v32, %v935_v31  ;;  %v1300_v8 = vmul.f32 %v2871_v9, %v2773_v22  ;;  %s2350_s6 = smov 96   ;;  %s1922_s15 = sshll.u32 %s201_s2, 4  ;;  %s1923_s15 = int_to_ptr.vmem [resolvable:$true] %s1922_s15 }
 0x144   : > { %4334 = vst [vmem:[#allocation45_spill] sm:$0xff] %v3275_v52  ;;  %4337 = vst [vmem:[#allocation48_spill] sm:$0xff] %v3284_v42  ;;  %v1047_v19 = vmul.f32 %v3284_v42, %v2863_v6  ;;  %v1172_v42 = vmul.f32 %v3278_v63, %v2863_v6  ;;  %v1176_v52 = vmul.f32 %v3281_v59, %v2861_v2  ;;  %v3340_v32 = vstv %s3255_s26 }
 0x145   : > { %739 = vrot.lane.b32.xlu1 %v732_v60, %s4310_s5  ;;  %1282 = vrot.lane.b32.xlu0 %v2950_v62, %s4310_s5  ;;  %4338 = vst [vmem:[#allocation49_spill] sm:$0xff] %v3291_v56  ;;  %v3306_v60 = vstv %s3212_s7  ;;  %4340 = vst [vmem:[#allocation51_spill] sm:$0xff] %v3309_v54  ;;  %v913_v62 = vadd.f32 %v910_v46, %v906_v33  ;;  %v1051_v56 = vmul.f32 %v3294_v34, %v2861_v2  ;;  %s2120_s7 = sshll.u32 %s2397_s1, 7 }
 0x146   : > { %4341 = vst [vmem:[#allocation52_spill] sm:$0xff] %v3327_v27  ;;  %v1448_v33 = vmul.f32 %v2874_v10, %v2582_v45  ;;  %v1452_v46 = vmul.f32 %v2885_v17, %v2594_v50  ;;  %4343 = vst [vmem:[#allocation54_spill] sm:$0xff] %v3340_v32  ;;  %v934_v34 = vmul.f32 %v2845_v61, %v2775_v23 }
 0x147   : > { %v3337_v31 = vadd.f32 %v1051_v56, %v1047_v19  ;;  %v3346_v59 = vadd.f32 %v1176_v52, %v1172_v42  ;;  %v1303_v63 = vadd.f32 %v1300_v8, %v1296_v35  ;;  %v938_v19 = vmul.f32 %v2826_v43, %v2773_v22 }
 0x148   : > { %v1562_v56 = vmul.f32 %v3309_v54, %v2863_v6  ;;  %v1437_v42 = vmul.f32 %v3327_v27, %v2863_v6  ;;  %v1441_v52 = vmul.f32 %v3340_v32, %v2861_v2  ;;  %v1409_v43 = vmul.f32 %v3297_v14, %v2863_v6  ;;  %p4460_p9 = scmp.ne.s32.totalorder %s4456_s22, 0 }
 0x149   : > { %920 = vrot.lane.b32.xlu1 %v913_v62, %s4310_s5  ;;  %950 = vrot.lane.b32.xlu0 %v942_v21, %s4308_s19  ;;  %4342 = vst [vmem:[#allocation53_spill] sm:$0xff] %v3337_v31  ;;  %4344 = vst [vmem:[#allocation55_spill] sm:$0xff] %v3346_v59  ;;  %v1256_v62 = vmul.f32 %v2978_v24, %v2863_v6  ;;  %v1260_v21 = vmul.f32 %v2991_v58, %v2861_v2  ;;  %v3389_v32 = vstv %s3286_s17  ;;  %s4458_s17 = sld [smem:[#allocation73_spill]] }
 0x14a   : > { %v1566_v31 = vmul.f32 %v3324_v44, %v2861_v2  ;;  %v1299_v35 = vmul.f32 %v2871_v9, %v2594_v50  ;;  %v1455_v27 = vadd.f32 %v1452_v46, %v1448_v33  ;;  %v3398_v54 = vstv %s3299_s4 }
 0x14b   : > { %v3360_v61 = vadd.f32 %v1260_v21, %v1256_v62  ;;  %v1413_v62 = vmul.f32 %v3306_v60, %v2861_v2  ;;  %v3380_v21 = vstv %s3273_s29  ;;  %4349 = vst [vmem:[#allocation60_spill] sm:$0xff] %v3398_v54  ;;  %v3401_v33 = vstv %s3311_s8 }
 0x14c   : > { %v3375_v8 = vadd.f32 %v1566_v31, %v1562_v56  ;;  %v1450_v31 = vmul.f32 %v2874_v10, %v2863_v6  ;;  %v1454_v56 = vmul.f32 %v2885_v17, %v2861_v2  ;;  %4350 = vst [vmem:[#allocation61_spill] sm:$0xff] %v3401_v33  ;;  %v3404_v46 = vstv %s3317_s13  ;;  %s1908_s13 = scalar_lea.sflag [#allocation8], %s2499_s10 }
 0x14d   : > { %4345 = vst [vmem:[#allocation56_spill] sm:$0xff] %v3360_v61  ;;  %1284 = vrot.lane.b32.xlu1 %v2975_v13, %s4310_s5  ;;  %1310 = vrot.lane.b32.xlu0 %v1303_v63, %s4308_s19  ;;  %v1295_v13 = vmul.f32 %v2868_v20, %v2582_v45  ;;  %v3386_v63 = vadd.f32 %v1441_v52, %v1437_v42  ;;  %4351 = vst [vmem:[#allocation62_spill] sm:$0xff] %v3404_v46  ;;  %v3407_v59 = vstv %s3329_s28  ;;  %s2257_s28 = scalar_lea.vmem %s1923_s15, 128 }
 0x14e   : > { %4346 = vst [vmem:[#allocation57_spill] sm:$0xff] %v3375_v8  ;;  %v941_v61 = vadd.f32 %v938_v19, %v934_v34  ;;  %v3395_v8 = vadd.f32 %v1413_v62, %v1409_v43  ;;  %4352 = vst [vmem:[#allocation63_spill] sm:$0xff] %v3407_v59  ;;  %v1297_v19 = vmul.f32 %v2868_v20, %v2863_v6  ;;  %v3416_v52 = vstv %s3342_s20  ;;  %p2258_p8 = scmp.ne.s32.totalorder %s1923_s15, %s2257_s28  ;;  %s2352_s20 = smov [#allocation11]  }
 0x14f   : > { %4347 = vst [vmem:[#allocation58_spill] sm:$0xff] %v3386_v63  ;;  %v1302_v34 = vadd.f32 %v1299_v35, %v1295_v13  ;;  %v1200_v42 = vmul.f32 %v3404_v46, %v2863_v6  ;;  %v1301_v43 = vmul.f32 %v2871_v9, %v2861_v2  ;;  %v838_v20 = vmul.f32 %v3380_v21, %v2863_v6  ;;  %s4459_s4 = smov %s4458_s17  ;;  %s1920_s8 = scalar_lea.hbm %s4458_s17, %s2120_s7 }
 0x150   : > { %4348 = vst [vmem:[#allocation59_spill] sm:$0xff] %v3395_v8  ;;  %v1457_v35 = vadd.f32 %v1454_v56, %v1450_v31  ;;  %v1091_v62 = vmul.f32 %v2911_v28, %v2773_v22  ;;  %v842_v13 = vmul.f32 %v3389_v32, %v2861_v2  ;;  %v1075_v9 = vmul.f32 %v3398_v54, %v2863_v6  ;;  %p2259_p11 = pnand %p2258_p8, %p4460_p9 }
 0x151   : > { %948 = vrot.lane.b32.xlu1 %v941_v61, %s4308_s19  ;;  %1461 = vrot.lane.b32.xlu0 %v1455_v27, %s4310_s5  ;;  %v1087_v61 = vmul.f32 %v2888_v18, %v2775_v23  ;;  %v1204_v27 = vmul.f32 %v3407_v59, %v2861_v2  ;;  %v3439_v8 = vstv %s3368_s21  ;;  %v1079_v63 = vmul.f32 %v3401_v33, %v2861_v2 }
 0x152   : > { %v3444_v59 = vstv %s3358_s24  ;;  %v1449_v31 = vmul.f32 %v2874_v10, %v2775_v23  ;;  %v965_v56 = vmul.f32 %v2917_v49, %v2594_v50  ;;  %v1304_v54 = vadd.f32 %v1301_v43, %v1297_v19  ;;  %p2260_p13 = pneg %p2259_p11 }
 0x153   : > { %v3436_v46 = vadd.f32 %v1204_v27, %v1200_v42  ;;  %v3452_v42 = vadd.f32 %v842_v13, %v838_v20  ;;  %v3455_v27 = vstv %s3382_s23  ;;  %v1453_v33 = vmul.f32 %v2885_v17, %v2773_v22 }
 0x154   : > { %v870_v10 = vmul.f32 %v3455_v27, %v2861_v2  ;;  %v1590_v20 = vmul.f32 %v3416_v52, %v2863_v6  ;;  %v1594_v13 = vmul.f32 %v3439_v8, %v2861_v2  ;;  %v961_v19 = vmul.f32 %v2914_v48, %v2582_v45 }
 0x155   : > { %4353 = vst [vmem:[#allocation64_spill] sm:$0xff] %v3436_v46  ;;  %1308 = vrot.lane.b32.xlu1 %v1302_v34, %s4308_s19  ;;  %1465 = vrot.lane.b32.xlu0 %v1457_v35, %s4310_s5  ;;  %v3459_v46 = vadd.f32 %v1079_v63, %v1075_v9  ;;  %v866_v34 = vmul.f32 %v3444_v59, %v2863_v6  ;;  %v3478_v43 = vstv %s3418_s14  ;;  %v3483_v9 = vstv %s3428_s27 }
 0x156   : > { %v1094_v35 = vadd.f32 %v1091_v62, %v1087_v61  ;;  %v3475_v63 = vadd.f32 %v1594_v13, %v1590_v20  ;;  %v968_v61 = vadd.f32 %v965_v56, %v961_v19  ;;  %v1090_v62 = vmul.f32 %v2911_v28, %v2594_v50  ;;  %v3495_v50 = vld [vmem:[#allocation2] sm:$0xff] }
 0x157   : > { %4354 = vst [vmem:[#allocation65_spill] sm:$0xff] %v3459_v46  ;;  %v3473_v17 = vadd.f32 %v870_v10, %v866_v34  ;;  %v1228_v46 = vmul.f32 %v3478_v43, %v2863_v6  ;;  %v1456_v45 = vadd.f32 %v1453_v33, %v1449_v31  ;;  %v967_v34 = vmul.f32 %v2917_v49, %v2861_v2 }
 0x158   : > { %v1086_v28 = vmul.f32 %v3495_v50, %v2888_v18  ;;  %v1328_v10 = vmul.f32 %v2931_v41, %v2773_v22  ;;  %v962_v20 = vmul.f32 %v2914_v48, %v2775_v23  ;;  %v966_v18 = vmul.f32 %v2917_v49, %v2773_v22 }
 0x159   : > { %1312 = vrot.lane.b32.xlu1 %v1304_v54, %s4308_s19  ;;  %1101 = vrot.lane.b32.xlu0 %v1094_v35, %s4310_s5  ;;  %v963_v54 = vmul.f32 %v2914_v48, %v2863_v6  ;;  %v1232_v35 = vmul.f32 %v3483_v9, %v2861_v2  ;;  %v1324_v6 = vmul.f32 %v2920_v37, %v2775_v23 }
 0x15a   : > { %v1093_v33 = vadd.f32 %v1090_v62, %v1086_v28  ;;  %v1476_v19 = vmul.f32 %v3495_v50, %v2944_v55  ;;  %v969_v62 = vadd.f32 %v966_v18, %v962_v20  ;;  %v1481_v28 = vmul.f32 %v2959_v0, %v2773_v22  ;;  %v4362_v20 = vld [vmem:[#allocation24_spill] sm:$0xff] }
 0x15b   : > { %v3499_v56 = vadd.f32 %v1232_v35, %v1228_v46  ;;  %v970_v31 = vadd.f32 %v967_v34, %v963_v54  ;;  %v1331_v2 = vadd.f32 %v1328_v10, %v1324_v6  ;;  %v3511_v46 = vld [vmem:[#allocation3] sm:$0xff]  ;;  %v4360_v6 = vld [vmem:[#allocation26_spill] sm:$0xff]  ;;  %v753_v18 = vmul.f32 %v4362_v20, %v2775_v23 }
 0x15c   : > { %v1480_v13 = vmul.f32 %v3511_v46, %v2959_v0  ;;  %v1327_v49 = vmul.f32 %v3511_v46, %v2931_v41  ;;  %v1477_v41 = vmul.f32 %v2944_v55, %v2775_v23  ;;  %v993_v55 = vmul.f32 %v3511_v46, %v4360_v6 }
 0x15d   : > { %1463 = vrot.lane.b32.xlu1 %v1456_v45, %s4310_s5  ;;  %974 = vrot.lane.b32.xlu0 %v968_v61, %s4312_s3  ;;  %v1323_v45 = vmul.f32 %v3495_v50, %v2920_v37  ;;  %v1115_v37 = vmul.f32 %v2966_v16, %v2775_v23  ;;  %v994_v20 = vmul.f32 %v4360_v6, %v2773_v22 }
 0x15e   : > { %v1483_v48 = vadd.f32 %v1480_v13, %v1476_v19  ;;  %v1484_v0 = vadd.f32 %v1481_v28, %v1477_v41  ;;  %v4363_v13 = vld [vmem:[#allocation23_spill] sm:$0xff]  ;;  %v1118_v41 = vmul.f32 %v3511_v46, %v2969_v11  ;;  %v1114_v28 = vmul.f32 %v3495_v50, %v2966_v16 }
 0x15f   : > { %v1330_v34 = vadd.f32 %v1327_v49, %v1323_v45  ;;  %v757_v19 = vmul.f32 %v4363_v13, %v2773_v22  ;;  %v4368_v13 = vld [vmem:[#allocation30_spill] sm:$0xff]  ;;  %v1355_v6 = vmul.f32 %v3511_v46, %v3049_v25 }
 0x161   : > { %1099 = vrot.lane.b32.xlu1 %v1093_v33, %s4310_s5  ;;  %978 = vrot.lane.b32.xlu0 %v970_v31, %s4312_s3  ;;  %v1119_v33 = vmul.f32 %v2969_v11, %v2773_v22  ;;  %v760_v45 = vadd.f32 %v757_v19, %v753_v18  ;;  %v1508_v18 = vmul.f32 %v3511_v46, %v3075_v39 }
 0x165   : > { %1103 = vrot.lane.b32.xlu1 %v3030_v53, %s4310_s5  ;;  %1338 = vrot.lane.b32.xlu0 %v1331_v2, %s4312_s3  ;;  %v1122_v2 = vadd.f32 %v1119_v33, %v1115_v37  ;;  %v1121_v33 = vadd.f32 %v1118_v41, %v1114_v28  ;;  %s1693_s5 = sld [smem:[#allocation5]] }
 0x167   : > { %v3520_v61 = vpop.permute.xlu0 %419  ;;  %v3528_v53 = vpop.permute.xlu1 %584 }
 0x168   : > { %4355 = vst [vmem:[#allocation66_spill] sm:$0xff] %v3520_v61 }
 0x169   : > { %976 = vrot.lane.b32.xlu1 %v969_v62, %s4312_s3  ;;  %1489 = vrot.lane.b32.xlu0 %v1483_v48, %s4308_s19 }
 0x16b   : > { %v3530_v54 = vpop.permute.xlu0 %439  ;;  %v3545_v31 = vpop.permute.xlu1 %640 }
 0x16c   : > { %4356 = vst [vmem:[#allocation67_spill] sm:$0xff] %v3530_v54  ;;  %4358 = vst [vmem:[#allocation69_spill] sm:$0xff] %v3545_v31  ;;  %v4401_v31 = vld [vmem:[#allocation56_spill] sm:$0xff] }
 0x16d   : > { %1336 = vrot.lane.b32.xlu1 %v1330_v34, %s4312_s3  ;;  %1493 = vrot.lane.b32.xlu0 %v3053_v29, %s4308_s19  ;;  %v4359_v29 = vld [vmem:[#allocation29_spill] sm:$0xff] }
 0x16f   : > { %v3535_v35 = vpop.permute.xlu0 %459  ;;  %v3563_v48 = vpop.permute.xlu1 %696 }
 0x170   : > { %4357 = vst [vmem:[#allocation68_spill] sm:$0xff] %v3535_v35  ;;  %4365 = vst [vmem:[#allocation26_spill] sm:$0xff] %v3563_v48  ;;  %v4391_v35 = vld [vmem:[#allocation44_spill] sm:$0xff] }
 0x171   : > { %1340 = vrot.lane.b32.xlu1 %v3063_v57, %s4312_s3  ;;  %769 = vrot.lane.b32.xlu0 %v4359_v29, %s4308_s19  ;;  %v4364_v57 = vld [vmem:[#allocation25_spill] sm:$0xff]  ;;  %v1352_v29 = vmul.f32 %v3010_v38, %v2775_v23 }
 0x172   : > { %v989_v62 = vmul.f32 %v3495_v50, %v4364_v57  ;;  %v990_v16 = vmul.f32 %v4364_v57, %v2775_v23 }
 0x173   : > { %v3553_v10 = vpop.permute.xlu0 %479 }
 0x174   : > { %4361 = vst [vmem:[#allocation29_spill] sm:$0xff] %v3553_v10  ;;  %v996_v34 = vadd.f32 %v993_v55, %v989_v62  ;;  %v3579_v55 = vpop.permute.xlu1 %765  ;;  %v4386_v10 = vld [vmem:[#allocation46_spill] sm:$0xff] }
 0x175   : > { %1491 = vrot.lane.b32.xlu1 %v1484_v0, %s4308_s19  ;;  %1129 = vrot.lane.b32.xlu0 %v1122_v2, %s4308_s19  ;;  %v1356_v0 = vmul.f32 %v3049_v25, %v2773_v22 }
 0x177   : > { %v3565_v49 = vpop.permute.xlu0 %499  ;;  %v1359_v2 = vadd.f32 %v1356_v0, %v1352_v29  ;;  %v785_v29 = vmul.f32 %v3113_v36, %v2773_v22 }
 0x178   : > { %4366 = vst [vmem:[#allocation24_spill] sm:$0xff] %v3565_v49  ;;  %v3597_v19 = vpop.permute.xlu1 %1280 }
 0x179   : > { %767 = vrot.lane.b32.xlu1 %v760_v45, %s4308_s19  ;;  %1002 = vrot.lane.b32.xlu0 %v996_v34, %s4309_s9  ;;  %v997_v45 = vadd.f32 %v994_v20, %v990_v16  ;;  %v1509_v16 = vmul.f32 %v3075_v39, %v2773_v22  ;;  %v1146_v20 = vmul.f32 %v3511_v46, %v3128_v47 }
 0x17a   : > { %v784_v39 = vmul.f32 %v3511_v46, %v3113_v36  ;;  %v4376_v36 = vld [vmem:[#allocation38_spill] sm:$0xff] }
 0x17b   : > { %v3573_v37 = vpop.permute.xlu0 %519 }
 0x17c   : > { %4367 = vst [vmem:[#allocation23_spill] sm:$0xff] %v3573_v37 }
 0x17d   : > { %1127 = vrot.lane.b32.xlu1 %v1121_v33, %s4308_s19  ;;  %1006 = vrot.lane.b32.xlu0 %v3104_v15, %s4309_s9  ;;  %v1504_v15 = vmul.f32 %v3495_v50, %v4368_v13  ;;  %v781_v33 = vmul.f32 %v3098_v30, %v2775_v23 }
 0x17f   : > { %v3584_v11 = vpop.permute.xlu0 %556  ;;  %v1511_v57 = vadd.f32 %v1508_v18, %v1504_v15  ;;  %v4372_v18 = vld [vmem:[#allocation35_spill] sm:$0xff] }
 0x181   : > { %1131 = vrot.lane.b32.xlu1 %v3108_v7, %s4308_s19  ;;  %1366 = vrot.lane.b32.xlu0 %v1359_v2, %s4309_s9  ;;  %v1351_v7 = vmul.f32 %v3495_v50, %v3010_v38  ;;  %v788_v38 = vadd.f32 %v785_v29, %v781_v33  ;;  %v1505_v2 = vmul.f32 %v4368_v13, %v2775_v23  ;;  %s2346_s19 = smov 32  }
 0x183   : > { %v3599_v62 = vpop.permute.xlu0 %612  ;;  %v1358_v28 = vadd.f32 %v1355_v6, %v1351_v7  ;;  %v1512_v6 = vadd.f32 %v1509_v16, %v1505_v2  ;;  %v780_v7 = vmul.f32 %v3495_v50, %v3098_v30  ;;  %v1022_v2 = vmul.f32 %v3208_v1, %v2773_v22 }
 0x185   : > { %1004 = vrot.lane.b32.xlu1 %v997_v45, %s4309_s9  ;;  %1517 = vrot.lane.b32.xlu0 %v1511_v57, %s4312_s3  ;;  %v787_v29 = vadd.f32 %v784_v39, %v780_v7  ;;  %v4379_v39 = vld [vmem:[#allocation40_spill] sm:$0xff]  ;;  %v4380_v7 = vld [vmem:[#allocation37_spill] sm:$0xff] }
 0x187   : > { %v3607_v34 = vpop.permute.xlu1 %421  ;;  %v3609_v41 = vpop.permute.xlu0 %668 }
 0x188   : > { %4369 = vst [vmem:[#allocation25_spill] sm:$0xff] %v3607_v34  ;;  %4370 = vst [vmem:[#allocation30_spill] sm:$0xff] %v3609_v41 }
 0x189   : > { %1364 = vrot.lane.b32.xlu1 %v1358_v28, %s4309_s9  ;;  %1521 = vrot.lane.b32.xlu0 %v3146_v5, %s4312_s3  ;;  %v4373_v5 = vld [vmem:[#allocation34_spill] sm:$0xff] }
 0x18a   : > { %v1142_v15 = vmul.f32 %v3495_v50, %v4373_v5 }
 0x18b   : > { %v3618_v25 = vpop.permute.xlu1 %441  ;;  %v3620_v0 = vpop.permute.xlu0 %737 }
 0x18c   : > { %4371 = vst [vmem:[#allocation70_spill] sm:$0xff] %v3618_v25  ;;  %v1149_v13 = vadd.f32 %v1146_v20, %v1142_v15  ;;  %v1147_v15 = vmul.f32 %v3128_v47, %v2773_v22  ;;  %v1021_v47 = vmul.f32 %v3511_v46, %v3208_v1 }
 0x18d   : > { %1368 = vrot.lane.b32.xlu1 %v4372_v18, %s4309_s9  ;;  %795 = vrot.lane.b32.xlu0 %v788_v38, %s4312_s3  ;;  %v1018_v38 = vmul.f32 %v3192_v51, %v2775_v23  ;;  %v1143_v18 = vmul.f32 %v4373_v5, %v2775_v23 }
 0x18f   : > { %v3633_v45 = vpop.permute.xlu1 %461  ;;  %v3635_v57 = vpop.permute.xlu0 %918  ;;  %v1025_v30 = vadd.f32 %v1022_v2, %v1018_v38  ;;  %v1150_v2 = vadd.f32 %v1147_v15, %v1143_v18  ;;  %v1537_v18 = vmul.f32 %v3251_v26, %v2773_v22  ;;  %v812_v22 = vmul.f32 %v3511_v46, %v3231_v3 }
 0x190   : > { %4374 = vst [vmem:[#allocation35_spill] sm:$0xff] %v3633_v45  ;;  %v4395_v45 = vld [vmem:[#allocation49_spill] sm:$0xff] }
 0x191   : > { %1519 = vrot.lane.b32.xlu1 %v1512_v6, %s4312_s3  ;;  %1155 = vrot.lane.b32.xlu0 %v1149_v13, %s4312_s3  ;;  %v4378_v6 = vld [vmem:[#allocation41_spill] sm:$0xff] }
 0x192   : > { %v1383_v13 = vmul.f32 %v3511_v46, %v4378_v6 }
 0x193   : > { %v3643_v28 = vpop.permute.xlu1 %481  ;;  %v3645_v33 = vpop.permute.xlu0 %946 }
 0x194   : > { %4375 = vst [vmem:[#allocation34_spill] sm:$0xff] %v3643_v28 }
 0x195   : > { %793 = vrot.lane.b32.xlu1 %v787_v29, %s4312_s3  ;;  %1159 = vrot.lane.b32.xlu0 %v4376_v36, %s4312_s3  ;;  %v1379_v29 = vmul.f32 %v3495_v50, %v4380_v7 }
 0x197   : > { %v3654_v16 = vpop.permute.xlu1 %501  ;;  %v3656_v20 = vpop.permute.xlu0 %560  ;;  %v1386_v5 = vadd.f32 %v1383_v13, %v1379_v29  ;;  %v1380_v13 = vmul.f32 %v4380_v7, %v2775_v23  ;;  %v3696_v29 = vld [vmem:[#allocation3 + $0x8] sm:$0xff] }
 0x198   : > { %4377 = vst [vmem:[#allocation38_spill] sm:$0xff] %v3654_v16 }
 0x199   : > { %797 = vrot.lane.b32.xlu1 %v4379_v39, %s4312_s3  ;;  %1032 = vrot.lane.b32.xlu0 %v1025_v30, %s4313_s25  ;;  %v1017_v39 = vmul.f32 %v3495_v50, %v3192_v51 }
 0x19b   : > { %v3669_v36 = vpop.permute.xlu1 %521  ;;  %v3671_v38 = vpop.permute.xlu0 %586  ;;  %v1024_v49 = vadd.f32 %v1021_v47, %v1017_v39 }
 0x19c   : > { %4381 = vst [vmem:[#allocation41_spill] sm:$0xff] %v3669_v36  ;;  %v1533_v36 = vmul.f32 %v3219_v40, %v2775_v23 }
 0x19d   : > { %1157 = vrot.lane.b32.xlu1 %v1150_v2, %s4312_s3  ;;  %1392 = vrot.lane.b32.xlu0 %v1386_v5, %s4313_s25  ;;  %v1384_v2 = vmul.f32 %v3696_v29, %v4378_v6  ;;  %v1536_v6 = vmul.f32 %v3511_v46, %v3251_v26  ;;  %s3992_s3 = sld [smem:[#allocation6]] }
 0x19e   : > { %v1540_v51 = vadd.f32 %v1537_v18, %v1533_v36 }
 0x19f   : > { %v3679_v30 = vpop.permute.xlu1 %558  ;;  %v3681_v37 = vpop.permute.xlu0 %616  ;;  %v1387_v23 = vadd.f32 %v1384_v2, %v1380_v13  ;;  %v4387_v2 = vld [vmem:[#allocation47_spill] sm:$0xff] }
 0x1a0   : > { %v1175_v26 = vmul.f32 %v3696_v29, %v4387_v2 }
 0x1a1   : > { %1030 = vrot.lane.b32.xlu1 %v1024_v49, %s4313_s25  ;;  %1396 = vrot.lane.b32.xlu0 %v3228_v12, %s4313_s25  ;;  %v4383_v12 = vld [vmem:[#allocation42_spill] sm:$0xff] }
 0x1a2   : > { %v808_v49 = vmul.f32 %v3495_v50, %v4383_v12 }
 0x1a3   : > { %v3690_v1 = vpop.permute.xlu1 %588  ;;  %v3692_v15 = vpop.permute.xlu0 %642 }
 0x1a4   : > { %4382 = vst [vmem:[#allocation40_spill] sm:$0xff] %v3692_v15  ;;  %v815_v7 = vadd.f32 %v812_v22, %v808_v49  ;;  %v4388_v22 = vld [vmem:[#allocation43_spill] sm:$0xff] }
 0x1a5   : > { %1034 = vrot.lane.b32.xlu1 %v3235_v4, %s4313_s25  ;;  %1547 = vrot.lane.b32.xlu0 %v1540_v51, %s4309_s9  ;;  %v1532_v4 = vmul.f32 %v3495_v50, %v3219_v40  ;;  %v3721_v51 = vld [vmem:[#allocation2 + $0x8] sm:$0xff] }
 0x1a6   : > { %v1171_v13 = vmul.f32 %v3721_v51, %v4386_v10 }
 0x1a7   : > { %v3707_v36 = vpop.permute.xlu1 %614  ;;  %v3709_v5 = vpop.permute.xlu0 %672  ;;  %v1539_v18 = vadd.f32 %v1536_v6, %v1532_v4  ;;  %v813_v6 = vmul.f32 %v3696_v29, %v3231_v3  ;;  %v4390_v4 = vld [vmem:[#allocation50_spill] sm:$0xff]  ;;  %v1174_v3 = vmul.f32 %v3511_v46, %v4387_v2 }
 0x1a8   : > { %4384 = vst [vmem:[#allocation37_spill] sm:$0xff] %v3709_v5  ;;  %v1049_v16 = vmul.f32 %v3511_v46, %v4390_v4 }
 0x1a9   : > { %1394 = vrot.lane.b32.xlu1 %v1387_v23, %s4313_s25  ;;  %821 = vrot.lane.b32.xlu0 %v815_v7, %s4309_s9  ;;  %v1178_v23 = vadd.f32 %v1175_v26, %v1171_v13  ;;  %v809_v7 = vmul.f32 %v3721_v51, %v4383_v12 }
 0x1ab   : > { %v3717_v47 = vpop.permute.xlu1 %644  ;;  %v3719_v39 = vpop.permute.xlu0 %698  ;;  %v816_v48 = vadd.f32 %v813_v6, %v809_v7  ;;  %v1408_v7 = vmul.f32 %v3721_v51, %v3297_v14 }
 0x1ac   : > { %4385 = vst [vmem:[#allocation42_spill] sm:$0xff] %v3719_v39  ;;  %v4397_v39 = vld [vmem:[#allocation33_spill] sm:$0xff] }
 0x1ad   : > { %1545 = vrot.lane.b32.xlu1 %v1539_v18, %s4309_s9  ;;  %825 = vrot.lane.b32.xlu0 %v4388_v22, %s4309_s9  ;;  %v4392_v18 = vld [vmem:[#allocation45_spill] sm:$0xff]  ;;  %v4393_v22 = vld [vmem:[#allocation48_spill] sm:$0xff]  ;;  %v893_v25 = vmul.f32 %v3721_v51, %v4397_v39 }
 0x1ae   : > { %v1045_v13 = vmul.f32 %v3495_v50, %v4393_v22 }
 0x1af   : > { %v3730_v49 = vpop.permute.xlu1 %670  ;;  %v742_v40 = vpop.permute.xlu0 %741 }
 0x1b0   : > { %4389 = vst [vmem:[#allocation46_spill] sm:$0xff] %v3730_v49  ;;  %v3739_v28 = vadd.f32 %v742_v40, %v4391_v35  ;;  %v1052_v54 = vadd.f32 %v1049_v16, %v1045_v13  ;;  %v1170_v35 = vmul.f32 %v3495_v50, %v4386_v10  ;;  %v1412_v16 = vmul.f32 %v3696_v29, %v3306_v60 }
 0x1b1   : > { %1549 = vrot.lane.b32.xlu1 %v4392_v18, %s4309_s9  ;;  %1185 = vrot.lane.b32.xlu0 %v1178_v23, %s4309_s9  ;;  %v1046_v13 = vmul.f32 %v3721_v51, %v4393_v22  ;;  %v4400_v22 = vld [vmem:[#allocation51_spill] sm:$0xff] }
 0x1b2   : > { %v1177_v18 = vadd.f32 %v1174_v3, %v1170_v35  ;;  %v1415_v6 = vadd.f32 %v1412_v16, %v1408_v7  ;;  %v1564_v3 = vmul.f32 %v3511_v46, %v3324_v44  ;;  %v1560_v7 = vmul.f32 %v3495_v50, %v4400_v22 }
 0x1b3   : > { %v3746_v26 = vpop.permute.xlu1 %700  ;;  %v923_v12 = vpop.permute.xlu0 %922 }
 0x1b4   : > { %4394 = vst [vmem:[#allocation47_spill] sm:$0xff] %v3746_v26  ;;  %v929_v61 = vadd.f32 %v923_v12, %v4395_v45  ;;  %v1255_v45 = vmul.f32 %v3721_v51, %v2978_v24  ;;  %v1050_v12 = vmul.f32 %v3696_v29, %v4390_v4  ;;  %v4399_v26 = vld [vmem:[#allocation55_spill] sm:$0xff] }
 0x1b5   : > { %823 = vrot.lane.b32.xlu1 %v816_v48, %s4309_s9  ;;  %1058 = vrot.lane.b32.xlu0 %v1052_v54, %s4311_s16  ;;  %v1259_v48 = vmul.f32 %v3696_v29, %v2991_v58  ;;  %v4396_v54 = vld [vmem:[#allocation53_spill] sm:$0xff] }
 0x1b6   : > { %v1053_v5 = vadd.f32 %v1050_v12, %v1046_v13  ;;  %v837_v13 = vmul.f32 %v3721_v51, %v3380_v21 }
 0x1b7   : > { %v3755_v40 = vpop.permute.xlu1 %739  ;;  %v1283_v23 = vpop.permute.xlu0 %1282  ;;  %v1262_v35 = vadd.f32 %v1259_v48, %v1255_v45  ;;  %v1567_v45 = vadd.f32 %v1564_v3, %v1560_v7  ;;  %v1411_v48 = vmul.f32 %v3511_v46, %v3306_v60  ;;  %v841_v60 = vmul.f32 %v3696_v29, %v3389_v32  ;;  %v4404_v3 = vld [vmem:[#allocation58_spill] sm:$0xff] }
 0x1b9   : > { %1183 = vrot.lane.b32.xlu1 %v1177_v18, %s4309_s9  ;;  %1062 = vrot.lane.b32.xlu0 %v4396_v54, %s4311_s16  ;;  %v4398_v18 = vld [vmem:[#allocation36_spill] sm:$0xff]  ;;  %v1290_v4 = vadd.f32 %v1283_v23, %v1262_v35 }
 0x1ba   : > { %v897_v41 = vmul.f32 %v3696_v29, %v4398_v18 }
 0x1bb   : > { %v921_v10 = vpop.permute.xlu1 %920  ;;  %v951_v2 = vpop.permute.xlu0 %950 }
 0x1bc   : > { %v957_v54 = vadd.f32 %v951_v2, %v929_v61  ;;  %v900_v49 = vadd.f32 %v897_v41, %v893_v25 }
 0x1bd   : > { %1187 = vrot.lane.b32.xlu1 %v4399_v26, %s4309_s9  ;;  %1422 = vrot.lane.b32.xlu0 %v1415_v6, %s4311_s16  ;;  %v1407_v26 = vmul.f32 %v3495_v50, %v3297_v14  ;;  %v844_v14 = vadd.f32 %v841_v60, %v837_v13  ;;  %s2345_s9 = smov 16  }
 0x1be   : > { %v928_v2 = vadd.f32 %v921_v10, %v900_v49  ;;  %v1565_v49 = vmul.f32 %v3696_v29, %v3324_v44  ;;  %v4403_v10 = vld [vmem:[#allocation63_spill] sm:$0xff]  ;;  %v840_v44 = vmul.f32 %v3511_v46, %v3389_v32  ;;  %v1593_v32 = vmul.f32 %v3696_v29, %v3439_v8 }
 0x1bf   : > { %v1285_v16 = vpop.permute.xlu1 %1284  ;;  %v1311_v34 = vpop.permute.xlu0 %1310  ;;  %v1414_v35 = vadd.f32 %v1411_v48, %v1407_v26  ;;  %v1202_v12 = vmul.f32 %v3511_v46, %v4403_v10 }
 0x1c0   : > { %v1291_v15 = vadd.f32 %v1285_v16, %v4401_v31  ;;  %v1318_v61 = vadd.f32 %v1311_v34, %v1290_v4  ;;  %v4402_v31 = vld [vmem:[#allocation57_spill] sm:$0xff]  ;;  %v4405_v4 = vld [vmem:[#allocation59_spill] sm:$0xff]  ;;  %v4406_v16 = vld [vmem:[#allocation62_spill] sm:$0xff] }
 0x1c1   : > { %1060 = vrot.lane.b32.xlu1 %v1053_v5, %s4311_s16  ;;  %1573 = vrot.lane.b32.xlu0 %v1567_v45, %s4313_s25  ;;  %v1561_v5 = vmul.f32 %v3721_v51, %v4400_v22  ;;  %v1198_v45 = vmul.f32 %v3495_v50, %v4406_v16 }
 0x1c3   : > { %v949_v23 = vpop.permute.xlu1 %948  ;;  %v1462_v6 = vpop.permute.xlu0 %1461  ;;  %v1568_v22 = vadd.f32 %v1565_v49, %v1561_v5  ;;  %v1199_v49 = vmul.f32 %v3721_v51, %v4406_v16  ;;  %v1258_v16 = vmul.f32 %v3511_v46, %v2991_v58  ;;  %v1588_v58 = vmul.f32 %v3495_v50, %v3416_v52 }
 0x1c4   : > { %v956_v41 = vadd.f32 %v949_v23, %v928_v2  ;;  %v1205_v2 = vadd.f32 %v1202_v12, %v1198_v45  ;;  %v1203_v12 = vmul.f32 %v3696_v29, %v4403_v10  ;;  %v4409_v10 = vld [vmem:[#allocation52_spill] sm:$0xff] }
 0x1c5   : > { %1420 = vrot.lane.b32.xlu1 %v1414_v35, %s4311_s16  ;;  %1577 = vrot.lane.b32.xlu0 %v4402_v31, %s4313_s25  ;;  %v836_v35 = vmul.f32 %v3495_v50, %v3380_v21 }
 0x1c7   : > { %v3797_v34 = vpop.permute.xlu1 %1308  ;;  %v1466_v25 = vpop.permute.xlu0 %1465  ;;  %v843_v31 = vadd.f32 %v840_v44, %v836_v35 }
 0x1c8   : > { %v3806_v7 = vadd.f32 %v1466_v25, %v4404_v3  ;;  %v1589_v25 = vmul.f32 %v3721_v51, %v3416_v52  ;;  %v868_v3 = vmul.f32 %v3511_v46, %v3455_v27  ;;  %v896_v52 = vmul.f32 %v3511_v46, %v4398_v18 }
 0x1c9   : > { %1424 = vrot.lane.b32.xlu1 %v4405_v4, %s4311_s16  ;;  %851 = vrot.lane.b32.xlu0 %v844_v14, %s4313_s25  ;;  %v4408_v4 = vld [vmem:[#allocation54_spill] sm:$0xff]  ;;  %v1436_v18 = vmul.f32 %v3721_v51, %v4409_v10 }
 0x1ca   : > { %v1596_v21 = vadd.f32 %v1593_v32, %v1589_v25  ;;  %v1439_v45 = vmul.f32 %v3511_v46, %v4408_v4 }
 0x1cb   : > { %v1313_v48 = vpop.permute.xlu1 %1312  ;;  %v3813_v26 = vpop.permute.xlu0 %1101 }
 0x1cc   : > { %v3817_v23 = vadd.f32 %v1313_v48, %v1291_v15  ;;  %v4407_v15 = vld [vmem:[#allocation64_spill] sm:$0xff] }
 0x1cd   : > { %1575 = vrot.lane.b32.xlu1 %v1568_v22, %s4313_s25  ;;  %1211 = vrot.lane.b32.xlu0 %v1205_v2, %s4313_s25  ;;  %v864_v22 = vmul.f32 %v3495_v50, %v3444_v59  ;;  %v1435_v2 = vmul.f32 %v3495_v50, %v4409_v10  ;;  %v1230_v10 = vmul.f32 %v3511_v46, %v3483_v9 }
 0x1cf   : > { %v3823_v13 = vpop.permute.xlu1 %1463  ;;  %v3825_v60 = vpop.permute.xlu0 %974  ;;  %v871_v25 = vadd.f32 %v868_v3, %v864_v22  ;;  %v1442_v32 = vadd.f32 %v1439_v45, %v1435_v2  ;;  %v1231_v45 = vmul.f32 %v3696_v29, %v3483_v9 }
 0x1d1   : > { %849 = vrot.lane.b32.xlu1 %v843_v31, %s4313_s25  ;;  %1215 = vrot.lane.b32.xlu0 %v4407_v15, %s4313_s25  ;;  %v1206_v31 = vadd.f32 %v1203_v12, %v1199_v49  ;;  %v4410_v15 = vld [vmem:[#allocation65_spill] sm:$0xff]  ;;  %v1470_v12 = vadd.f32 %v1462_v6, %v1442_v32 }
 0x1d3   : > { %v3834_v14 = vpop.permute.xlu1 %1099  ;;  %v979_v5 = vpop.permute.xlu0 %978 }
 0x1d4   : > { %v3844_v48 = vadd.f32 %v979_v5, %v957_v54  ;;  %v1592_v54 = vmul.f32 %v3511_v46, %v3439_v8 }
 0x1d5   : > { %853 = vrot.lane.b32.xlu1 %v3452_v42, %s4313_s25  ;;  %1603 = vrot.lane.b32.xlu0 %v1596_v21, %s4311_s16  ;;  %v1254_v42 = vmul.f32 %v3495_v50, %v2978_v24  ;;  %v1227_v24 = vmul.f32 %v3721_v51, %v3478_v43 }
 0x1d6   : > { %v1595_v22 = vadd.f32 %v1592_v54, %v1588_v58  ;;  %v892_v58 = vmul.f32 %v3495_v50, %v4397_v39 }
 0x1d7   : > { %v1104_v44 = vpop.permute.xlu1 %1103  ;;  %v1339_v35 = vpop.permute.xlu0 %1338  ;;  %v1261_v49 = vadd.f32 %v1258_v16, %v1254_v42  ;;  %v4411_v16 = vld [vmem:[#allocation60_spill] sm:$0xff]  ;;  %v865_v42 = vmul.f32 %v3721_v51, %v3444_v59 }
 0x1d8   : > { %v3860_v5 = vadd.f32 %v1104_v44, %v4410_v15  ;;  %v3862_v21 = vadd.f32 %v1339_v35, %v1318_v61  ;;  %v1074_v35 = vmul.f32 %v3721_v51, %v4411_v16  ;;  %v899_v59 = vadd.f32 %v896_v52, %v892_v58  ;;  %v4414_v58 = vld [vmem:[#allocation32_spill] sm:$0xff] }
 0x1d9   : > { %1213 = vrot.lane.b32.xlu1 %v1206_v31, %s4313_s25  ;;  %877 = vrot.lane.b32.xlu0 %v871_v25, %s4311_s16  ;;  %v1289_v61 = vadd.f32 %v3597_v19, %v1261_v49  ;;  %v4412_v31 = vld [vmem:[#allocation61_spill] sm:$0xff]  ;;  %s2347_s25 = smov 64  }
 0x1da   : > { %v1078_v25 = vmul.f32 %v3696_v29, %v4412_v31  ;;  %v927_v39 = vadd.f32 %v3635_v57, %v899_v59  ;;  %v1073_v57 = vmul.f32 %v3495_v50, %v4411_v16  ;;  %v716_v59 = vmul.f32 %v3696_v29, %v4414_v58 }
 0x1db   : > { %v977_v3 = vpop.permute.xlu1 %976  ;;  %v1490_v8 = vpop.permute.xlu0 %1489  ;;  %v1317_v6 = vadd.f32 %v3797_v34, %v1289_v61  ;;  %v1440_v34 = vmul.f32 %v3696_v29, %v4408_v4 }
 0x1dc   : > { %v984_v2 = vadd.f32 %v977_v3, %v956_v41  ;;  %v1498_v44 = vadd.f32 %v1490_v8, %v1470_v12  ;;  %v1234_v41 = vadd.f32 %v1231_v45, %v1227_v24  ;;  %v1081_v3 = vadd.f32 %v1078_v25, %v1074_v35 }
 0x1dd   : > { %1601 = vrot.lane.b32.xlu1 %v1595_v22, %s4311_s16  ;;  %881 = vrot.lane.b32.xlu0 %v3473_v17, %s4311_s16  ;;  %v869_v17 = vmul.f32 %v3696_v29, %v3455_v27  ;;  %v1443_v4 = vadd.f32 %v1440_v34, %v1436_v18  ;;  %v955_v52 = vadd.f32 %v3645_v33, %v927_v39  ;;  %v4413_v18 = vld [vmem:[#allocation31_spill] sm:$0xff] }
 0x1de   : > { %v1109_v22 = vadd.f32 %v3813_v26, %v1081_v3  ;;  %v712_v34 = vmul.f32 %v3721_v51, %v4413_v18 }
 0x1df   : > { %v1337_v54 = vpop.permute.xlu1 %1336  ;;  %v1494_v19 = vpop.permute.xlu0 %1493  ;;  %v872_v12 = vadd.f32 %v869_v17, %v865_v42  ;;  %v1471_v24 = vadd.f32 %v3823_v13, %v1443_v4 }
 0x1e0   : > { %v1345_v32 = vadd.f32 %v1337_v54, %v1317_v6  ;;  %v1500_v15 = vadd.f32 %v1494_v19, %v3806_v7 }
 0x1e1   : > { %1605 = vrot.lane.b32.xlu1 %v3475_v63, %s4311_s16  ;;  %1241 = vrot.lane.b32.xlu0 %v1234_v41, %s4311_s16  ;;  %v1226_v63 = vmul.f32 %v3495_v50, %v3478_v43  ;;  %v983_v43 = vadd.f32 %v3825_v60, %v955_v52 }
 0x1e3   : > { %v1341_v49 = vpop.permute.xlu1 %1340  ;;  %v770_v27 = vpop.permute.xlu0 %769  ;;  %v1233_v9 = vadd.f32 %v1230_v10, %v1226_v63 }
 0x1e4   : > { %v1347_v8 = vadd.f32 %v1341_v49, %v3817_v23  ;;  %v776_v7 = vadd.f32 %v770_v27, %v3739_v28  ;;  %v1077_v23 = vmul.f32 %v3511_v46, %v4412_v31 }
 0x1e5   : > { %879 = vrot.lane.b32.xlu1 %v872_v12, %s4311_s16  ;;  %v719_v12 = vadd.f32 %v716_v59, %v712_v34 }
 0x1e6   : > { %v1080_v13 = vadd.f32 %v1077_v23, %v1073_v57 }
 0x1e7   : > { %v1492_v45 = vpop.permute.xlu1 %1491  ;;  %v1130_v61 = vpop.permute.xlu0 %1129  ;;  %v747_v3 = vadd.f32 %v3755_v40, %v719_v12 }
 0x1e8   : > { %v1499_v28 = vadd.f32 %v1492_v45, %v1471_v24  ;;  %v1137_v6 = vadd.f32 %v1130_v61, %v1109_v22  ;;  %v1108_v33 = vadd.f32 %v3834_v14, %v1080_v13 }
 0x1e9   : > { %1239 = vrot.lane.b32.xlu1 %v1233_v9, %s4311_s16 }
 0x1eb   : > { %v768_v26 = vpop.permute.xlu1 %767  ;;  %v1003_v35 = vpop.permute.xlu0 %1002 }
 0x1ec   : > { %v1011_v25 = vadd.f32 %v1003_v35, %v983_v43 }
 0x1ed   : > { %1243 = vrot.lane.b32.xlu1 %v3499_v56, %s4311_s16  ;;  %s3998_s16 = sld [smem:[#allocation6 + $0x31]] }
 0x1ef   : > { %v1128_v54 = vpop.permute.xlu1 %1127  ;;  %v1007_v31 = vpop.permute.xlu0 %1006 }
 0x1f0   : > { %v1136_v19 = vadd.f32 %v1128_v54, %v1108_v33  ;;  %v1013_v41 = vadd.f32 %v1007_v31, %v3844_v48 }
 0x1f3   : > { %v1132_v42 = vpop.permute.xlu1 %1131  ;;  %v1367_v17 = vpop.permute.xlu0 %1366 }
 0x1f4   : > { %v1138_v60 = vadd.f32 %v1132_v42, %v3860_v5  ;;  %v1374_v16 = vadd.f32 %v1367_v17, %v3862_v21  ;;  %v775_v21 = vadd.f32 %v768_v26, %v747_v3 }
 0x1f7   : > { %v1005_v56 = vpop.permute.xlu1 %1004  ;;  %v1518_v49 = vpop.permute.xlu0 %1517 }
 0x1f8   : > { %v1012_v14 = vadd.f32 %v1005_v56, %v984_v2  ;;  %v3924_v27 = vadd.f32 %v1518_v49, %v1498_v44 }
 0x1fb   : > { %v1365_v10 = vpop.permute.xlu1 %1364  ;;  %v1522_v48 = vpop.permute.xlu0 %1521 }
 0x1fc   : > { %v1373_v4 = vadd.f32 %v1365_v10, %v1345_v32  ;;  %v3927_v5 = vadd.f32 %v1522_v48, %v1500_v15 }
 0x1ff   : > { %v1369_v63 = vpop.permute.xlu1 %1368  ;;  %v796_v39 = vpop.permute.xlu0 %795 }
 0x200   : > { %v1375_v22 = vadd.f32 %v1369_v63, %v1347_v8  ;;  %v3929_v24 = vadd.f32 %v796_v39, %v775_v21 }
 0x203   : > { %v1520_v45 = vpop.permute.xlu1 %1519  ;;  %v1156_v61 = vpop.permute.xlu0 %1155 }
 0x204   : > { %v3931_v9 = vadd.f32 %v1520_v45, %v1499_v28  ;;  %v3933_v2 = vadd.f32 %v1156_v61, %v1136_v19 }
 0x207   : > { %v3935_v44 = vpop.permute.xlu1 %793  ;;  %v1160_v52 = vpop.permute.xlu0 %1159 }
 0x208   : > { %v3937_v23 = vadd.f32 %v1160_v52, %v1138_v60 }
 0x20b   : > { %v798_v40 = vpop.permute.xlu1 %797  ;;  %v1033_v32 = vpop.permute.xlu0 %1032 }
 0x20c   : > { %v3939_v15 = vadd.f32 %v798_v40, %v776_v7  ;;  %v1040_v43 = vadd.f32 %v1033_v32, %v1012_v14 }
 0x20f   : > { %v1158_v57 = vpop.permute.xlu1 %1157  ;;  %v1393_v8 = vpop.permute.xlu0 %1392 }
 0x210   : > { %v3941_v26 = vadd.f32 %v1158_v57, %v1137_v6  ;;  %v1401_v39 = vadd.f32 %v1393_v8, %v1373_v4 }
 0x213   : > { %v1031_v35 = vpop.permute.xlu1 %1030  ;;  %v1397_v13 = vpop.permute.xlu0 %1396 }
 0x214   : > { %v1039_v28 = vadd.f32 %v1031_v35, %v1011_v25  ;;  %v1403_v4 = vadd.f32 %v1397_v13, %v1375_v22 }
 0x217   : > { %v1035_v33 = vpop.permute.xlu1 %1034  ;;  %v3943_v54 = vpop.permute.xlu0 %1547 }
 0x218   : > { %v1041_v14 = vadd.f32 %v1035_v33, %v1013_v41 }
 0x21b   : > { %v1395_v31 = vpop.permute.xlu1 %1394  ;;  %v3945_v19 = vpop.permute.xlu0 %821 }
 0x21c   : > { %v1402_v21 = vadd.f32 %v1395_v31, %v1374_v16  ;;  %v715_v16 = vmul.f32 %v3511_v46, %v4414_v58 }
 0x21f   : > { %v3947_v42 = vpop.permute.xlu1 %1545  ;;  %v3949_v17 = vpop.permute.xlu0 %825 }
 0x223   : > { %v3951_v7 = vpop.permute.xlu1 %1549  ;;  %v3953_v60 = vpop.permute.xlu0 %1185 }
 0x227   : > { %v3955_v34 = vpop.permute.xlu1 %823  ;;  %v1059_v6 = vpop.permute.xlu0 %1058 }
 0x228   : > { %v1067_v12 = vadd.f32 %v1059_v6, %v1039_v28  ;;  %v711_v6 = vmul.f32 %v3495_v50, %v4413_v18 }
 0x22a   : > { %v1629_v45 = vrot.slane %v1067_v12, 1  ;;  %v718_v13 = vadd.f32 %v715_v16, %v711_v6  ;;  %v4417_v16 = vld [vmem:[#allocation39_spill] sm:$0xff] }
 0x22b   : > { %v3957_v59 = vpop.permute.xlu1 %1183  ;;  %v1063_v25 = vpop.permute.xlu0 %1062 }
 0x22c   : > { %v3961_v10 = vadd.f32 %v1063_v25, %v1041_v14  ;;  %v4415_v14 = vld [vmem:[#allocation28_spill] sm:$0xff] }
 0x22d   : > { %v534_v12 = vmul.f32 %v3511_v46, %v4415_v14  ;;  %v535_v22 = vmul.f32 %v3696_v29, %v4415_v14 }
 0x22e   : > { %v1632_v61 = vrot.slane %v3961_v10, 1  ;;  %v4428_v10 = vld [vmem:[#allocation35_spill] sm:$0xff] }
 0x22f   : > { %v3959_v56 = vpop.permute.xlu1 %1187  ;;  %v1423_v49 = vpop.permute.xlu0 %1422 }
 0x230   : > { %v1430_v52 = vadd.f32 %v1423_v49, %v1402_v21 }
 0x233   : > { %v1061_v48 = vpop.permute.xlu1 %1060  ;;  %v3963_v3 = vpop.permute.xlu0 %1573 }
 0x234   : > { %v1068_v63 = vadd.f32 %v1061_v48, %v1040_v43  ;;  %v1657_v43 = vrot.slane %v1430_v52, 1  ;;  %v4416_v48 = vld [vmem:[#allocation27_spill] sm:$0xff] }
 0x235   : > { %v531_v58 = vmul.f32 %v3721_v51, %v4416_v48  ;;  %v530_v18 = vmul.f32 %v3495_v50, %v4416_v48 }
 0x236   : > { %v1630_v40 = vrot.slane %v1068_v63, 1 }
 0x237   : > { %v1421_v32 = vpop.permute.xlu1 %1420  ;;  %v3966_v57 = vpop.permute.xlu0 %1577 }
 0x238   : > { %v1429_v35 = vadd.f32 %v1421_v32, %v1401_v39  ;;  %v1631_v41 = vsel %vm1616_vm7, %v1629_v45, %v1630_v40  ;;  %v3972_v28 = vsel %vm1616_vm7, %v1630_v40, %v1632_v61  ;;  %v746_v45 = vadd.f32 %v3620_v0, %v718_v13 }
 0x239   : > { %v537_v40 = vadd.f32 %v534_v12, %v530_v18  ;;  %v538_v32 = vadd.f32 %v535_v22, %v531_v58  ;;  %v399_v22 = vstv %s3992_s3  ;;  %v402_v13 = vstv %s3998_s16 }
 0x23a   : > { %v1656_v8 = vrot.slane %v1429_v35, 1  ;;  %v774_v0 = vadd.f32 %v3579_v55, %v746_v45  ;;  %v404_v18 = vmul.f32 %v3696_v29, %v402_v13  ;;  %v832_v29 = vadd.f32 %v3949_v17, %v3939_v15 }
 0x23b   : > { %v1425_v33 = vpop.permute.xlu1 %1424  ;;  %v3976_v31 = vpop.permute.xlu0 %851  ;;  %v565_v35 = vadd.f32 %v3584_v11, %v537_v40  ;;  %v1556_v15 = vadd.f32 %v3951_v7, %v3927_v5 }
 0x23c   : > { %v3980_v25 = vadd.f32 %v1425_v33, %v1403_v4  ;;  %v3983_v49 = vsel %vm1616_vm7, %v1656_v8, %v1657_v43  ;;  %v567_v4 = vadd.f32 %v3656_v20, %v4417_v16  ;;  %v566_v8 = vadd.f32 %v3679_v30, %v538_v32  ;;  %v4418_v16 = vld [vmem:[#allocation40_spill] sm:$0xff] }
 0x23d   : > { %v593_v48 = vadd.f32 %v3528_v53, %v565_v35  ;;  %v401_v30 = vmul.f32 %v3721_v51, %v399_v22 }
 0x23e   : > { %v1659_v21 = vrot.slane %v3980_v25, 1  ;;  %v595_v14 = vadd.f32 %v3690_v1, %v567_v4  ;;  %v594_v12 = vadd.f32 %v3671_v38, %v566_v8  ;;  %v4419_v8 = vld [vmem:[#allocation69_spill] sm:$0xff] }
 0x23f   : > { %v1576_v63 = vpop.permute.xlu1 %1575  ;;  %v3996_v39 = vpop.permute.xlu0 %1211  ;;  %v621_v38 = vadd.f32 %v3599_v62, %v593_v48  ;;  %v406_v35 = vadd.f32 %v404_v18, %v401_v30 }
 0x240   : > { %v4004_v52 = vsel %vm1616_vm7, %v1657_v43, %v1659_v21  ;;  %v802_v43 = vadd.f32 %v3935_v44, %v774_v0  ;;  %v622_v55 = vadd.f32 %v3707_v36, %v594_v12  ;;  %v623_v1 = vadd.f32 %v3681_v37, %v595_v14  ;;  %v4420_v0 = vld [vmem:[#allocation46_spill] sm:$0xff] }
 0x241   : > { %v1555_v44 = vadd.f32 %v3943_v54, %v3931_v9  ;;  %v403_v37 = vmul.f32 %v3511_v46, %v402_v13  ;;  %v1584_v13 = vadd.f32 %v3966_v57, %v1556_v15 }
 0x242   : > { %v830_v20 = vadd.f32 %v3945_v19, %v802_v43  ;;  %v651_v45 = vadd.f32 %v3717_v47, %v623_v1  ;;  %v1554_v19 = vadd.f32 %v3947_v42, %v3924_v27  ;;  %v650_v9 = vadd.f32 %v4418_v16, %v622_v55  ;;  %v4421_v42 = vld [vmem:[#allocation37_spill] sm:$0xff]  ;;  %v4425_v55 = vld [vmem:[#allocation70_spill] sm:$0xff] }
 0x243   : > { %v850_v33 = vpop.permute.xlu1 %849  ;;  %v4010_v6 = vpop.permute.xlu0 %1215  ;;  %v1583_v51 = vadd.f32 %v1576_v63, %v1555_v44  ;;  %v400_v63 = vmul.f32 %v3495_v50, %v399_v22  ;;  %v4424_v50 = vld [vmem:[#allocation30_spill] sm:$0xff] }
 0x244   : > { %v858_v53 = vadd.f32 %v850_v33, %v830_v20  ;;  %v1582_v54 = vadd.f32 %v3963_v3, %v1554_v19  ;;  %v649_v33 = vadd.f32 %v4419_v8, %v621_v38  ;;  %v678_v27 = vadd.f32 %v4420_v0, %v650_v9  ;;  %v4430_v9 = vld [vmem:[#allocation26_spill] sm:$0xff] }
 0x245   : > { %v679_v14 = vadd.f32 %v4421_v42, %v651_v45  ;;  %v1193_v3 = vadd.f32 %v3953_v60, %v3941_v26  ;;  %v405_v7 = vadd.f32 %v403_v37, %v400_v63  ;;  %v4426_v60 = vld [vmem:[#allocation42_spill] sm:$0xff]  ;;  %v831_v38 = vadd.f32 %v3955_v34, %v3929_v24  ;;  %v4434_v63 = vld [vmem:[#allocation29_spill] sm:$0xff] }
 0x246   : > { %v677_v22 = vadd.f32 %v4424_v50, %v649_v33  ;;  %v706_v1 = vadd.f32 %v4426_v60, %v678_v27  ;;  %v1192_v8 = vadd.f32 %v3957_v59, %v3933_v2  ;;  %v4432_v27 = vld [vmem:[#allocation68_spill] sm:$0xff]  ;;  %v1194_v2 = vadd.f32 %v3959_v56, %v3937_v23  ;;  %v4437_v56 = vld [vmem:[#allocation23_spill] sm:$0xff] }
 0x247   : > { %v854_v58 = vpop.permute.xlu1 %853  ;;  %v1604_v11 = vpop.permute.xlu0 %1603 }
 0x248   : > { %v860_v62 = vadd.f32 %v854_v58, %v832_v29  ;;  %v1611_v4 = vadd.f32 %v1604_v11, %v1583_v51  ;;  %v4423_v58 = vld [vmem:[#allocation47_spill] sm:$0xff]  ;;  %v859_v51 = vadd.f32 %v3976_v31, %v831_v38  ;;  %v4433_v31 = vld [vmem:[#allocation38_spill] sm:$0xff] }
 0x249   : > { %v707_v11 = vadd.f32 %v4423_v58, %v679_v14 }
 0x24a   : > { %v1671_v20 = vrot.slane %v1611_v4, 2  ;;  %v1618_v4 = vrot.slane %v706_v1, 1 }
 0x24b   : > { %v1214_v40 = vpop.permute.xlu1 %1213  ;;  %v878_v32 = vpop.permute.xlu0 %877  ;;  %v1620_v29 = vrot.slane %v707_v11, 1 }
 0x24c   : > { %v886_v36 = vadd.f32 %v878_v32, %v858_v53  ;;  %v1221_v30 = vadd.f32 %v1214_v40, %v1193_v3  ;;  %v4427_v32 = vld [vmem:[#allocation66_spill] sm:$0xff] }
 0x24d   : > { %v425_v19 = vadd.f32 %v4427_v32, %v405_v7 }
 0x24e   : > { %v4035_v47 = vadd.f32 %v1631_v41, %v886_v36  ;;  %v4422_v41 = vld [vmem:[#allocation25_spill] sm:$0xff] }
 0x24f   : > { %v1602_v17 = vpop.permute.xlu1 %1601  ;;  %v882_v46 = vpop.permute.xlu0 %881  ;;  %v426_v12 = vadd.f32 %v4422_v41, %v406_v35  ;;  %v4429_v35 = vld [vmem:[#allocation67_spill] sm:$0xff] }
 0x250   : > { %v1610_v43 = vadd.f32 %v1602_v17, %v1582_v54  ;;  %v888_v48 = vadd.f32 %v882_v46, %v860_v62  ;;  %v445_v16 = vadd.f32 %v4429_v35, %v425_v19  ;;  %v705_v54 = vadd.f32 %v4430_v9, %v677_v22  ;;  %v4431_v62 = vld [vmem:[#allocation34_spill] sm:$0xff] }
 0x251   : > { %v446_v26 = vadd.f32 %v4425_v55, %v426_v12  ;;  %v1220_v17 = vadd.f32 %v3996_v39, %v1192_v8  ;;  %v1644_v12 = vrot.slane %v4035_v47, 2  ;;  %v2344_v9 = vmov 1966171168  }
 0x252   : > { %v1670_v18 = vrot.slane %v1610_v43, 2  ;;  %v1639_v5 = vadd.f32 %v1632_v61, %v888_v48  ;;  %v465_v42 = vadd.f32 %v4432_v27, %v445_v16  ;;  %v1617_v43 = vrot.slane %v705_v54, 1  ;;  %v4435_v48 = vld [vmem:[#allocation41_spill] sm:$0xff] }
 0x253   : > { %v1606_v44 = vpop.permute.xlu1 %1605  ;;  %v1242_v53 = vpop.permute.xlu0 %1241  ;;  %v466_v61 = vadd.f32 %v4428_v10, %v446_v26  ;;  %v1709_v16 = vlaneseq  ;;  %v1716_v54 = vunpack.c.l.s4 %v2344_v9 }
 0x254   : > { %v1612_v57 = vadd.f32 %v1606_v44, %v1584_v13  ;;  %v1249_v45 = vadd.f32 %v1242_v53, %v1221_v30  ;;  %v1672_v40 = vsel %vm1643_vm8, %v1670_v18, %v1671_v20  ;;  %v485_v3 = vadd.f32 %v4434_v63, %v465_v42 }
 0x255   : > { %v486_v24 = vadd.f32 %v4431_v62, %v466_v61  ;;  %v1647_v58 = vrot.slane %v1639_v5, 2  ;;  %v1619_v39 = vsel %vm1616_vm7, %v1617_v43, %v1618_v4  ;;  %v1222_v18 = vadd.f32 %v4010_v6, %v1194_v2 }
 0x256   : > { %v1673_v36 = vrot.slane %v1612_v57, 2  ;;  %v1665_v37 = vadd.f32 %v4004_v52, %v1249_v45  ;;  %v1621_v52 = vsel %vm1616_vm7, %v1618_v4, %v1620_v29  ;;  %v1694_v6 = vstv %s1693_s5 }
 0x257   : > { %v880_v34 = vpop.permute.xlu1 %879  ;;  %v506_v14 = vadd.f32 %v4433_v31, %v486_v24  ;;  %v4088_v62 = vshrl.u32 %v1709_v16, 7  ;;  %vm1711_vm9 = vcmp.lt.s32.totalorder %v1709_v16, 16  ;;  %vm1740_vm10 = vcmp.ge.s32.totalorder %v1709_v16, 16 }
 0x258   : > { %v1674_v33 = vsel %vm1643_vm8, %v1671_v20, %v1673_v36  ;;  %v887_v0 = vadd.f32 %v880_v34, %v859_v51  ;;  %v4436_v20 = vld [vmem:[#allocation24_spill] sm:$0xff]  ;;  %vm1741_vm11 = vcmp.lt.s32.totalorder %v1709_v16, 32  ;;  %vm4095_vm13 = vcmp.ge.s32.totalorder %v1709_v16, 32 }
 0x259   : > { %v1679_v15 = vadd.f32 %v1674_v33, %v1665_v37  ;;  %v526_v41 = vadd.f32 %v4435_v48, %v506_v14  ;;  %v505_v30 = vadd.f32 %v4436_v20, %v485_v3  ;;  %vm1742_vm12 = vmand %vm1740_vm10, %vm1741_vm11  ;;  %vm1749_vm14 = vcmp.lt.s32.totalorder %v1709_v16, 48 }
 0x25a   : > { %v1638_v46 = vadd.f32 %v3972_v28, %v887_v0  ;;  %vm1750_vm15 = vmand %vm4095_vm13, %vm1749_vm14  ;;  %vm4108_vm1 = vcmp.lt.s32.totalorder %v1709_v16, 64  ;;  %vm4113_vm2 = vcmp.ge.s32.totalorder %v1709_v16, 64  ;;  %vm4118_vm3 = vcmp.lt.s32.totalorder %v1709_v16, 80 }
 0x25b   : > { %v1240_v59 = vpop.permute.xlu1 %1239  ;;  %v1625_v28 = vadd.f32 %v1621_v52, %v526_v41  ;;  %v525_v22 = vadd.f32 %v4437_v56, %v505_v30  ;;  %v1685_v1 = vrot.slane %v1679_v15, 4  ;;  %vm1780_vm5 = vmand %vm4113_vm2, %vm4118_vm3  ;;  %vm4131_vm6 = vcmp.ge.s32.totalorder %v1709_v16, 80 }
 0x25c   : > { %v1645_v11 = vrot.slane %v1638_v46, 2  ;;  %v1248_v13 = vadd.f32 %v1240_v59, %v1220_v17  ;;  %vm4136_vm7 = vcmp.lt.s32.totalorder %v1709_v16, 96  ;;  %vm4150_vm10 = vcmp.lt.s32.totalorder %v1709_v16, 112 }
 0x25d   : > { %v1624_v60 = vadd.f32 %v1619_v39, %v525_v22  ;;  %vm1810_vm13 = vcmp.lt.s32.totalorder %v1709_v16, 128 }
 0x25e   : > { %v1646_v7 = vsel %vm1643_vm8, %v1644_v12, %v1645_v11  ;;  %v1648_v50 = vsel %vm1643_vm8, %v1645_v11, %v1647_v58  ;;  %v1664_v23 = vadd.f32 %v3983_v49, %v1248_v13  ;;  %vm1795_vm8 = vmand %vm4131_vm6, %vm4136_vm7 }
 0x25f   : > { %v1652_v47 = vadd.f32 %v1648_v50, %v1625_v28  ;;  %v1244_v5 = vpop.permute.xlu1 %1243  ;;  %v1651_v38 = vadd.f32 %v1646_v7, %v1624_v60 }
 0x260   : > { %v1678_v55 = vadd.f32 %v1672_v40, %v1664_v23  ;;  %v1250_v26 = vadd.f32 %v1244_v5, %v1222_v18 }
 0x262   : > { %v1684_v44 = vrot.slane %v1678_v55, 4  ;;  %v1666_v53 = vadd.f32 %v1659_v21, %v1250_v26 }
 0x264   : > { %v1686_v57 = vsel %vm227_vm0, %v1684_v44, %v1685_v1  ;;  %v1680_v45 = vadd.f32 %v1673_v36, %v1666_v53  ;;  %v1717_v36 = vunpack.c.0.s8 %v1716_v54 }
 0x265   : > { %v1691_v32 = vadd.f32 %v1686_v57, %v1651_v38 }
 0x266   : > { %v1687_v19 = vrot.slane %v1680_v45, 4  ;;  %v1720_v24 = vsub.s32 %v1717_v36, %v4088_v62 }
 0x267   : > { %v1695_v49 = vadd.f32 %v1694_v6, %v1691_v32 }
 0x268   : > { %v1688_v10 = vsel %vm227_vm0, %v1685_v1, %v1687_v19  ;;  %vm4103_vm0 = vcmp.ge.s32.totalorder %v1709_v16, 48 }
 0x269   : > { %v2112_v61 = vmul.f32 -1.442695, %v1695_v49  ;;  %v1692_v29 = vadd.f32 %v1688_v10, %v1652_v47  ;;  %vm1758_vm4 = vmand %vm4103_vm0, %vm4108_vm1 }
 0x26b   : > { %2202 = vpow2.f32 %v2112_v61  ;;  %v1696_v40 = vadd.f32 %v1694_v6, %v1692_v29  ;;  %v1897_v29 = vsub.s32 0, %v4088_v62 }
 0x26d   : > { %v2113_v51 = vmul.f32 -1.442695, %v1696_v40  ;;  %v1901_v40 = vsub.s32 1, %v4088_v62 }
 0x26f   : > { %2204 = vpow2.f32 %v2113_v51 }
 0x278   : > { %v2203_v37 = vpop.eup %2202 }
 0x279   : > { %v1703_v35 = vadd.f32 1.0, %v2203_v37 }
 0x27b   : > { %2206 = vrcp.f32 %v1703_v35 }
 0x27c   : > { %v2205_v25 = vpop.eup %2204 }
 0x27d   : > { %v1704_v21 = vadd.f32 1.0, %v2205_v25  ;;  %v1893_v25 = vld [vmem:[%s2505_s12] sm:$0xff]  ;;  %s2261_s12 = sshll.u32 %s2352_s20, 4  ;;  %s2262_s12 = int_to_ptr.vmem [resolvable:$false] %s2261_s12 }
 0x27e   : > { %s2263_s1 = scalar_lea.vmem %s2262_s12, 256  ;;  %p2264_p2 = scmp.lt.s32.totalorder %s1923_s15, %s2262_s12 }
 0x27f   : > { %2208 = vrcp.f32 %v1704_v21  ;;  %p2265_p1 = scmp.lt.s32.totalorder %s2263_s1, %s2257_s28 }
 0x281   : > { %p2266_p0 = por %p2265_p1, %p2264_p2 }
 0x283   : > { %p2267_p3 = pnand %p2266_p0, %p2260_p13 }
 0x288   : > { %v2207_v34 = vpop.eup %2206 }
 0x289   : > { %v1721_v4 = vrot.slane %v2207_v34, %v1720_v24  ;;  %1713 = vst.msk [vmem:[#allocation4] sm:$0x1] %vm1711_vm9, %v2207_v34  ;;  %v1760_v0 = vcombine.high %v2207_v34, %v2207_v34 }
 0x28b   : > { %v1722_v8 = vcombine.high %v1721_v4, %v1721_v4  ;;  %v1729_v31 = vrot.slane %v1721_v4, %v1720_v24  ;;  %v1767_v15 = vrot.slane %v1760_v0, %v1720_v24 }
 0x28c   : > { %v2209_v33 = vpop.eup %2208 }
 0x28d   : > { %v1736_v27 = vrot.slane %v1722_v8, %v1720_v24  ;;  %v1821_v42 = vrot.slane %v2209_v33, %v1720_v24  ;;  %1813 = vst.msk [vmem:[#allocation4 + $0x1] sm:$0x1] %vm1711_vm9, %v2209_v33  ;;  %v1744_v17 = vcombine.high %v1729_v31, %v1729_v31  ;;  %v1851_v63 = vcombine.high %v2209_v33, %v2209_v33 }
 0x28e   : > { %v1774_v43 = vrot.slane %v1767_v15, %v1720_v24  ;;  %v1782_v59 = vcombine.high %v1767_v15, %v1767_v15  ;;  %vm4145_vm9 = vcmp.ge.s32.totalorder %v1709_v16, 96 }
 0x28f   : > { %1737 = vrot.lane.b32.xlu0 %v1736_v27, %s2345_s9  ;;  %v1822_v14 = vcombine.high %v1821_v42, %v1821_v42  ;;  %v1829_v46 = vrot.slane %v1821_v42, %v1720_v24  ;;  %v1858_v48 = vrot.slane %v1851_v63, %v1720_v24  ;;  %v1752_v2 = vcombine.high %v1736_v27, %v1736_v27  ;;  %vm1803_vm11 = vmand %vm4145_vm9, %vm4150_vm10 }
 0x290   : > { %v1789_v58 = vrot.slane %v1782_v59, %v1720_v24  ;;  %v1797_v20 = vcombine.high %v1774_v43, %v1774_v43 }
 0x291   : > { %v1836_v52 = vrot.slane %v1822_v14, %v1720_v24  ;;  %v1841_v3 = vcombine.high %v1829_v46, %v1829_v46  ;;  %v1865_v41 = vrot.slane %v1858_v48, %v1720_v24  ;;  %v1870_v11 = vcombine.high %v1858_v48, %v1858_v48 }
 0x292   : > { %v1805_v39 = vcombine.high %v1789_v58, %v1789_v58 }
 0x293   : > { %1837 = vrot.lane.b32.xlu1 %v1836_v52, %s2345_s9  ;;  %1745 = vrot.lane.b32.xlu0 %v1744_v17, %s2346_s19  ;;  %v1846_v12 = vcombine.high %v1836_v52, %v1836_v52  ;;  %v1877_v13 = vrot.slane %v1870_v11, %v1720_v24  ;;  %v1882_v30 = vcombine.high %v1865_v41, %v1865_v41 }
 0x295   : > { %v1887_v28 = vcombine.high %v1877_v13, %v1877_v13 }
 0x297   : > { %1842 = vrot.lane.b32.xlu1 %v1841_v3, %s2346_s19  ;;  %1775 = vrot.lane.b32.xlu0 %v1774_v43, %s2347_s25 }
 0x29b   : > { %1866 = vrot.lane.b32.xlu1 %v1865_v41, %s2347_s25  ;;  %1753 = vrot.lane.b32.xlu0 %v1752_v2, %s2348_s11 }
 0x29f   : > { %1847 = vrot.lane.b32.xlu1 %v1846_v12, %s2348_s11  ;;  %1790 = vrot.lane.b32.xlu0 %v1789_v58, %s2349_s30 }
 0x2a3   : > { %1878 = vrot.lane.b32.xlu1 %v1877_v13, %s2349_s30  ;;  %1798 = vrot.lane.b32.xlu0 %v1797_v20, %s2350_s6 }
 0x2a7   : > { %1883 = vrot.lane.b32.xlu1 %v1882_v30, %s2350_s6  ;;  %1806 = vrot.lane.b32.xlu0 %v1805_v39, %s2351_s18 }
 0x2ab   : > { %1888 = vrot.lane.b32.xlu1 %v1887_v28, %s2351_s18 }
 0x301   : > { %v1738_v7 = vpop.permute.xlu0 %1737 }
 0x302   : > { %1743 = vst.msk [vmem:[#allocation4] sm:$0x1] %vm1742_vm12, %v1738_v7 }
 0x305   : > { %v1838_v50 = vpop.permute.xlu1 %1837  ;;  %v1746_v23 = vpop.permute.xlu0 %1745 }
 0x306   : > { %1840 = vst.msk [vmem:[#allocation4 + $0x1] sm:$0x1] %vm1742_vm12, %v1838_v50  ;;  %vm1809_vm12 = vcmp.ge.s32.totalorder %v1709_v16, 112 }
 0x307   : > { %1751 = vst.msk [vmem:[#allocation4] sm:$0x1] %vm1750_vm15, %v1746_v23  ;;  %vm1811_vm14 = vmand %vm1809_vm12, %vm1810_vm13 }
 0x309   : > { %v1843_v47 = vpop.permute.xlu1 %1842  ;;  %v1776_v5 = vpop.permute.xlu0 %1775 }
 0x30a   : > { %1845 = vst.msk [vmem:[#allocation4 + $0x1] sm:$0x1] %vm1750_vm15, %v1843_v47 }
 0x30d   : > { %v1867_v44 = vpop.permute.xlu1 %1866  ;;  %v1754_v53 = vpop.permute.xlu0 %1753 }
 0x30e   : > { %1759 = vst.msk [vmem:[#allocation4] sm:$0x1] %vm1758_vm4, %v1754_v53 }
 0x30f   : > { %1781 = vst.msk [vmem:[#allocation4] sm:$0x1] %vm1780_vm5, %v1776_v5 }
 0x311   : > { %v1848_v57 = vpop.permute.xlu1 %1847  ;;  %v1791_v45 = vpop.permute.xlu0 %1790 }
 0x312   : > { %1850 = vst.msk [vmem:[#allocation4 + $0x1] sm:$0x1] %vm1758_vm4, %v1848_v57 }
 0x313   : > { %1796 = vst.msk [vmem:[#allocation4] sm:$0x1] %vm1795_vm8, %v1791_v45 }
 0x314   : > { %1869 = vst.msk [vmem:[#allocation4 + $0x1] sm:$0x1] %vm1780_vm5, %v1867_v44 }
 0x315   : > { %v1879_v32 = vpop.permute.xlu1 %1878  ;;  %v1799_v19 = vpop.permute.xlu0 %1798 }
 0x316   : > { %1881 = vst.msk [vmem:[#allocation4 + $0x1] sm:$0x1] %vm1795_vm8, %v1879_v32 }
 0x317   : > { %1804 = vst.msk [vmem:[#allocation4] sm:$0x1] %vm1803_vm11, %v1799_v19 }
 0x319   : > { %v1884_v49 = vpop.permute.xlu1 %1883  ;;  %v1807_v10 = vpop.permute.xlu0 %1806 }
 0x31a   : > { %1886 = vst.msk [vmem:[#allocation4 + $0x1] sm:$0x1] %vm1803_vm11, %v1884_v49 }
 0x31b   : > { %1812 = vst.msk [vmem:[#allocation4] sm:$0x1] %vm1811_vm14, %v1807_v10 }
 0x31d   : > { %v1889_v61 = vpop.permute.xlu1 %1888 }
 0x31e   : > { %1891 = vst.msk [vmem:[#allocation4 + $0x1] sm:$0x1] %vm1811_vm14, %v1889_v61 }
 0x325   : > { %v1892_v51 = vld [vmem:[#allocation4] sm:$0x3] }
 0x326   : > { %v1898_v37 = vrot.slane %v1892_v51, %v1897_v29  ;;  %v1902_v35 = vrot.slane %v1892_v51, %v1901_v40 }
 0x328   : > { %v1903_v21 = vcombine.low %v1898_v37, %v1902_v35 }
 0x32a   : > { %v1905_v16 = vmul.f32 %v1903_v21, %v1893_v25 }
 0x32c   : > { %1906 = vst [vmem:[%s201_s2] sm:$0xff] %v1905_v16 }
 0x32d   : > { %2270 = shalt.err (!%p2267_p3)
}
 0x32e   : > { %s2271_s24 = scalar_lea.hbm %s1920_s8, 128  ;;  %s2275_s23 = scalar_lea.hbm %s4459_s4, 256 }
 0x32f   : > { %p2272_p12 = scmp.ne.s32.totalorder %s1920_s8, %s2271_s24  ;;  %p2276_p10 = scmp.lt.s32.totalorder %s1920_s8, %s4459_s4 }
 0x330   : > { %p2277_p6 = scmp.lt.s32.totalorder %s2275_s23, %s2271_s24 }
 0x331   : > { %p2273_p5 = pnand %p2272_p12, %p4460_p9 }
 0x332   : > { %p2278_p4 = por %p2277_p6, %p2276_p10 }
 0x333   : > { %p2274_p7 = pneg %p2273_p5 }
 0x335   : > { %p2279_p8 = pnand %p2278_p4, %p2274_p7 }
 0x337   : > { %2282 = shalt.err (!%p2279_p8)
}
 0x338   : > { %2127 = dma.vmem_to_hbm [thread:$0]  (%p4460_p9), %s1923_s15, 128, %s1920_s8, %s1908_s13  }
 0x339 PF: > { %s4461_s3 = sld [smem:[#allocation15_spill]] }
 0x33a   : > { %s4462_s16 = sld [smem:[#allocation19_spill]] }
 0x33b   : > { %s4463_s5 = sld [smem:[#allocation18_spill]] }
 0x33f   : > { %s1934_s9 = sand.u32 1, %s4461_s3  }
 0x340   : > { %p4464_p11 = scmp.ne.s32.totalorder %s4462_s16, 0  ;;  %s1935_s19 = scalar_lea.sflag [#allocation8], %s1934_s9 }
 0x341   : > { %p4465_p13 = scmp.ge.s32.totalorder %s4463_s5, 2 }
 0x343   : > { %p2138_p2 = pnand %p4465_p13, %p4464_p11 }
 0x345   : > { %p2139_p1 = pneg %p2138_p2 }
 0x347   : > { %2308 = dma.done.wait (%p2139_p1), %s1935_s19, 128  }
 0x348   : > { %2310 = vsyncadd (%p2139_p1), %s1935_s19, 4294967168  ;;  %s4466_s17 = sld [smem:[#allocation20_spill]] }
 0x349   : > { %s4467_s14 = sld [smem:[#allocation16_spill]] }
 0x34a   : > { %s4468_s15 = sld [smem:[#allocation17_spill]] }
 0x34b   : > { %s4469_s16 = sld [smem:[#allocation21_spill]] }
 0x34e   : > { %p18_p0 = scmp.ge.s32.totalorder %s4466_s17, 4  }
 0x350   :  { %20 = sbr.rel (!%p18_p0) target bundleno = 11 (0xb), region = 82 }
 0x355   :  { %1940 = vsyncpa [#allocation7], 1 }
 0x356   :  { %1942 = vsyncpa [#allocation7 + $0x1], 1 }
 0x357   :  { %1943 = vsyncpa [#allocation8], 1 }
 0x358   :  { %1945 = vsyncpa [#allocation8 + $0x1], 1 }
 0x359   :  { %1946 = vsyncpa [#allocation9], 1 }
 0x35a   :  { %1948 = vsyncpa [#allocation9 + $0x1], 1 }

</bundles_post_ra>
